<compile_context>
chip_gen: v7x
topology: tpu7x:2x2x1
jax: 0.10.0
libtpu: 0.0.40
codegen_flags: <defaults>
</compile_context>

<pallas_src>
import functools

import jax
import jax.numpy as jnp
from jax import lax
from jax.experimental import pallas as pl
from jax.experimental.pallas import tpu as pltpu


def _round_up(x, m):
    return (x + m - 1) // m * m


# ----------------------------------------------------------------------------
# Fused Pallas kernel: L LSTM layers + FC head, whole sequence in VMEM.
# ----------------------------------------------------------------------------
def char_rnn_kernel(*refs, n_layers, seq_len):
    """Ref order: x, (w_l, b_l)*L, w_fc, b_fc, h0, c0 | logits, hT, cT | ybuf.

    x      : (T, Bp, Vp)        f32   time-major, padded
    w_l    : (In_p + Hp, 4*Hp)  bf16  fused [W_ih ; W_hh] (transposed, padded)
    b_l    : (1, 4*Hp)          f32   combined b_ih + b_hh (padded)
    w_fc   : (Hp, Vp)           bf16
    b_fc   : (1, Vp)            f32
    h0, c0 : (L, Bp, Hp)        f32
    logits : (T, Bp, Vp)        f32   (FC fused into last layer's time loop)
    hT, cT : (L, Bp, Hp)        f32
    ybuf   : (T, Bp, Hp)        f32   VMEM scratch, inter-layer activations
    """
    x_ref = refs[0]
    w_refs = [refs[1 + 2 * l] for l in range(n_layers)]
    b_refs = [refs[2 + 2 * l] for l in range(n_layers)]
    base = 1 + 2 * n_layers
    wfc_ref, bfc_ref, h0_ref, c0_ref = refs[base:base + 4]
    logits_ref, hT_ref, cT_ref = refs[base + 4:base + 7]
    ybuf = refs[base + 7]

    Bp, Hp = h0_ref.shape[1], h0_ref.shape[2]
    Vp = logits_ref.shape[-1]

    # FC weight / bias: loaded and broadcast once, hoisted out of all loops.
    wfc = wfc_ref[...]                                    # (Hp, Vp) bf16
    bfc = jnp.broadcast_to(bfc_ref[...], (Bp, Vp))        # (Bp, Vp) f32

    for l in range(n_layers):
        last = l == n_layers - 1
        w = w_refs[l][...]                                # (In_p+Hp, 4Hp) bf16
        bias = jnp.broadcast_to(b_refs[l][...], (Bp, 4 * Hp))   # hoisted
        h_init = h0_ref[l].astype(jnp.float32)
        c_init = c0_ref[l].astype(jnp.float32)

        def step(t, carry):
            h, c = carry
            if l == 0:
                x_t = x_ref[t].astype(jnp.bfloat16)       # (Bp, Vp)
            else:
                x_t = ybuf[t].astype(jnp.bfloat16)        # (Bp, Hp)
            # Single fused MXU matmul per step: [x_t ; h] @ [[W_ih];[W_hh]].
            xh = jnp.concatenate([x_t, h.astype(jnp.bfloat16)], axis=-1)
            gates = jnp.dot(xh, w, preferred_element_type=jnp.float32) + bias
            # Lane-tile-aligned gate slices (Hp is a multiple of 128).
            i_g = jax.nn.sigmoid(gates[:, 0 * Hp:1 * Hp])
            f_g = jax.nn.sigmoid(gates[:, 1 * Hp:2 * Hp])
            g_g = jnp.tanh(gates[:, 2 * Hp:3 * Hp])
            o_g = jax.nn.sigmoid(gates[:, 3 * Hp:4 * Hp])
            c_new = f_g * c + i_g * g_g
            h_new = o_g * jnp.tanh(c_new)
            if last:
                # FC head fused into the last layer's recurrence: lane-dense
                # (Vp = multiple of 128) unmasked stores, no HBM round trip.
                logits_ref[t] = (
                    jnp.dot(h_new.astype(jnp.bfloat16), wfc,
                            preferred_element_type=jnp.float32)
                    + bfc).astype(logits_ref.dtype)
            else:
                ybuf[t] = h_new.astype(ybuf.dtype)
            return h_new, c_new

        h_fin, c_fin = lax.fori_loop(0, seq_len, step, (h_init, c_init),
                                     unroll=True)
        hT_ref[l] = h_fin.astype(hT_ref.dtype)
        cT_ref[l] = c_fin.astype(cT_ref.dtype)


# ----------------------------------------------------------------------------
# Wrapper
# ----------------------------------------------------------------------------
def _pack_lstm_layer(w_ih, w_hh, b_ih, b_hh, in_p, h_p):
    """PyTorch (4H, In)/(4H, H) weights -> fused, padded, bf16 MXU layout."""
    four_h, in_sz = w_ih.shape
    H = four_h // 4
    wih_t = jnp.asarray(w_ih, jnp.float32).T              # (In, 4H)
    whh_t = jnp.asarray(w_hh, jnp.float32).T              # (H, 4H)
    bsum = (jnp.asarray(b_ih) + jnp.asarray(b_hh)).reshape(1, 4 * H)
    w = jnp.zeros((in_p + h_p, 4 * h_p), jnp.float32)
    b = jnp.zeros((1, 4 * h_p), jnp.float32)
    for k in range(4):  # i, f, g, o gate blocks -> 128-lane-aligned blocks
        w = w.at[:in_sz, k * h_p:k * h_p + H].set(wih_t[:, k * H:(k + 1) * H])
        w = w.at[in_p:in_p + H, k * h_p:k * h_p + H].set(
            whh_t[:, k * H:(k + 1) * H])
        b = b.at[:, k * h_p:k * h_p + H].set(bsum[:, k * H:(k + 1) * H])
    return w.astype(jnp.bfloat16), b


def char_rnn_forward(x, hc, params):
    """Forward pass matching CharRNN.forward.

    x  : (B, T, V)  float32 (one-hot or dense features), batch_first
    hc : (h0, c0) each (n_layers, B, H)
    returns (logits (B*T, V), (h, c))
    """
    h0_all, c0_all = hc
    B, T, V = x.shape
    L, _, H = h0_all.shape
    Bp = _round_up(B, 8)         # f32 sublanes
    Hp = _round_up(H, 128)       # lanes; 4*Hp multiple of 256 for v6e/v7x MXU
    Vp = _round_up(V, 128)       # lane-dense FC output

    # Time-major, zero-padded input (pad batch to 8, features to 128).
    x_tm = jnp.transpose(x, (1, 0, 2)).astype(jnp.float32)       # (T, B, V)
    x_p = jnp.zeros((T, Bp, Vp), jnp.float32).at[:, :B, :V].set(x_tm)

    # Fused / padded / bf16 weights (done once, outside the kernel).
    packed = []
    for l in range(L):
        in_p = Vp if l == 0 else Hp
        w_l, b_l = _pack_lstm_layer(
            params[f"w_ih_l{l}"], params[f"w_hh_l{l}"],
            params[f"b_ih_l{l}"], params[f"b_hh_l{l}"], in_p, Hp)
        packed += [w_l, b_l]

    wfc = jnp.zeros((Hp, Vp), jnp.float32).at[:H, :V].set(
        jnp.asarray(params["w_fc"], jnp.float32).T).astype(jnp.bfloat16)
    bfc = jnp.zeros((1, Vp), jnp.float32).at[:, :V].set(
        params["b_fc"].reshape(1, V))

    h0_p = jnp.zeros((L, Bp, Hp), jnp.float32).at[:, :B, :H].set(h0_all)
    c0_p = jnp.zeros((L, Bp, Hp), jnp.float32).at[:, :B, :H].set(c0_all)

    kernel = functools.partial(char_rnn_kernel, n_layers=L, seq_len=T)
    vspec = pl.BlockSpec(memory_space=pltpu.MemorySpace.VMEM)
    n_in = 1 + 2 * L + 4

    logits_p, hT_p, cT_p = pl.pallas_call(
        kernel,
        out_shape=(
            jax.ShapeDtypeStruct((T, Bp, Vp), jnp.float32),
            jax.ShapeDtypeStruct((L, Bp, Hp), jnp.float32),
            jax.ShapeDtypeStruct((L, Bp, Hp), jnp.float32),
        ),
        in_specs=[vspec] * n_in,
        out_specs=(vspec, vspec, vspec),
        scratch_shapes=[pltpu.VMEM((T, Bp, Hp), jnp.float32)],
    )(x_p, *packed, wfc, bfc, h0_p, c0_p)

    # Only the small logits tensor is reordered to batch-first (b, t) rows;
    # the large (T,B,H) activation never makes an HBM round trip.
    logits = jnp.transpose(logits_p, (1, 0, 2))[:B, :, :V].reshape(B * T, V)
    return logits, (hT_p[:, :B, :H], cT_p[:, :B, :H])


# ----------------------------------------------------------------------------
# Deterministic parameter construction (shapes from CharRNN.__init__)
# ----------------------------------------------------------------------------
def make_params(key, vocab, n_hidden, n_layers):
    params = {}
    k = 1.0 / jnp.sqrt(n_hidden)
    keys = jax.random.split(key, 4 * n_layers + 2)
    ki = 0
    for l in range(n_layers):
        in_sz = vocab if l == 0 else n_hidden
        params[f"w_ih_l{l}"] = jax.random.uniform(
            keys[ki], (4 * n_hidden, in_sz), jnp.float32, -k, k); ki += 1
        params[f"w_hh_l{l}"] = jax.random.uniform(
            keys[ki], (4 * n_hidden, n_hidden), jnp.float32, -k, k); ki += 1
        params[f"b_ih_l{l}"] = jax.random.uniform(
            keys[ki], (4 * n_hidden,), jnp.float32, -k, k); ki += 1
        params[f"b_hh_l{l}"] = jax.random.uniform(
            keys[ki], (4 * n_hidden,), jnp.float32, -k, k); ki += 1
    # init_weights(): fc.weight ~ U(-1, 1), fc.bias = 0
    params["w_fc"] = jax.random.uniform(
        keys[ki], (vocab, n_hidden), jnp.float32, -1.0, 1.0); ki += 1
    params["b_fc"] = jnp.zeros((vocab,), jnp.float32)
    return params


# ----------------------------------------------------------------------------
# Pure-JAX f32 reference (for correctness check)
# ----------------------------------------------------------------------------
def ref_forward(x, hc, params):
    h0_all, c0_all = hc
    B, T, _ = x.shape
    n_layers = h0_all.shape[0]
    layer_in = x
    h_out, c_out = [], []
    for l in range(n_layers):
        H = h0_all.shape[-1]
        w_ih, w_hh = params[f"w_ih_l{l}"], params[f"w_hh_l{l}"]
        b = params[f"b_ih_l{l}"] + params[f"b_hh_l{l}"]
        h, c = h0_all[l], c0_all[l]
        ys = []
        for t in range(T):
            g = layer_in[:, t, :] @ w_ih.T + h @ w_hh.T + b
            i = jax.nn.sigmoid(g[:, :H])
            f = jax.nn.sigmoid(g[:, H:2 * H])
            gg = jnp.tanh(g[:, 2 * H:3 * H])
            o = jax.nn.sigmoid(g[:, 3 * H:])
            c = f * c + i * gg
            h = o * jnp.tanh(c)
            ys.append(h)
        layer_in = jnp.stack(ys, 1)
        h_out.append(h)
        c_out.append(c)
    flat = layer_in.reshape(B * T, -1)
    logits = flat @ params["w_fc"].T + params["b_fc"]
    return logits, (jnp.stack(h_out, 0), jnp.stack(c_out, 0))


# ----------------------------------------------------------------------------
if __name__ == "__main__":
    # Small shapes consistent with the module: vocab=32 tokens, seq=8,
    # batch=2, hidden=32, 2 LSTM layers.
    VOCAB, HIDDEN, LAYERS = 32, 32, 2
    B, T = 2, 8

    key = jax.random.PRNGKey(0)
    k_par, k_x = jax.random.split(key)
    params = make_params(k_par, VOCAB, HIDDEN, LAYERS)

    # One-hot-encoded character input, like predict()/one_hot_encode.
    ids = jax.random.randint(k_x, (B, T), 0, VOCAB)
    x = jax.nn.one_hot(ids, VOCAB, dtype=jnp.float32)        # (B, T, VOCAB)

    # init_hidden(): zeros of shape (n_layers, B, H)
    h0 = jnp.zeros((LAYERS, B, HIDDEN), jnp.float32)
    c0 = jnp.zeros((LAYERS, B, HIDDEN), jnp.float32)

    logits, (hN, cN) = char_rnn_forward(x, (h0, c0), params)
    jax.block_until_ready((logits, hN, cN))

    # Sanity check against the pure-JAX f32 reference.  Tolerances are
    # loosened because the kernel feeds bf16 operands to the MXU
    # (f32 accumulation).
    ref_logits, (ref_h, ref_c) = ref_forward(x, (h0, c0), params)
    assert logits.shape == (B * T, VOCAB)
    assert hN.shape == (LAYERS, B, HIDDEN) and cN.shape == (LAYERS, B, HIDDEN)
    assert jnp.allclose(logits, ref_logits, atol=1e-1, rtol=1e-1), float(
        jnp.max(jnp.abs(logits - ref_logits)))
    assert jnp.allclose(hN, ref_h, atol=2e-2, rtol=2e-2)
    assert jnp.allclose(cN, ref_c, atol=2e-2, rtol=2e-2)

    print("KERNEL_OK")
</pallas_src>

<mosaic_0001>
module attributes {stable_mosaic.version = 11 : i64} {
  func.func @char_rnn_kernel(%arg0: memref<8x8x128xf32, #tpu.memory_space<vmem>>, %arg1: memref<256x512xbf16, #tpu.memory_space<vmem>>, %arg2: memref<1x512xf32, #tpu.memory_space<vmem>>, %arg3: memref<256x512xbf16, #tpu.memory_space<vmem>>, %arg4: memref<1x512xf32, #tpu.memory_space<vmem>>, %arg5: memref<128x128xbf16, #tpu.memory_space<vmem>>, %arg6: memref<1x128xf32, #tpu.memory_space<vmem>>, %arg7: memref<2x8x128xf32, #tpu.memory_space<vmem>>, %arg8: memref<2x8x128xf32, #tpu.memory_space<vmem>>, %arg9: memref<8x8x128xf32, #tpu.memory_space<vmem>>, %arg10: memref<2x8x128xf32, #tpu.memory_space<vmem>>, %arg11: memref<2x8x128xf32, #tpu.memory_space<vmem>>, %arg12: memref<8x8x128xf32, #tpu.memory_space<vmem>>) attributes {dimension_semantics = [], scalar_prefetch = 0 : i64, scratch_operands = 1 : i64, tpu.core_type = #tpu.core_type<tc>} {
    %c0 = arith.constant 0 : index
    %c0_0 = arith.constant 0 : index
    %0 = vector.load %arg5[%c0, %c0_0] : memref<128x128xbf16, #tpu.memory_space<vmem>>, vector<128x128xbf16>
    %c0_1 = arith.constant 0 : index
    %c0_2 = arith.constant 0 : index
    %1 = vector.load %arg6[%c0_1, %c0_2] : memref<1x128xf32, #tpu.memory_space<vmem>>, vector<1x128xf32>
    %2 = vector.shape_cast %1 : vector<1x128xf32> to vector<1x128xf32>
    %3 = vector.broadcast %2 : vector<1x128xf32> to vector<8x128xf32>
    %c0_3 = arith.constant 0 : index
    %c0_4 = arith.constant 0 : index
    %4 = vector.load %arg1[%c0_3, %c0_4] : memref<256x512xbf16, #tpu.memory_space<vmem>>, vector<256x512xbf16>
    %c0_5 = arith.constant 0 : index
    %c0_6 = arith.constant 0 : index
    %5 = vector.load %arg2[%c0_5, %c0_6] : memref<1x512xf32, #tpu.memory_space<vmem>>, vector<1x512xf32>
    %6 = vector.shape_cast %5 : vector<1x512xf32> to vector<1x512xf32>
    %7 = vector.broadcast %6 : vector<1x512xf32> to vector<8x512xf32>
    %c0_7 = arith.constant 0 : index
    %c0_8 = arith.constant 0 : index
    %c0_9 = arith.constant 0 : index
    %8 = vector.load %arg7[%c0_7, %c0_8, %c0_9] : memref<2x8x128xf32, #tpu.memory_space<vmem>>, vector<1x8x128xf32>
    %9 = vector.shape_cast %8 : vector<1x8x128xf32> to vector<8x128xf32>
    %c0_10 = arith.constant 0 : index
    %c0_11 = arith.constant 0 : index
    %c0_12 = arith.constant 0 : index
    %10 = vector.load %arg8[%c0_10, %c0_11, %c0_12] : memref<2x8x128xf32, #tpu.memory_space<vmem>>, vector<1x8x128xf32>
    %11 = vector.shape_cast %10 : vector<1x8x128xf32> to vector<8x128xf32>
    %c0_i32 = arith.constant 0 : i32
    %12 = arith.index_cast %c0_i32 : i32 to index
    %c0_13 = arith.constant 0 : index
    %c0_14 = arith.constant 0 : index
    %13 = vector.load %arg0[%12, %c0_13, %c0_14] : memref<8x8x128xf32, #tpu.memory_space<vmem>>, vector<1x8x128xf32>
    %14 = vector.shape_cast %13 : vector<1x8x128xf32> to vector<8x128xf32>
    %15 = arith.truncf %14 : vector<8x128xf32> to vector<8x128xbf16>
    %16 = arith.truncf %9 : vector<8x128xf32> to vector<8x128xbf16>
    %17 = tpu.concatenate %15, %16 in 1 : vector<8x128xbf16>, vector<8x128xbf16> -> vector<8x256xbf16>
    %cst = arith.constant dense<0.000000e+00> : vector<8x512xf32>
    %18 = tpu.matmul %17, %4, %cst {dimension_numbers = #tpu.dot_dimension_numbers<[1], [0], [0], [1], [0, 0, 1, 1], [], []>} : vector<8x256xbf16>, vector<256x512xbf16>, vector<8x512xf32> -> vector<8x512xf32>
    %19 = arith.addf %18, %7 : vector<8x512xf32>
    %20 = vector.extract_strided_slice %19 {offsets = [0, 0], sizes = [8, 128], strides = [1, 1]} : vector<8x512xf32> to vector<8x128xf32>
    %21 = arith.negf %20 : vector<8x128xf32>
    %22 = math.exp %21 : vector<8x128xf32>
    %cst_15 = arith.constant 1.000000e+00 : f32
    %23 = vector.broadcast %cst_15 : f32 to vector<8x128xf32>
    %24 = arith.addf %23, %22 : vector<8x128xf32>
    %25 = arith.divf %23, %24 : vector<8x128xf32>
    %26 = vector.extract_strided_slice %19 {offsets = [0, 128], sizes = [8, 128], strides = [1, 1]} : vector<8x512xf32> to vector<8x128xf32>
    %27 = arith.negf %26 : vector<8x128xf32>
    %28 = math.exp %27 : vector<8x128xf32>
    %cst_16 = arith.constant 1.000000e+00 : f32
    %29 = vector.broadcast %cst_16 : f32 to vector<8x128xf32>
    %30 = arith.addf %29, %28 : vector<8x128xf32>
    %31 = arith.divf %29, %30 : vector<8x128xf32>
    %32 = vector.extract_strided_slice %19 {offsets = [0, 256], sizes = [8, 128], strides = [1, 1]} : vector<8x512xf32> to vector<8x128xf32>
    %33 = math.tanh %32 : vector<8x128xf32>
    %34 = vector.extract_strided_slice %19 {offsets = [0, 384], sizes = [8, 128], strides = [1, 1]} : vector<8x512xf32> to vector<8x128xf32>
    %35 = arith.negf %34 : vector<8x128xf32>
    %36 = math.exp %35 : vector<8x128xf32>
    %cst_17 = arith.constant 1.000000e+00 : f32
    %37 = vector.broadcast %cst_17 : f32 to vector<8x128xf32>
    %38 = arith.addf %37, %36 : vector<8x128xf32>
    %39 = arith.divf %37, %38 : vector<8x128xf32>
    %40 = arith.mulf %31, %11 : vector<8x128xf32>
    %41 = arith.mulf %25, %33 : vector<8x128xf32>
    %42 = arith.addf %40, %41 : vector<8x128xf32>
    %43 = math.tanh %42 : vector<8x128xf32>
    %44 = arith.mulf %39, %43 : vector<8x128xf32>
    %45 = arith.index_cast %c0_i32 : i32 to index
    %c0_18 = arith.constant 0 : index
    %c0_19 = arith.constant 0 : index
    %46 = vector.load %arg12[%45, %c0_18, %c0_19] : memref<8x8x128xf32, #tpu.memory_space<vmem>>, vector<1x8x128xf32>
    %47 = vector.shape_cast %46 : vector<1x8x128xf32> to vector<8x128xf32>
    %48 = vector.shape_cast %44 : vector<8x128xf32> to vector<1x8x128xf32>
    tpu.vector_store %arg12[%45, %c0_18, %c0_19], %48 {strides = array<i32>} : memref<8x8x128xf32, #tpu.memory_space<vmem>>, vector<1x8x128xf32>,
    %c1_i32 = arith.constant 1 : i32
    %49 = arith.index_cast %c1_i32 : i32 to index
    %c0_20 = arith.constant 0 : index
    %c0_21 = arith.constant 0 : index
    %50 = vector.load %arg0[%49, %c0_20, %c0_21] : memref<8x8x128xf32, #tpu.memory_space<vmem>>, vector<1x8x128xf32>
    %51 = vector.shape_cast %50 : vector<1x8x128xf32> to vector<8x128xf32>
    %52 = arith.truncf %51 : vector<8x128xf32> to vector<8x128xbf16>
    %53 = arith.truncf %44 : vector<8x128xf32> to vector<8x128xbf16>
    %54 = tpu.concatenate %52, %53 in 1 : vector<8x128xbf16>, vector<8x128xbf16> -> vector<8x256xbf16>
    %cst_22 = arith.constant dense<0.000000e+00> : vector<8x512xf32>
    %55 = tpu.matmul %54, %4, %cst_22 {dimension_numbers = #tpu.dot_dimension_numbers<[1], [0], [0], [1], [0, 0, 1, 1], [], []>} : vector<8x256xbf16>, vector<256x512xbf16>, vector<8x512xf32> -> vector<8x512xf32>
    %56 = arith.addf %55, %7 : vector<8x512xf32>
    %57 = vector.extract_strided_slice %56 {offsets = [0, 0], sizes = [8, 128], strides = [1, 1]} : vector<8x512xf32> to vector<8x128xf32>
    %58 = arith.negf %57 : vector<8x128xf32>
    %59 = math.exp %58 : vector<8x128xf32>
    %cst_23 = arith.constant 1.000000e+00 : f32
    %60 = vector.broadcast %cst_23 : f32 to vector<8x128xf32>
    %61 = arith.addf %60, %59 : vector<8x128xf32>
    %62 = arith.divf %60, %61 : vector<8x128xf32>
    %63 = vector.extract_strided_slice %56 {offsets = [0, 128], sizes = [8, 128], strides = [1, 1]} : vector<8x512xf32> to vector<8x128xf32>
    %64 = arith.negf %63 : vector<8x128xf32>
    %65 = math.exp %64 : vector<8x128xf32>
    %cst_24 = arith.constant 1.000000e+00 : f32
    %66 = vector.broadcast %cst_24 : f32 to vector<8x128xf32>
    %67 = arith.addf %66, %65 : vector<8x128xf32>
    %68 = arith.divf %66, %67 : vector<8x128xf32>
    %69 = vector.extract_strided_slice %56 {offsets = [0, 256], sizes = [8, 128], strides = [1, 1]} : vector<8x512xf32> to vector<8x128xf32>
    %70 = math.tanh %69 : vector<8x128xf32>
    %71 = vector.extract_strided_slice %56 {offsets = [0, 384], sizes = [8, 128], strides = [1, 1]} : vector<8x512xf32> to vector<8x128xf32>
    %72 = arith.negf %71 : vector<8x128xf32>
    %73 = math.exp %72 : vector<8x128xf32>
    %cst_25 = arith.constant 1.000000e+00 : f32
    %74 = vector.broadcast %cst_25 : f32 to vector<8x128xf32>
    %75 = arith.addf %74, %73 : vector<8x128xf32>
    %76 = arith.divf %74, %75 : vector<8x128xf32>
    %77 = arith.mulf %68, %42 : vector<8x128xf32>
    %78 = arith.mulf %62, %70 : vector<8x128xf32>
    %79 = arith.addf %77, %78 : vector<8x128xf32>
    %80 = math.tanh %79 : vector<8x128xf32>
    %81 = arith.mulf %76, %80 : vector<8x128xf32>
    %82 = arith.index_cast %c1_i32 : i32 to index
    %c0_26 = arith.constant 0 : index
    %c0_27 = arith.constant 0 : index
    %83 = vector.load %arg12[%82, %c0_26, %c0_27] : memref<8x8x128xf32, #tpu.memory_space<vmem>>, vector<1x8x128xf32>
    %84 = vector.shape_cast %83 : vector<1x8x128xf32> to vector<8x128xf32>
    %85 = vector.shape_cast %81 : vector<8x128xf32> to vector<1x8x128xf32>
    tpu.vector_store %arg12[%82, %c0_26, %c0_27], %85 {strides = array<i32>} : memref<8x8x128xf32, #tpu.memory_space<vmem>>, vector<1x8x128xf32>,
    %c2_i32 = arith.constant 2 : i32
    %86 = arith.index_cast %c2_i32 : i32 to index
    %c0_28 = arith.constant 0 : index
    %c0_29 = arith.constant 0 : index
    %87 = vector.load %arg0[%86, %c0_28, %c0_29] : memref<8x8x128xf32, #tpu.memory_space<vmem>>, vector<1x8x128xf32>
    %88 = vector.shape_cast %87 : vector<1x8x128xf32> to vector<8x128xf32>
    %89 = arith.truncf %88 : vector<8x128xf32> to vector<8x128xbf16>
    %90 = arith.truncf %81 : vector<8x128xf32> to vector<8x128xbf16>
    %91 = tpu.concatenate %89, %90 in 1 : vector<8x128xbf16>, vector<8x128xbf16> -> vector<8x256xbf16>
    %cst_30 = arith.constant dense<0.000000e+00> : vector<8x512xf32>
    %92 = tpu.matmul %91, %4, %cst_30 {dimension_numbers = #tpu.dot_dimension_numbers<[1], [0], [0], [1], [0, 0, 1, 1], [], []>} : vector<8x256xbf16>, vector<256x512xbf16>, vector<8x512xf32> -> vector<8x512xf32>
    %93 = arith.addf %92, %7 : vector<8x512xf32>
    %94 = vector.extract_strided_slice %93 {offsets = [0, 0], sizes = [8, 128], strides = [1, 1]} : vector<8x512xf32> to vector<8x128xf32>
    %95 = arith.negf %94 : vector<8x128xf32>
    %96 = math.exp %95 : vector<8x128xf32>
    %cst_31 = arith.constant 1.000000e+00 : f32
    %97 = vector.broadcast %cst_31 : f32 to vector<8x128xf32>
    %98 = arith.addf %97, %96 : vector<8x128xf32>
    %99 = arith.divf %97, %98 : vector<8x128xf32>
    %100 = vector.extract_strided_slice %93 {offsets = [0, 128], sizes = [8, 128], strides = [1, 1]} : vector<8x512xf32> to vector<8x128xf32>
    %101 = arith.negf %100 : vector<8x128xf32>
    %102 = math.exp %101 : vector<8x128xf32>
    %cst_32 = arith.constant 1.000000e+00 : f32
    %103 = vector.broadcast %cst_32 : f32 to vector<8x128xf32>
    %104 = arith.addf %103, %102 : vector<8x128xf32>
    %105 = arith.divf %103, %104 : vector<8x128xf32>
    %106 = vector.extract_strided_slice %93 {offsets = [0, 256], sizes = [8, 128], strides = [1, 1]} : vector<8x512xf32> to vector<8x128xf32>
    %107 = math.tanh %106 : vector<8x128xf32>
    %108 = vector.extract_strided_slice %93 {offsets = [0, 384], sizes = [8, 128], strides = [1, 1]} : vector<8x512xf32> to vector<8x128xf32>
    %109 = arith.negf %108 : vector<8x128xf32>
    %110 = math.exp %109 : vector<8x128xf32>
    %cst_33 = arith.constant 1.000000e+00 : f32
    %111 = vector.broadcast %cst_33 : f32 to vector<8x128xf32>
    %112 = arith.addf %111, %110 : vector<8x128xf32>
    %113 = arith.divf %111, %112 : vector<8x128xf32>
    %114 = arith.mulf %105, %79 : vector<8x128xf32>
    %115 = arith.mulf %99, %107 : vector<8x128xf32>
    %116 = arith.addf %114, %115 : vector<8x128xf32>
    %117 = math.tanh %116 : vector<8x128xf32>
    %118 = arith.mulf %113, %117 : vector<8x128xf32>
    %119 = arith.index_cast %c2_i32 : i32 to index
    %c0_34 = arith.constant 0 : index
    %c0_35 = arith.constant 0 : index
    %120 = vector.load %arg12[%119, %c0_34, %c0_35] : memref<8x8x128xf32, #tpu.memory_space<vmem>>, vector<1x8x128xf32>
    %121 = vector.shape_cast %120 : vector<1x8x128xf32> to vector<8x128xf32>
    %122 = vector.shape_cast %118 : vector<8x128xf32> to vector<1x8x128xf32>
    tpu.vector_store %arg12[%119, %c0_34, %c0_35], %122 {strides = array<i32>} : memref<8x8x128xf32, #tpu.memory_space<vmem>>, vector<1x8x128xf32>,
    %c3_i32 = arith.constant 3 : i32
    %123 = arith.index_cast %c3_i32 : i32 to index
    %c0_36 = arith.constant 0 : index
    %c0_37 = arith.constant 0 : index
    %124 = vector.load %arg0[%123, %c0_36, %c0_37] : memref<8x8x128xf32, #tpu.memory_space<vmem>>, vector<1x8x128xf32>
    %125 = vector.shape_cast %124 : vector<1x8x128xf32> to vector<8x128xf32>
    %126 = arith.truncf %125 : vector<8x128xf32> to vector<8x128xbf16>
    %127 = arith.truncf %118 : vector<8x128xf32> to vector<8x128xbf16>
    %128 = tpu.concatenate %126, %127 in 1 : vector<8x128xbf16>, vector<8x128xbf16> -> vector<8x256xbf16>
    %cst_38 = arith.constant dense<0.000000e+00> : vector<8x512xf32>
    %129 = tpu.matmul %128, %4, %cst_38 {dimension_numbers = #tpu.dot_dimension_numbers<[1], [0], [0], [1], [0, 0, 1, 1], [], []>} : vector<8x256xbf16>, vector<256x512xbf16>, vector<8x512xf32> -> vector<8x512xf32>
    %130 = arith.addf %129, %7 : vector<8x512xf32>
    %131 = vector.extract_strided_slice %130 {offsets = [0, 0], sizes = [8, 128], strides = [1, 1]} : vector<8x512xf32> to vector<8x128xf32>
    %132 = arith.negf %131 : vector<8x128xf32>
    %133 = math.exp %132 : vector<8x128xf32>
    %cst_39 = arith.constant 1.000000e+00 : f32
    %134 = vector.broadcast %cst_39 : f32 to vector<8x128xf32>
    %135 = arith.addf %134, %133 : vector<8x128xf32>
    %136 = arith.divf %134, %135 : vector<8x128xf32>
    %137 = vector.extract_strided_slice %130 {offsets = [0, 128], sizes = [8, 128], strides = [1, 1]} : vector<8x512xf32> to vector<8x128xf32>
    %138 = arith.negf %137 : vector<8x128xf32>
    %139 = math.exp %138 : vector<8x128xf32>
    %cst_40 = arith.constant 1.000000e+00 : f32
    %140 = vector.broadcast %cst_40 : f32 to vector<8x128xf32>
    %141 = arith.addf %140, %139 : vector<8x128xf32>
    %142 = arith.divf %140, %141 : vector<8x128xf32>
    %143 = vector.extract_strided_slice %130 {offsets = [0, 256], sizes = [8, 128], strides = [1, 1]} : vector<8x512xf32> to vector<8x128xf32>
    %144 = math.tanh %143 : vector<8x128xf32>
    %145 = vector.extract_strided_slice %130 {offsets = [0, 384], sizes = [8, 128], strides = [1, 1]} : vector<8x512xf32> to vector<8x128xf32>
    %146 = arith.negf %145 : vector<8x128xf32>
    %147 = math.exp %146 : vector<8x128xf32>
    %cst_41 = arith.constant 1.000000e+00 : f32
    %148 = vector.broadcast %cst_41 : f32 to vector<8x128xf32>
    %149 = arith.addf %148, %147 : vector<8x128xf32>
    %150 = arith.divf %148, %149 : vector<8x128xf32>
    %151 = arith.mulf %142, %116 : vector<8x128xf32>
    %152 = arith.mulf %136, %144 : vector<8x128xf32>
    %153 = arith.addf %151, %152 : vector<8x128xf32>
    %154 = math.tanh %153 : vector<8x128xf32>
    %155 = arith.mulf %150, %154 : vector<8x128xf32>
    %156 = arith.index_cast %c3_i32 : i32 to index
    %c0_42 = arith.constant 0 : index
    %c0_43 = arith.constant 0 : index
    %157 = vector.load %arg12[%156, %c0_42, %c0_43] : memref<8x8x128xf32, #tpu.memory_space<vmem>>, vector<1x8x128xf32>
    %158 = vector.shape_cast %157 : vector<1x8x128xf32> to vector<8x128xf32>
    %159 = vector.shape_cast %155 : vector<8x128xf32> to vector<1x8x128xf32>
    tpu.vector_store %arg12[%156, %c0_42, %c0_43], %159 {strides = array<i32>} : memref<8x8x128xf32, #tpu.memory_space<vmem>>, vector<1x8x128xf32>,
    %c4_i32 = arith.constant 4 : i32
    %160 = arith.index_cast %c4_i32 : i32 to index
    %c0_44 = arith.constant 0 : index
    %c0_45 = arith.constant 0 : index
    %161 = vector.load %arg0[%160, %c0_44, %c0_45] : memref<8x8x128xf32, #tpu.memory_space<vmem>>, vector<1x8x128xf32>
    %162 = vector.shape_cast %161 : vector<1x8x128xf32> to vector<8x128xf32>
    %163 = arith.truncf %162 : vector<8x128xf32> to vector<8x128xbf16>
    %164 = arith.truncf %155 : vector<8x128xf32> to vector<8x128xbf16>
    %165 = tpu.concatenate %163, %164 in 1 : vector<8x128xbf16>, vector<8x128xbf16> -> vector<8x256xbf16>
    %cst_46 = arith.constant dense<0.000000e+00> : vector<8x512xf32>
    %166 = tpu.matmul %165, %4, %cst_46 {dimension_numbers = #tpu.dot_dimension_numbers<[1], [0], [0], [1], [0, 0, 1, 1], [], []>} : vector<8x256xbf16>, vector<256x512xbf16>, vector<8x512xf32> -> vector<8x512xf32>
    %167 = arith.addf %166, %7 : vector<8x512xf32>
    %168 = vector.extract_strided_slice %167 {offsets = [0, 0], sizes = [8, 128], strides = [1, 1]} : vector<8x512xf32> to vector<8x128xf32>
    %169 = arith.negf %168 : vector<8x128xf32>
    %170 = math.exp %169 : vector<8x128xf32>
    %cst_47 = arith.constant 1.000000e+00 : f32
    %171 = vector.broadcast %cst_47 : f32 to vector<8x128xf32>
    %172 = arith.addf %171, %170 : vector<8x128xf32>
    %173 = arith.divf %171, %172 : vector<8x128xf32>
    %174 = vector.extract_strided_slice %167 {offsets = [0, 128], sizes = [8, 128], strides = [1, 1]} : vector<8x512xf32> to vector<8x128xf32>
    %175 = arith.negf %174 : vector<8x128xf32>
    %176 = math.exp %175 : vector<8x128xf32>
    %cst_48 = arith.constant 1.000000e+00 : f32
    %177 = vector.broadcast %cst_48 : f32 to vector<8x128xf32>
    %178 = arith.addf %177, %176 : vector<8x128xf32>
    %179 = arith.divf %177, %178 : vector<8x128xf32>
    %180 = vector.extract_strided_slice %167 {offsets = [0, 256], sizes = [8, 128], strides = [1, 1]} : vector<8x512xf32> to vector<8x128xf32>
    %181 = math.tanh %180 : vector<8x128xf32>
    %182 = vector.extract_strided_slice %167 {offsets = [0, 384], sizes = [8, 128], strides = [1, 1]} : vector<8x512xf32> to vector<8x128xf32>
    %183 = arith.negf %182 : vector<8x128xf32>
    %184 = math.exp %183 : vector<8x128xf32>
    %cst_49 = arith.constant 1.000000e+00 : f32
    %185 = vector.broadcast %cst_49 : f32 to vector<8x128xf32>
    %186 = arith.addf %185, %184 : vector<8x128xf32>
    %187 = arith.divf %185, %186 : vector<8x128xf32>
    %188 = arith.mulf %179, %153 : vector<8x128xf32>
    %189 = arith.mulf %173, %181 : vector<8x128xf32>
    %190 = arith.addf %188, %189 : vector<8x128xf32>
    %191 = math.tanh %190 : vector<8x128xf32>
    %192 = arith.mulf %187, %191 : vector<8x128xf32>
    %193 = arith.index_cast %c4_i32 : i32 to index
    %c0_50 = arith.constant 0 : index
    %c0_51 = arith.constant 0 : index
    %194 = vector.load %arg12[%193, %c0_50, %c0_51] : memref<8x8x128xf32, #tpu.memory_space<vmem>>, vector<1x8x128xf32>
    %195 = vector.shape_cast %194 : vector<1x8x128xf32> to vector<8x128xf32>
    %196 = vector.shape_cast %192 : vector<8x128xf32> to vector<1x8x128xf32>
    tpu.vector_store %arg12[%193, %c0_50, %c0_51], %196 {strides = array<i32>} : memref<8x8x128xf32, #tpu.memory_space<vmem>>, vector<1x8x128xf32>,
    %c5_i32 = arith.constant 5 : i32
    %197 = arith.index_cast %c5_i32 : i32 to index
    %c0_52 = arith.constant 0 : index
    %c0_53 = arith.constant 0 : index
    %198 = vector.load %arg0[%197, %c0_52, %c0_53] : memref<8x8x128xf32, #tpu.memory_space<vmem>>, vector<1x8x128xf32>
    %199 = vector.shape_cast %198 : vector<1x8x128xf32> to vector<8x128xf32>
    %200 = arith.truncf %199 : vector<8x128xf32> to vector<8x128xbf16>
    %201 = arith.truncf %192 : vector<8x128xf32> to vector<8x128xbf16>
    %202 = tpu.concatenate %200, %201 in 1 : vector<8x128xbf16>, vector<8x128xbf16> -> vector<8x256xbf16>
    %cst_54 = arith.constant dense<0.000000e+00> : vector<8x512xf32>
    %203 = tpu.matmul %202, %4, %cst_54 {dimension_numbers = #tpu.dot_dimension_numbers<[1], [0], [0], [1], [0, 0, 1, 1], [], []>} : vector<8x256xbf16>, vector<256x512xbf16>, vector<8x512xf32> -> vector<8x512xf32>
    %204 = arith.addf %203, %7 : vector<8x512xf32>
    %205 = vector.extract_strided_slice %204 {offsets = [0, 0], sizes = [8, 128], strides = [1, 1]} : vector<8x512xf32> to vector<8x128xf32>
    %206 = arith.negf %205 : vector<8x128xf32>
    %207 = math.exp %206 : vector<8x128xf32>
    %cst_55 = arith.constant 1.000000e+00 : f32
    %208 = vector.broadcast %cst_55 : f32 to vector<8x128xf32>
    %209 = arith.addf %208, %207 : vector<8x128xf32>
    %210 = arith.divf %208, %209 : vector<8x128xf32>
    %211 = vector.extract_strided_slice %204 {offsets = [0, 128], sizes = [8, 128], strides = [1, 1]} : vector<8x512xf32> to vector<8x128xf32>
    %212 = arith.negf %211 : vector<8x128xf32>
    %213 = math.exp %212 : vector<8x128xf32>
    %cst_56 = arith.constant 1.000000e+00 : f32
    %214 = vector.broadcast %cst_56 : f32 to vector<8x128xf32>
    %215 = arith.addf %214, %213 : vector<8x128xf32>
    %216 = arith.divf %214, %215 : vector<8x128xf32>
    %217 = vector.extract_strided_slice %204 {offsets = [0, 256], sizes = [8, 128], strides = [1, 1]} : vector<8x512xf32> to vector<8x128xf32>
    %218 = math.tanh %217 : vector<8x128xf32>
    %219 = vector.extract_strided_slice %204 {offsets = [0, 384], sizes = [8, 128], strides = [1, 1]} : vector<8x512xf32> to vector<8x128xf32>
    %220 = arith.negf %219 : vector<8x128xf32>
    %221 = math.exp %220 : vector<8x128xf32>
    %cst_57 = arith.constant 1.000000e+00 : f32
    %222 = vector.broadcast %cst_57 : f32 to vector<8x128xf32>
    %223 = arith.addf %222, %221 : vector<8x128xf32>
    %224 = arith.divf %222, %223 : vector<8x128xf32>
    %225 = arith.mulf %216, %190 : vector<8x128xf32>
    %226 = arith.mulf %210, %218 : vector<8x128xf32>
    %227 = arith.addf %225, %226 : vector<8x128xf32>
    %228 = math.tanh %227 : vector<8x128xf32>
    %229 = arith.mulf %224, %228 : vector<8x128xf32>
    %230 = arith.index_cast %c5_i32 : i32 to index
    %c0_58 = arith.constant 0 : index
    %c0_59 = arith.constant 0 : index
    %231 = vector.load %arg12[%230, %c0_58, %c0_59] : memref<8x8x128xf32, #tpu.memory_space<vmem>>, vector<1x8x128xf32>
    %232 = vector.shape_cast %231 : vector<1x8x128xf32> to vector<8x128xf32>
    %233 = vector.shape_cast %229 : vector<8x128xf32> to vector<1x8x128xf32>
    tpu.vector_store %arg12[%230, %c0_58, %c0_59], %233 {strides = array<i32>} : memref<8x8x128xf32, #tpu.memory_space<vmem>>, vector<1x8x128xf32>,
    %c6_i32 = arith.constant 6 : i32
    %234 = arith.index_cast %c6_i32 : i32 to index
    %c0_60 = arith.constant 0 : index
    %c0_61 = arith.constant 0 : index
    %235 = vector.load %arg0[%234, %c0_60, %c0_61] : memref<8x8x128xf32, #tpu.memory_space<vmem>>, vector<1x8x128xf32>
    %236 = vector.shape_cast %235 : vector<1x8x128xf32> to vector<8x128xf32>
    %237 = arith.truncf %236 : vector<8x128xf32> to vector<8x128xbf16>
    %238 = arith.truncf %229 : vector<8x128xf32> to vector<8x128xbf16>
    %239 = tpu.concatenate %237, %238 in 1 : vector<8x128xbf16>, vector<8x128xbf16> -> vector<8x256xbf16>
    %cst_62 = arith.constant dense<0.000000e+00> : vector<8x512xf32>
    %240 = tpu.matmul %239, %4, %cst_62 {dimension_numbers = #tpu.dot_dimension_numbers<[1], [0], [0], [1], [0, 0, 1, 1], [], []>} : vector<8x256xbf16>, vector<256x512xbf16>, vector<8x512xf32> -> vector<8x512xf32>
    %241 = arith.addf %240, %7 : vector<8x512xf32>
    %242 = vector.extract_strided_slice %241 {offsets = [0, 0], sizes = [8, 128], strides = [1, 1]} : vector<8x512xf32> to vector<8x128xf32>
    %243 = arith.negf %242 : vector<8x128xf32>
    %244 = math.exp %243 : vector<8x128xf32>
    %cst_63 = arith.constant 1.000000e+00 : f32
    %245 = vector.broadcast %cst_63 : f32 to vector<8x128xf32>
    %246 = arith.addf %245, %244 : vector<8x128xf32>
    %247 = arith.divf %245, %246 : vector<8x128xf32>
    %248 = vector.extract_strided_slice %241 {offsets = [0, 128], sizes = [8, 128], strides = [1, 1]} : vector<8x512xf32> to vector<8x128xf32>
    %249 = arith.negf %248 : vector<8x128xf32>
    %250 = math.exp %249 : vector<8x128xf32>
    %cst_64 = arith.constant 1.000000e+00 : f32
    %251 = vector.broadcast %cst_64 : f32 to vector<8x128xf32>
    %252 = arith.addf %251, %250 : vector<8x128xf32>
    %253 = arith.divf %251, %252 : vector<8x128xf32>
    %254 = vector.extract_strided_slice %241 {offsets = [0, 256], sizes = [8, 128], strides = [1, 1]} : vector<8x512xf32> to vector<8x128xf32>
    %255 = math.tanh %254 : vector<8x128xf32>
    %256 = vector.extract_strided_slice %241 {offsets = [0, 384], sizes = [8, 128], strides = [1, 1]} : vector<8x512xf32> to vector<8x128xf32>
    %257 = arith.negf %256 : vector<8x128xf32>
    %258 = math.exp %257 : vector<8x128xf32>
    %cst_65 = arith.constant 1.000000e+00 : f32
    %259 = vector.broadcast %cst_65 : f32 to vector<8x128xf32>
    %260 = arith.addf %259, %258 : vector<8x128xf32>
    %261 = arith.divf %259, %260 : vector<8x128xf32>
    %262 = arith.mulf %253, %227 : vector<8x128xf32>
    %263 = arith.mulf %247, %255 : vector<8x128xf32>
    %264 = arith.addf %262, %263 : vector<8x128xf32>
    %265 = math.tanh %264 : vector<8x128xf32>
    %266 = arith.mulf %261, %265 : vector<8x128xf32>
    %267 = arith.index_cast %c6_i32 : i32 to index
    %c0_66 = arith.constant 0 : index
    %c0_67 = arith.constant 0 : index
    %268 = vector.load %arg12[%267, %c0_66, %c0_67] : memref<8x8x128xf32, #tpu.memory_space<vmem>>, vector<1x8x128xf32>
    %269 = vector.shape_cast %268 : vector<1x8x128xf32> to vector<8x128xf32>
    %270 = vector.shape_cast %266 : vector<8x128xf32> to vector<1x8x128xf32>
    tpu.vector_store %arg12[%267, %c0_66, %c0_67], %270 {strides = array<i32>} : memref<8x8x128xf32, #tpu.memory_space<vmem>>, vector<1x8x128xf32>,
    %c7_i32 = arith.constant 7 : i32
    %271 = arith.index_cast %c7_i32 : i32 to index
    %c0_68 = arith.constant 0 : index
    %c0_69 = arith.constant 0 : index
    %272 = vector.load %arg0[%271, %c0_68, %c0_69] : memref<8x8x128xf32, #tpu.memory_space<vmem>>, vector<1x8x128xf32>
    %273 = vector.shape_cast %272 : vector<1x8x128xf32> to vector<8x128xf32>
    %274 = arith.truncf %273 : vector<8x128xf32> to vector<8x128xbf16>
    %275 = arith.truncf %266 : vector<8x128xf32> to vector<8x128xbf16>
    %276 = tpu.concatenate %274, %275 in 1 : vector<8x128xbf16>, vector<8x128xbf16> -> vector<8x256xbf16>
    %cst_70 = arith.constant dense<0.000000e+00> : vector<8x512xf32>
    %277 = tpu.matmul %276, %4, %cst_70 {dimension_numbers = #tpu.dot_dimension_numbers<[1], [0], [0], [1], [0, 0, 1, 1], [], []>} : vector<8x256xbf16>, vector<256x512xbf16>, vector<8x512xf32> -> vector<8x512xf32>
    %278 = arith.addf %277, %7 : vector<8x512xf32>
    %279 = vector.extract_strided_slice %278 {offsets = [0, 0], sizes = [8, 128], strides = [1, 1]} : vector<8x512xf32> to vector<8x128xf32>
    %280 = arith.negf %279 : vector<8x128xf32>
    %281 = math.exp %280 : vector<8x128xf32>
    %cst_71 = arith.constant 1.000000e+00 : f32
    %282 = vector.broadcast %cst_71 : f32 to vector<8x128xf32>
    %283 = arith.addf %282, %281 : vector<8x128xf32>
    %284 = arith.divf %282, %283 : vector<8x128xf32>
    %285 = vector.extract_strided_slice %278 {offsets = [0, 128], sizes = [8, 128], strides = [1, 1]} : vector<8x512xf32> to vector<8x128xf32>
    %286 = arith.negf %285 : vector<8x128xf32>
    %287 = math.exp %286 : vector<8x128xf32>
    %cst_72 = arith.constant 1.000000e+00 : f32
    %288 = vector.broadcast %cst_72 : f32 to vector<8x128xf32>
    %289 = arith.addf %288, %287 : vector<8x128xf32>
    %290 = arith.divf %288, %289 : vector<8x128xf32>
    %291 = vector.extract_strided_slice %278 {offsets = [0, 256], sizes = [8, 128], strides = [1, 1]} : vector<8x512xf32> to vector<8x128xf32>
    %292 = math.tanh %291 : vector<8x128xf32>
    %293 = vector.extract_strided_slice %278 {offsets = [0, 384], sizes = [8, 128], strides = [1, 1]} : vector<8x512xf32> to vector<8x128xf32>
    %294 = arith.negf %293 : vector<8x128xf32>
    %295 = math.exp %294 : vector<8x128xf32>
    %cst_73 = arith.constant 1.000000e+00 : f32
    %296 = vector.broadcast %cst_73 : f32 to vector<8x128xf32>
    %297 = arith.addf %296, %295 : vector<8x128xf32>
    %298 = arith.divf %296, %297 : vector<8x128xf32>
    %299 = arith.mulf %290, %264 : vector<8x128xf32>
    %300 = arith.mulf %284, %292 : vector<8x128xf32>
    %301 = arith.addf %299, %300 : vector<8x128xf32>
    %302 = math.tanh %301 : vector<8x128xf32>
    %303 = arith.mulf %298, %302 : vector<8x128xf32>
    %304 = arith.index_cast %c7_i32 : i32 to index
    %c0_74 = arith.constant 0 : index
    %c0_75 = arith.constant 0 : index
    %305 = vector.load %arg12[%304, %c0_74, %c0_75] : memref<8x8x128xf32, #tpu.memory_space<vmem>>, vector<1x8x128xf32>
    %306 = vector.shape_cast %305 : vector<1x8x128xf32> to vector<8x128xf32>
    %307 = vector.shape_cast %303 : vector<8x128xf32> to vector<1x8x128xf32>
    tpu.vector_store %arg12[%304, %c0_74, %c0_75], %307 {strides = array<i32>} : memref<8x8x128xf32, #tpu.memory_space<vmem>>, vector<1x8x128xf32>,
    %c8_i32 = arith.constant 8 : i32
    %c0_76 = arith.constant 0 : index
    %c0_77 = arith.constant 0 : index
    %c0_78 = arith.constant 0 : index
    %308 = vector.load %arg10[%c0_76, %c0_77, %c0_78] : memref<2x8x128xf32, #tpu.memory_space<vmem>>, vector<1x8x128xf32>
    %309 = vector.shape_cast %308 : vector<1x8x128xf32> to vector<8x128xf32>
    %310 = vector.shape_cast %303 : vector<8x128xf32> to vector<1x8x128xf32>
    tpu.vector_store %arg10[%c0_76, %c0_77, %c0_78], %310 {strides = array<i32>} : memref<2x8x128xf32, #tpu.memory_space<vmem>>, vector<1x8x128xf32>,
    %c0_79 = arith.constant 0 : index
    %c0_80 = arith.constant 0 : index
    %c0_81 = arith.constant 0 : index
    %311 = vector.load %arg11[%c0_79, %c0_80, %c0_81] : memref<2x8x128xf32, #tpu.memory_space<vmem>>, vector<1x8x128xf32>
    %312 = vector.shape_cast %311 : vector<1x8x128xf32> to vector<8x128xf32>
    %313 = vector.shape_cast %301 : vector<8x128xf32> to vector<1x8x128xf32>
    tpu.vector_store %arg11[%c0_79, %c0_80, %c0_81], %313 {strides = array<i32>} : memref<2x8x128xf32, #tpu.memory_space<vmem>>, vector<1x8x128xf32>,
    %c0_82 = arith.constant 0 : index
    %c0_83 = arith.constant 0 : index
    %314 = vector.load %arg3[%c0_82, %c0_83] : memref<256x512xbf16, #tpu.memory_space<vmem>>, vector<256x512xbf16>
    %c0_84 = arith.constant 0 : index
    %c0_85 = arith.constant 0 : index
    %315 = vector.load %arg4[%c0_84, %c0_85] : memref<1x512xf32, #tpu.memory_space<vmem>>, vector<1x512xf32>
    %316 = vector.shape_cast %315 : vector<1x512xf32> to vector<1x512xf32>
    %317 = vector.broadcast %316 : vector<1x512xf32> to vector<8x512xf32>
    %c1 = arith.constant 1 : index
    %c0_86 = arith.constant 0 : index
    %c0_87 = arith.constant 0 : index
    %318 = vector.load %arg7[%c1, %c0_86, %c0_87] : memref<2x8x128xf32, #tpu.memory_space<vmem>>, vector<1x8x128xf32>
    %319 = vector.shape_cast %318 : vector<1x8x128xf32> to vector<8x128xf32>
    %c1_88 = arith.constant 1 : index
    %c0_89 = arith.constant 0 : index
    %c0_90 = arith.constant 0 : index
    %320 = vector.load %arg8[%c1_88, %c0_89, %c0_90] : memref<2x8x128xf32, #tpu.memory_space<vmem>>, vector<1x8x128xf32>
    %321 = vector.shape_cast %320 : vector<1x8x128xf32> to vector<8x128xf32>
    %c0_i32_91 = arith.constant 0 : i32
    %322 = arith.index_cast %c0_i32_91 : i32 to index
    %c0_92 = arith.constant 0 : index
    %c0_93 = arith.constant 0 : index
    %323 = vector.load %arg12[%322, %c0_92, %c0_93] : memref<8x8x128xf32, #tpu.memory_space<vmem>>, vector<1x8x128xf32>
    %324 = vector.shape_cast %323 : vector<1x8x128xf32> to vector<8x128xf32>
    %325 = arith.truncf %324 : vector<8x128xf32> to vector<8x128xbf16>
    %326 = arith.truncf %319 : vector<8x128xf32> to vector<8x128xbf16>
    %327 = tpu.concatenate %325, %326 in 1 : vector<8x128xbf16>, vector<8x128xbf16> -> vector<8x256xbf16>
    %cst_94 = arith.constant dense<0.000000e+00> : vector<8x512xf32>
    %328 = tpu.matmul %327, %314, %cst_94 {dimension_numbers = #tpu.dot_dimension_numbers<[1], [0], [0], [1], [0, 0, 1, 1], [], []>} : vector<8x256xbf16>, vector<256x512xbf16>, vector<8x512xf32> -> vector<8x512xf32>
    %329 = arith.addf %328, %317 : vector<8x512xf32>
    %330 = vector.extract_strided_slice %329 {offsets = [0, 0], sizes = [8, 128], strides = [1, 1]} : vector<8x512xf32> to vector<8x128xf32>
    %331 = arith.negf %330 : vector<8x128xf32>
    %332 = math.exp %331 : vector<8x128xf32>
    %cst_95 = arith.constant 1.000000e+00 : f32
    %333 = vector.broadcast %cst_95 : f32 to vector<8x128xf32>
    %334 = arith.addf %333, %332 : vector<8x128xf32>
    %335 = arith.divf %333, %334 : vector<8x128xf32>
    %336 = vector.extract_strided_slice %329 {offsets = [0, 128], sizes = [8, 128], strides = [1, 1]} : vector<8x512xf32> to vector<8x128xf32>
    %337 = arith.negf %336 : vector<8x128xf32>
    %338 = math.exp %337 : vector<8x128xf32>
    %cst_96 = arith.constant 1.000000e+00 : f32
    %339 = vector.broadcast %cst_96 : f32 to vector<8x128xf32>
    %340 = arith.addf %339, %338 : vector<8x128xf32>
    %341 = arith.divf %339, %340 : vector<8x128xf32>
    %342 = vector.extract_strided_slice %329 {offsets = [0, 256], sizes = [8, 128], strides = [1, 1]} : vector<8x512xf32> to vector<8x128xf32>
    %343 = math.tanh %342 : vector<8x128xf32>
    %344 = vector.extract_strided_slice %329 {offsets = [0, 384], sizes = [8, 128], strides = [1, 1]} : vector<8x512xf32> to vector<8x128xf32>
    %345 = arith.negf %344 : vector<8x128xf32>
    %346 = math.exp %345 : vector<8x128xf32>
    %cst_97 = arith.constant 1.000000e+00 : f32
    %347 = vector.broadcast %cst_97 : f32 to vector<8x128xf32>
    %348 = arith.addf %347, %346 : vector<8x128xf32>
    %349 = arith.divf %347, %348 : vector<8x128xf32>
    %350 = arith.mulf %341, %321 : vector<8x128xf32>
    %351 = arith.mulf %335, %343 : vector<8x128xf32>
    %352 = arith.addf %350, %351 : vector<8x128xf32>
    %353 = math.tanh %352 : vector<8x128xf32>
    %354 = arith.mulf %349, %353 : vector<8x128xf32>
    %355 = arith.truncf %354 : vector<8x128xf32> to vector<8x128xbf16>
    %cst_98 = arith.constant dense<0.000000e+00> : vector<8x128xf32>
    %356 = tpu.matmul %355, %0, %cst_98 {dimension_numbers = #tpu.dot_dimension_numbers<[1], [0], [0], [1], [0, 0, 1, 1], [], []>} : vector<8x128xbf16>, vector<128x128xbf16>, vector<8x128xf32> -> vector<8x128xf32>
    %357 = arith.addf %356, %3 : vector<8x128xf32>
    %358 = arith.index_cast %c0_i32_91 : i32 to index
    %c0_99 = arith.constant 0 : index
    %c0_100 = arith.constant 0 : index
    %359 = vector.load %arg9[%358, %c0_99, %c0_100] : memref<8x8x128xf32, #tpu.memory_space<vmem>>, vector<1x8x128xf32>
    %360 = vector.shape_cast %359 : vector<1x8x128xf32> to vector<8x128xf32>
    %361 = vector.shape_cast %357 : vector<8x128xf32> to vector<1x8x128xf32>
    tpu.vector_store %arg9[%358, %c0_99, %c0_100], %361 {strides = array<i32>} : memref<8x8x128xf32, #tpu.memory_space<vmem>>, vector<1x8x128xf32>,
    %c1_i32_101 = arith.constant 1 : i32
    %362 = arith.index_cast %c1_i32_101 : i32 to index
    %c0_102 = arith.constant 0 : index
    %c0_103 = arith.constant 0 : index
    %363 = vector.load %arg12[%362, %c0_102, %c0_103] : memref<8x8x128xf32, #tpu.memory_space<vmem>>, vector<1x8x128xf32>
    %364 = vector.shape_cast %363 : vector<1x8x128xf32> to vector<8x128xf32>
    %365 = arith.truncf %364 : vector<8x128xf32> to vector<8x128xbf16>
    %366 = arith.truncf %354 : vector<8x128xf32> to vector<8x128xbf16>
    %367 = tpu.concatenate %365, %366 in 1 : vector<8x128xbf16>, vector<8x128xbf16> -> vector<8x256xbf16>
    %cst_104 = arith.constant dense<0.000000e+00> : vector<8x512xf32>
    %368 = tpu.matmul %367, %314, %cst_104 {dimension_numbers = #tpu.dot_dimension_numbers<[1], [0], [0], [1], [0, 0, 1, 1], [], []>} : vector<8x256xbf16>, vector<256x512xbf16>, vector<8x512xf32> -> vector<8x512xf32>
    %369 = arith.addf %368, %317 : vector<8x512xf32>
    %370 = vector.extract_strided_slice %369 {offsets = [0, 0], sizes = [8, 128], strides = [1, 1]} : vector<8x512xf32> to vector<8x128xf32>
    %371 = arith.negf %370 : vector<8x128xf32>
    %372 = math.exp %371 : vector<8x128xf32>
    %cst_105 = arith.constant 1.000000e+00 : f32
    %373 = vector.broadcast %cst_105 : f32 to vector<8x128xf32>
    %374 = arith.addf %373, %372 : vector<8x128xf32>
    %375 = arith.divf %373, %374 : vector<8x128xf32>
    %376 = vector.extract_strided_slice %369 {offsets = [0, 128], sizes = [8, 128], strides = [1, 1]} : vector<8x512xf32> to vector<8x128xf32>
    %377 = arith.negf %376 : vector<8x128xf32>
    %378 = math.exp %377 : vector<8x128xf32>
    %cst_106 = arith.constant 1.000000e+00 : f32
    %379 = vector.broadcast %cst_106 : f32 to vector<8x128xf32>
    %380 = arith.addf %379, %378 : vector<8x128xf32>
    %381 = arith.divf %379, %380 : vector<8x128xf32>
    %382 = vector.extract_strided_slice %369 {offsets = [0, 256], sizes = [8, 128], strides = [1, 1]} : vector<8x512xf32> to vector<8x128xf32>
    %383 = math.tanh %382 : vector<8x128xf32>
    %384 = vector.extract_strided_slice %369 {offsets = [0, 384], sizes = [8, 128], strides = [1, 1]} : vector<8x512xf32> to vector<8x128xf32>
    %385 = arith.negf %384 : vector<8x128xf32>
    %386 = math.exp %385 : vector<8x128xf32>
    %cst_107 = arith.constant 1.000000e+00 : f32
    %387 = vector.broadcast %cst_107 : f32 to vector<8x128xf32>
    %388 = arith.addf %387, %386 : vector<8x128xf32>
    %389 = arith.divf %387, %388 : vector<8x128xf32>
    %390 = arith.mulf %381, %352 : vector<8x128xf32>
    %391 = arith.mulf %375, %383 : vector<8x128xf32>
    %392 = arith.addf %390, %391 : vector<8x128xf32>
    %393 = math.tanh %392 : vector<8x128xf32>
    %394 = arith.mulf %389, %393 : vector<8x128xf32>
    %395 = arith.truncf %394 : vector<8x128xf32> to vector<8x128xbf16>
    %cst_108 = arith.constant dense<0.000000e+00> : vector<8x128xf32>
    %396 = tpu.matmul %395, %0, %cst_108 {dimension_numbers = #tpu.dot_dimension_numbers<[1], [0], [0], [1], [0, 0, 1, 1], [], []>} : vector<8x128xbf16>, vector<128x128xbf16>, vector<8x128xf32> -> vector<8x128xf32>
    %397 = arith.addf %396, %3 : vector<8x128xf32>
    %398 = arith.index_cast %c1_i32_101 : i32 to index
    %c0_109 = arith.constant 0 : index
    %c0_110 = arith.constant 0 : index
    %399 = vector.load %arg9[%398, %c0_109, %c0_110] : memref<8x8x128xf32, #tpu.memory_space<vmem>>, vector<1x8x128xf32>
    %400 = vector.shape_cast %399 : vector<1x8x128xf32> to vector<8x128xf32>
    %401 = vector.shape_cast %397 : vector<8x128xf32> to vector<1x8x128xf32>
    tpu.vector_store %arg9[%398, %c0_109, %c0_110], %401 {strides = array<i32>} : memref<8x8x128xf32, #tpu.memory_space<vmem>>, vector<1x8x128xf32>,
    %c2_i32_111 = arith.constant 2 : i32
    %402 = arith.index_cast %c2_i32_111 : i32 to index
    %c0_112 = arith.constant 0 : index
    %c0_113 = arith.constant 0 : index
    %403 = vector.load %arg12[%402, %c0_112, %c0_113] : memref<8x8x128xf32, #tpu.memory_space<vmem>>, vector<1x8x128xf32>
    %404 = vector.shape_cast %403 : vector<1x8x128xf32> to vector<8x128xf32>
    %405 = arith.truncf %404 : vector<8x128xf32> to vector<8x128xbf16>
    %406 = arith.truncf %394 : vector<8x128xf32> to vector<8x128xbf16>
    %407 = tpu.concatenate %405, %406 in 1 : vector<8x128xbf16>, vector<8x128xbf16> -> vector<8x256xbf16>
    %cst_114 = arith.constant dense<0.000000e+00> : vector<8x512xf32>
    %408 = tpu.matmul %407, %314, %cst_114 {dimension_numbers = #tpu.dot_dimension_numbers<[1], [0], [0], [1], [0, 0, 1, 1], [], []>} : vector<8x256xbf16>, vector<256x512xbf16>, vector<8x512xf32> -> vector<8x512xf32>
    %409 = arith.addf %408, %317 : vector<8x512xf32>
    %410 = vector.extract_strided_slice %409 {offsets = [0, 0], sizes = [8, 128], strides = [1, 1]} : vector<8x512xf32> to vector<8x128xf32>
    %411 = arith.negf %410 : vector<8x128xf32>
    %412 = math.exp %411 : vector<8x128xf32>
    %cst_115 = arith.constant 1.000000e+00 : f32
    %413 = vector.broadcast %cst_115 : f32 to vector<8x128xf32>
    %414 = arith.addf %413, %412 : vector<8x128xf32>
    %415 = arith.divf %413, %414 : vector<8x128xf32>
    %416 = vector.extract_strided_slice %409 {offsets = [0, 128], sizes = [8, 128], strides = [1, 1]} : vector<8x512xf32> to vector<8x128xf32>
    %417 = arith.negf %416 : vector<8x128xf32>
    %418 = math.exp %417 : vector<8x128xf32>
    %cst_116 = arith.constant 1.000000e+00 : f32
    %419 = vector.broadcast %cst_116 : f32 to vector<8x128xf32>
    %420 = arith.addf %419, %418 : vector<8x128xf32>
    %421 = arith.divf %419, %420 : vector<8x128xf32>
    %422 = vector.extract_strided_slice %409 {offsets = [0, 256], sizes = [8, 128], strides = [1, 1]} : vector<8x512xf32> to vector<8x128xf32>
    %423 = math.tanh %422 : vector<8x128xf32>
    %424 = vector.extract_strided_slice %409 {offsets = [0, 384], sizes = [8, 128], strides = [1, 1]} : vector<8x512xf32> to vector<8x128xf32>
    %425 = arith.negf %424 : vector<8x128xf32>
    %426 = math.exp %425 : vector<8x128xf32>
    %cst_117 = arith.constant 1.000000e+00 : f32
    %427 = vector.broadcast %cst_117 : f32 to vector<8x128xf32>
    %428 = arith.addf %427, %426 : vector<8x128xf32>
    %429 = arith.divf %427, %428 : vector<8x128xf32>
    %430 = arith.mulf %421, %392 : vector<8x128xf32>
    %431 = arith.mulf %415, %423 : vector<8x128xf32>
    %432 = arith.addf %430, %431 : vector<8x128xf32>
    %433 = math.tanh %432 : vector<8x128xf32>
    %434 = arith.mulf %429, %433 : vector<8x128xf32>
    %435 = arith.truncf %434 : vector<8x128xf32> to vector<8x128xbf16>
    %cst_118 = arith.constant dense<0.000000e+00> : vector<8x128xf32>
    %436 = tpu.matmul %435, %0, %cst_118 {dimension_numbers = #tpu.dot_dimension_numbers<[1], [0], [0], [1], [0, 0, 1, 1], [], []>} : vector<8x128xbf16>, vector<128x128xbf16>, vector<8x128xf32> -> vector<8x128xf32>
    %437 = arith.addf %436, %3 : vector<8x128xf32>
    %438 = arith.index_cast %c2_i32_111 : i32 to index
    %c0_119 = arith.constant 0 : index
    %c0_120 = arith.constant 0 : index
    %439 = vector.load %arg9[%438, %c0_119, %c0_120] : memref<8x8x128xf32, #tpu.memory_space<vmem>>, vector<1x8x128xf32>
    %440 = vector.shape_cast %439 : vector<1x8x128xf32> to vector<8x128xf32>
    %441 = vector.shape_cast %437 : vector<8x128xf32> to vector<1x8x128xf32>
    tpu.vector_store %arg9[%438, %c0_119, %c0_120], %441 {strides = array<i32>} : memref<8x8x128xf32, #tpu.memory_space<vmem>>, vector<1x8x128xf32>,
    %c3_i32_121 = arith.constant 3 : i32
    %442 = arith.index_cast %c3_i32_121 : i32 to index
    %c0_122 = arith.constant 0 : index
    %c0_123 = arith.constant 0 : index
    %443 = vector.load %arg12[%442, %c0_122, %c0_123] : memref<8x8x128xf32, #tpu.memory_space<vmem>>, vector<1x8x128xf32>
    %444 = vector.shape_cast %443 : vector<1x8x128xf32> to vector<8x128xf32>
    %445 = arith.truncf %444 : vector<8x128xf32> to vector<8x128xbf16>
    %446 = arith.truncf %434 : vector<8x128xf32> to vector<8x128xbf16>
    %447 = tpu.concatenate %445, %446 in 1 : vector<8x128xbf16>, vector<8x128xbf16> -> vector<8x256xbf16>
    %cst_124 = arith.constant dense<0.000000e+00> : vector<8x512xf32>
    %448 = tpu.matmul %447, %314, %cst_124 {dimension_numbers = #tpu.dot_dimension_numbers<[1], [0], [0], [1], [0, 0, 1, 1], [], []>} : vector<8x256xbf16>, vector<256x512xbf16>, vector<8x512xf32> -> vector<8x512xf32>
    %449 = arith.addf %448, %317 : vector<8x512xf32>
    %450 = vector.extract_strided_slice %449 {offsets = [0, 0], sizes = [8, 128], strides = [1, 1]} : vector<8x512xf32> to vector<8x128xf32>
    %451 = arith.negf %450 : vector<8x128xf32>
    %452 = math.exp %451 : vector<8x128xf32>
    %cst_125 = arith.constant 1.000000e+00 : f32
    %453 = vector.broadcast %cst_125 : f32 to vector<8x128xf32>
    %454 = arith.addf %453, %452 : vector<8x128xf32>
    %455 = arith.divf %453, %454 : vector<8x128xf32>
    %456 = vector.extract_strided_slice %449 {offsets = [0, 128], sizes = [8, 128], strides = [1, 1]} : vector<8x512xf32> to vector<8x128xf32>
    %457 = arith.negf %456 : vector<8x128xf32>
    %458 = math.exp %457 : vector<8x128xf32>
    %cst_126 = arith.constant 1.000000e+00 : f32
    %459 = vector.broadcast %cst_126 : f32 to vector<8x128xf32>
    %460 = arith.addf %459, %458 : vector<8x128xf32>
    %461 = arith.divf %459, %460 : vector<8x128xf32>
    %462 = vector.extract_strided_slice %449 {offsets = [0, 256], sizes = [8, 128], strides = [1, 1]} : vector<8x512xf32> to vector<8x128xf32>
    %463 = math.tanh %462 : vector<8x128xf32>
    %464 = vector.extract_strided_slice %449 {offsets = [0, 384], sizes = [8, 128], strides = [1, 1]} : vector<8x512xf32> to vector<8x128xf32>
    %465 = arith.negf %464 : vector<8x128xf32>
    %466 = math.exp %465 : vector<8x128xf32>
    %cst_127 = arith.constant 1.000000e+00 : f32
    %467 = vector.broadcast %cst_127 : f32 to vector<8x128xf32>
    %468 = arith.addf %467, %466 : vector<8x128xf32>
    %469 = arith.divf %467, %468 : vector<8x128xf32>
    %470 = arith.mulf %461, %432 : vector<8x128xf32>
    %471 = arith.mulf %455, %463 : vector<8x128xf32>
    %472 = arith.addf %470, %471 : vector<8x128xf32>
    %473 = math.tanh %472 : vector<8x128xf32>
    %474 = arith.mulf %469, %473 : vector<8x128xf32>
    %475 = arith.truncf %474 : vector<8x128xf32> to vector<8x128xbf16>
    %cst_128 = arith.constant dense<0.000000e+00> : vector<8x128xf32>
    %476 = tpu.matmul %475, %0, %cst_128 {dimension_numbers = #tpu.dot_dimension_numbers<[1], [0], [0], [1], [0, 0, 1, 1], [], []>} : vector<8x128xbf16>, vector<128x128xbf16>, vector<8x128xf32> -> vector<8x128xf32>
    %477 = arith.addf %476, %3 : vector<8x128xf32>
    %478 = arith.index_cast %c3_i32_121 : i32 to index
    %c0_129 = arith.constant 0 : index
    %c0_130 = arith.constant 0 : index
    %479 = vector.load %arg9[%478, %c0_129, %c0_130] : memref<8x8x128xf32, #tpu.memory_space<vmem>>, vector<1x8x128xf32>
    %480 = vector.shape_cast %479 : vector<1x8x128xf32> to vector<8x128xf32>
    %481 = vector.shape_cast %477 : vector<8x128xf32> to vector<1x8x128xf32>
    tpu.vector_store %arg9[%478, %c0_129, %c0_130], %481 {strides = array<i32>} : memref<8x8x128xf32, #tpu.memory_space<vmem>>, vector<1x8x128xf32>,
    %c4_i32_131 = arith.constant 4 : i32
    %482 = arith.index_cast %c4_i32_131 : i32 to index
    %c0_132 = arith.constant 0 : index
    %c0_133 = arith.constant 0 : index
    %483 = vector.load %arg12[%482, %c0_132, %c0_133] : memref<8x8x128xf32, #tpu.memory_space<vmem>>, vector<1x8x128xf32>
    %484 = vector.shape_cast %483 : vector<1x8x128xf32> to vector<8x128xf32>
    %485 = arith.truncf %484 : vector<8x128xf32> to vector<8x128xbf16>
    %486 = arith.truncf %474 : vector<8x128xf32> to vector<8x128xbf16>
    %487 = tpu.concatenate %485, %486 in 1 : vector<8x128xbf16>, vector<8x128xbf16> -> vector<8x256xbf16>
    %cst_134 = arith.constant dense<0.000000e+00> : vector<8x512xf32>
    %488 = tpu.matmul %487, %314, %cst_134 {dimension_numbers = #tpu.dot_dimension_numbers<[1], [0], [0], [1], [0, 0, 1, 1], [], []>} : vector<8x256xbf16>, vector<256x512xbf16>, vector<8x512xf32> -> vector<8x512xf32>
    %489 = arith.addf %488, %317 : vector<8x512xf32>
    %490 = vector.extract_strided_slice %489 {offsets = [0, 0], sizes = [8, 128], strides = [1, 1]} : vector<8x512xf32> to vector<8x128xf32>
    %491 = arith.negf %490 : vector<8x128xf32>
    %492 = math.exp %491 : vector<8x128xf32>
    %cst_135 = arith.constant 1.000000e+00 : f32
    %493 = vector.broadcast %cst_135 : f32 to vector<8x128xf32>
    %494 = arith.addf %493, %492 : vector<8x128xf32>
    %495 = arith.divf %493, %494 : vector<8x128xf32>
    %496 = vector.extract_strided_slice %489 {offsets = [0, 128], sizes = [8, 128], strides = [1, 1]} : vector<8x512xf32> to vector<8x128xf32>
    %497 = arith.negf %496 : vector<8x128xf32>
    %498 = math.exp %497 : vector<8x128xf32>
    %cst_136 = arith.constant 1.000000e+00 : f32
    %499 = vector.broadcast %cst_136 : f32 to vector<8x128xf32>
    %500 = arith.addf %499, %498 : vector<8x128xf32>
    %501 = arith.divf %499, %500 : vector<8x128xf32>
    %502 = vector.extract_strided_slice %489 {offsets = [0, 256], sizes = [8, 128], strides = [1, 1]} : vector<8x512xf32> to vector<8x128xf32>
    %503 = math.tanh %502 : vector<8x128xf32>
    %504 = vector.extract_strided_slice %489 {offsets = [0, 384], sizes = [8, 128], strides = [1, 1]} : vector<8x512xf32> to vector<8x128xf32>
    %505 = arith.negf %504 : vector<8x128xf32>
    %506 = math.exp %505 : vector<8x128xf32>
    %cst_137 = arith.constant 1.000000e+00 : f32
    %507 = vector.broadcast %cst_137 : f32 to vector<8x128xf32>
    %508 = arith.addf %507, %506 : vector<8x128xf32>
    %509 = arith.divf %507, %508 : vector<8x128xf32>
    %510 = arith.mulf %501, %472 : vector<8x128xf32>
    %511 = arith.mulf %495, %503 : vector<8x128xf32>
    %512 = arith.addf %510, %511 : vector<8x128xf32>
    %513 = math.tanh %512 : vector<8x128xf32>
    %514 = arith.mulf %509, %513 : vector<8x128xf32>
    %515 = arith.truncf %514 : vector<8x128xf32> to vector<8x128xbf16>
    %cst_138 = arith.constant dense<0.000000e+00> : vector<8x128xf32>
    %516 = tpu.matmul %515, %0, %cst_138 {dimension_numbers = #tpu.dot_dimension_numbers<[1], [0], [0], [1], [0, 0, 1, 1], [], []>} : vector<8x128xbf16>, vector<128x128xbf16>, vector<8x128xf32> -> vector<8x128xf32>
    %517 = arith.addf %516, %3 : vector<8x128xf32>
    %518 = arith.index_cast %c4_i32_131 : i32 to index
    %c0_139 = arith.constant 0 : index
    %c0_140 = arith.constant 0 : index
    %519 = vector.load %arg9[%518, %c0_139, %c0_140] : memref<8x8x128xf32, #tpu.memory_space<vmem>>, vector<1x8x128xf32>
    %520 = vector.shape_cast %519 : vector<1x8x128xf32> to vector<8x128xf32>
    %521 = vector.shape_cast %517 : vector<8x128xf32> to vector<1x8x128xf32>
    tpu.vector_store %arg9[%518, %c0_139, %c0_140], %521 {strides = array<i32>} : memref<8x8x128xf32, #tpu.memory_space<vmem>>, vector<1x8x128xf32>,
    %c5_i32_141 = arith.constant 5 : i32
    %522 = arith.index_cast %c5_i32_141 : i32 to index
    %c0_142 = arith.constant 0 : index
    %c0_143 = arith.constant 0 : index
    %523 = vector.load %arg12[%522, %c0_142, %c0_143] : memref<8x8x128xf32, #tpu.memory_space<vmem>>, vector<1x8x128xf32>
    %524 = vector.shape_cast %523 : vector<1x8x128xf32> to vector<8x128xf32>
    %525 = arith.truncf %524 : vector<8x128xf32> to vector<8x128xbf16>
    %526 = arith.truncf %514 : vector<8x128xf32> to vector<8x128xbf16>
    %527 = tpu.concatenate %525, %526 in 1 : vector<8x128xbf16>, vector<8x128xbf16> -> vector<8x256xbf16>
    %cst_144 = arith.constant dense<0.000000e+00> : vector<8x512xf32>
    %528 = tpu.matmul %527, %314, %cst_144 {dimension_numbers = #tpu.dot_dimension_numbers<[1], [0], [0], [1], [0, 0, 1, 1], [], []>} : vector<8x256xbf16>, vector<256x512xbf16>, vector<8x512xf32> -> vector<8x512xf32>
    %529 = arith.addf %528, %317 : vector<8x512xf32>
    %530 = vector.extract_strided_slice %529 {offsets = [0, 0], sizes = [8, 128], strides = [1, 1]} : vector<8x512xf32> to vector<8x128xf32>
    %531 = arith.negf %530 : vector<8x128xf32>
    %532 = math.exp %531 : vector<8x128xf32>
    %cst_145 = arith.constant 1.000000e+00 : f32
    %533 = vector.broadcast %cst_145 : f32 to vector<8x128xf32>
    %534 = arith.addf %533, %532 : vector<8x128xf32>
    %535 = arith.divf %533, %534 : vector<8x128xf32>
    %536 = vector.extract_strided_slice %529 {offsets = [0, 128], sizes = [8, 128], strides = [1, 1]} : vector<8x512xf32> to vector<8x128xf32>
    %537 = arith.negf %536 : vector<8x128xf32>
    %538 = math.exp %537 : vector<8x128xf32>
    %cst_146 = arith.constant 1.000000e+00 : f32
    %539 = vector.broadcast %cst_146 : f32 to vector<8x128xf32>
    %540 = arith.addf %539, %538 : vector<8x128xf32>
    %541 = arith.divf %539, %540 : vector<8x128xf32>
    %542 = vector.extract_strided_slice %529 {offsets = [0, 256], sizes = [8, 128], strides = [1, 1]} : vector<8x512xf32> to vector<8x128xf32>
    %543 = math.tanh %542 : vector<8x128xf32>
    %544 = vector.extract_strided_slice %529 {offsets = [0, 384], sizes = [8, 128], strides = [1, 1]} : vector<8x512xf32> to vector<8x128xf32>
    %545 = arith.negf %544 : vector<8x128xf32>
    %546 = math.exp %545 : vector<8x128xf32>
    %cst_147 = arith.constant 1.000000e+00 : f32
    %547 = vector.broadcast %cst_147 : f32 to vector<8x128xf32>
    %548 = arith.addf %547, %546 : vector<8x128xf32>
    %549 = arith.divf %547, %548 : vector<8x128xf32>
    %550 = arith.mulf %541, %512 : vector<8x128xf32>
    %551 = arith.mulf %535, %543 : vector<8x128xf32>
    %552 = arith.addf %550, %551 : vector<8x128xf32>
    %553 = math.tanh %552 : vector<8x128xf32>
    %554 = arith.mulf %549, %553 : vector<8x128xf32>
    %555 = arith.truncf %554 : vector<8x128xf32> to vector<8x128xbf16>
    %cst_148 = arith.constant dense<0.000000e+00> : vector<8x128xf32>
    %556 = tpu.matmul %555, %0, %cst_148 {dimension_numbers = #tpu.dot_dimension_numbers<[1], [0], [0], [1], [0, 0, 1, 1], [], []>} : vector<8x128xbf16>, vector<128x128xbf16>, vector<8x128xf32> -> vector<8x128xf32>
    %557 = arith.addf %556, %3 : vector<8x128xf32>
    %558 = arith.index_cast %c5_i32_141 : i32 to index
    %c0_149 = arith.constant 0 : index
    %c0_150 = arith.constant 0 : index
    %559 = vector.load %arg9[%558, %c0_149, %c0_150] : memref<8x8x128xf32, #tpu.memory_space<vmem>>, vector<1x8x128xf32>
    %560 = vector.shape_cast %559 : vector<1x8x128xf32> to vector<8x128xf32>
    %561 = vector.shape_cast %557 : vector<8x128xf32> to vector<1x8x128xf32>
    tpu.vector_store %arg9[%558, %c0_149, %c0_150], %561 {strides = array<i32>} : memref<8x8x128xf32, #tpu.memory_space<vmem>>, vector<1x8x128xf32>,
    %c6_i32_151 = arith.constant 6 : i32
    %562 = arith.index_cast %c6_i32_151 : i32 to index
    %c0_152 = arith.constant 0 : index
    %c0_153 = arith.constant 0 : index
    %563 = vector.load %arg12[%562, %c0_152, %c0_153] : memref<8x8x128xf32, #tpu.memory_space<vmem>>, vector<1x8x128xf32>
    %564 = vector.shape_cast %563 : vector<1x8x128xf32> to vector<8x128xf32>
    %565 = arith.truncf %564 : vector<8x128xf32> to vector<8x128xbf16>
    %566 = arith.truncf %554 : vector<8x128xf32> to vector<8x128xbf16>
    %567 = tpu.concatenate %565, %566 in 1 : vector<8x128xbf16>, vector<8x128xbf16> -> vector<8x256xbf16>
    %cst_154 = arith.constant dense<0.000000e+00> : vector<8x512xf32>
    %568 = tpu.matmul %567, %314, %cst_154 {dimension_numbers = #tpu.dot_dimension_numbers<[1], [0], [0], [1], [0, 0, 1, 1], [], []>} : vector<8x256xbf16>, vector<256x512xbf16>, vector<8x512xf32> -> vector<8x512xf32>
    %569 = arith.addf %568, %317 : vector<8x512xf32>
    %570 = vector.extract_strided_slice %569 {offsets = [0, 0], sizes = [8, 128], strides = [1, 1]} : vector<8x512xf32> to vector<8x128xf32>
    %571 = arith.negf %570 : vector<8x128xf32>
    %572 = math.exp %571 : vector<8x128xf32>
    %cst_155 = arith.constant 1.000000e+00 : f32
    %573 = vector.broadcast %cst_155 : f32 to vector<8x128xf32>
    %574 = arith.addf %573, %572 : vector<8x128xf32>
    %575 = arith.divf %573, %574 : vector<8x128xf32>
    %576 = vector.extract_strided_slice %569 {offsets = [0, 128], sizes = [8, 128], strides = [1, 1]} : vector<8x512xf32> to vector<8x128xf32>
    %577 = arith.negf %576 : vector<8x128xf32>
    %578 = math.exp %577 : vector<8x128xf32>
    %cst_156 = arith.constant 1.000000e+00 : f32
    %579 = vector.broadcast %cst_156 : f32 to vector<8x128xf32>
    %580 = arith.addf %579, %578 : vector<8x128xf32>
    %581 = arith.divf %579, %580 : vector<8x128xf32>
    %582 = vector.extract_strided_slice %569 {offsets = [0, 256], sizes = [8, 128], strides = [1, 1]} : vector<8x512xf32> to vector<8x128xf32>
    %583 = math.tanh %582 : vector<8x128xf32>
    %584 = vector.extract_strided_slice %569 {offsets = [0, 384], sizes = [8, 128], strides = [1, 1]} : vector<8x512xf32> to vector<8x128xf32>
    %585 = arith.negf %584 : vector<8x128xf32>
    %586 = math.exp %585 : vector<8x128xf32>
    %cst_157 = arith.constant 1.000000e+00 : f32
    %587 = vector.broadcast %cst_157 : f32 to vector<8x128xf32>
    %588 = arith.addf %587, %586 : vector<8x128xf32>
    %589 = arith.divf %587, %588 : vector<8x128xf32>
    %590 = arith.mulf %581, %552 : vector<8x128xf32>
    %591 = arith.mulf %575, %583 : vector<8x128xf32>
    %592 = arith.addf %590, %591 : vector<8x128xf32>
    %593 = math.tanh %592 : vector<8x128xf32>
    %594 = arith.mulf %589, %593 : vector<8x128xf32>
    %595 = arith.truncf %594 : vector<8x128xf32> to vector<8x128xbf16>
    %cst_158 = arith.constant dense<0.000000e+00> : vector<8x128xf32>
    %596 = tpu.matmul %595, %0, %cst_158 {dimension_numbers = #tpu.dot_dimension_numbers<[1], [0], [0], [1], [0, 0, 1, 1], [], []>} : vector<8x128xbf16>, vector<128x128xbf16>, vector<8x128xf32> -> vector<8x128xf32>
    %597 = arith.addf %596, %3 : vector<8x128xf32>
    %598 = arith.index_cast %c6_i32_151 : i32 to index
    %c0_159 = arith.constant 0 : index
    %c0_160 = arith.constant 0 : index
    %599 = vector.load %arg9[%598, %c0_159, %c0_160] : memref<8x8x128xf32, #tpu.memory_space<vmem>>, vector<1x8x128xf32>
    %600 = vector.shape_cast %599 : vector<1x8x128xf32> to vector<8x128xf32>
    %601 = vector.shape_cast %597 : vector<8x128xf32> to vector<1x8x128xf32>
    tpu.vector_store %arg9[%598, %c0_159, %c0_160], %601 {strides = array<i32>} : memref<8x8x128xf32, #tpu.memory_space<vmem>>, vector<1x8x128xf32>,
    %c7_i32_161 = arith.constant 7 : i32
    %602 = arith.index_cast %c7_i32_161 : i32 to index
    %c0_162 = arith.constant 0 : index
    %c0_163 = arith.constant 0 : index
    %603 = vector.load %arg12[%602, %c0_162, %c0_163] : memref<8x8x128xf32, #tpu.memory_space<vmem>>, vector<1x8x128xf32>
    %604 = vector.shape_cast %603 : vector<1x8x128xf32> to vector<8x128xf32>
    %605 = arith.truncf %604 : vector<8x128xf32> to vector<8x128xbf16>
    %606 = arith.truncf %594 : vector<8x128xf32> to vector<8x128xbf16>
    %607 = tpu.concatenate %605, %606 in 1 : vector<8x128xbf16>, vector<8x128xbf16> -> vector<8x256xbf16>
    %cst_164 = arith.constant dense<0.000000e+00> : vector<8x512xf32>
    %608 = tpu.matmul %607, %314, %cst_164 {dimension_numbers = #tpu.dot_dimension_numbers<[1], [0], [0], [1], [0, 0, 1, 1], [], []>} : vector<8x256xbf16>, vector<256x512xbf16>, vector<8x512xf32> -> vector<8x512xf32>
    %609 = arith.addf %608, %317 : vector<8x512xf32>
    %610 = vector.extract_strided_slice %609 {offsets = [0, 0], sizes = [8, 128], strides = [1, 1]} : vector<8x512xf32> to vector<8x128xf32>
    %611 = arith.negf %610 : vector<8x128xf32>
    %612 = math.exp %611 : vector<8x128xf32>
    %cst_165 = arith.constant 1.000000e+00 : f32
    %613 = vector.broadcast %cst_165 : f32 to vector<8x128xf32>
    %614 = arith.addf %613, %612 : vector<8x128xf32>
    %615 = arith.divf %613, %614 : vector<8x128xf32>
    %616 = vector.extract_strided_slice %609 {offsets = [0, 128], sizes = [8, 128], strides = [1, 1]} : vector<8x512xf32> to vector<8x128xf32>
    %617 = arith.negf %616 : vector<8x128xf32>
    %618 = math.exp %617 : vector<8x128xf32>
    %cst_166 = arith.constant 1.000000e+00 : f32
    %619 = vector.broadcast %cst_166 : f32 to vector<8x128xf32>
    %620 = arith.addf %619, %618 : vector<8x128xf32>
    %621 = arith.divf %619, %620 : vector<8x128xf32>
    %622 = vector.extract_strided_slice %609 {offsets = [0, 256], sizes = [8, 128], strides = [1, 1]} : vector<8x512xf32> to vector<8x128xf32>
    %623 = math.tanh %622 : vector<8x128xf32>
    %624 = vector.extract_strided_slice %609 {offsets = [0, 384], sizes = [8, 128], strides = [1, 1]} : vector<8x512xf32> to vector<8x128xf32>
    %625 = arith.negf %624 : vector<8x128xf32>
    %626 = math.exp %625 : vector<8x128xf32>
    %cst_167 = arith.constant 1.000000e+00 : f32
    %627 = vector.broadcast %cst_167 : f32 to vector<8x128xf32>
    %628 = arith.addf %627, %626 : vector<8x128xf32>
    %629 = arith.divf %627, %628 : vector<8x128xf32>
    %630 = arith.mulf %621, %592 : vector<8x128xf32>
    %631 = arith.mulf %615, %623 : vector<8x128xf32>
    %632 = arith.addf %630, %631 : vector<8x128xf32>
    %633 = math.tanh %632 : vector<8x128xf32>
    %634 = arith.mulf %629, %633 : vector<8x128xf32>
    %635 = arith.truncf %634 : vector<8x128xf32> to vector<8x128xbf16>
    %cst_168 = arith.constant dense<0.000000e+00> : vector<8x128xf32>
    %636 = tpu.matmul %635, %0, %cst_168 {dimension_numbers = #tpu.dot_dimension_numbers<[1], [0], [0], [1], [0, 0, 1, 1], [], []>} : vector<8x128xbf16>, vector<128x128xbf16>, vector<8x128xf32> -> vector<8x128xf32>
    %637 = arith.addf %636, %3 : vector<8x128xf32>
    %638 = arith.index_cast %c7_i32_161 : i32 to index
    %c0_169 = arith.constant 0 : index
    %c0_170 = arith.constant 0 : index
    %639 = vector.load %arg9[%638, %c0_169, %c0_170] : memref<8x8x128xf32, #tpu.memory_space<vmem>>, vector<1x8x128xf32>
    %640 = vector.shape_cast %639 : vector<1x8x128xf32> to vector<8x128xf32>
    %641 = vector.shape_cast %637 : vector<8x128xf32> to vector<1x8x128xf32>
    tpu.vector_store %arg9[%638, %c0_169, %c0_170], %641 {strides = array<i32>} : memref<8x8x128xf32, #tpu.memory_space<vmem>>, vector<1x8x128xf32>,
    %c8_i32_171 = arith.constant 8 : i32
    %c1_172 = arith.constant 1 : index
    %c0_173 = arith.constant 0 : index
    %c0_174 = arith.constant 0 : index
    %642 = vector.load %arg10[%c1_172, %c0_173, %c0_174] : memref<2x8x128xf32, #tpu.memory_space<vmem>>, vector<1x8x128xf32>
    %643 = vector.shape_cast %642 : vector<1x8x128xf32> to vector<8x128xf32>
    %644 = vector.shape_cast %634 : vector<8x128xf32> to vector<1x8x128xf32>
    tpu.vector_store %arg10[%c1_172, %c0_173, %c0_174], %644 {strides = array<i32>} : memref<2x8x128xf32, #tpu.memory_space<vmem>>, vector<1x8x128xf32>,
    %c1_175 = arith.constant 1 : index
    %c0_176 = arith.constant 0 : index
    %c0_177 = arith.constant 0 : index
    %645 = vector.load %arg11[%c1_175, %c0_176, %c0_177] : memref<2x8x128xf32, #tpu.memory_space<vmem>>, vector<1x8x128xf32>
    %646 = vector.shape_cast %645 : vector<1x8x128xf32> to vector<8x128xf32>
    %647 = vector.shape_cast %632 : vector<8x128xf32> to vector<1x8x128xf32>
    tpu.vector_store %arg11[%c1_175, %c0_176, %c0_177], %647 {strides = array<i32>} : memref<2x8x128xf32, #tpu.memory_space<vmem>>, vector<1x8x128xf32>,
    return
  }
}

</mosaic_0001>

<bundles_post_ra>
// kernel: tpu_custom_call.1
= control target key start
LH: loop header
LB: loop body
LE: loop exit
PB: predicated region body
PF: predicated region fallthrough
CT: control target
= control target key end

     0   :  { %17 = vsyncpa [#allocation4], 0  ;;  %s6506_s0 = inlined_call_operand.hbm [shape: f32[8,8,128], index: 0, kind: input, shape index: {}]   ;;  %s6507_s1 = inlined_call_operand.hbm [shape: bf16[256,512], index: 1, kind: input, shape index: {}]   ;;  %s6508_s2 = inlined_call_operand.vmem [shape: f32[1,512], index: 2, kind: input, shape index: {}]   ;;  %s6509_s3 = inlined_call_operand.hbm [shape: bf16[256,512], index: 3, kind: input, shape index: {}]   ;;  %s6510_s4 = inlined_call_operand.vmem [shape: f32[1,512], index: 4, kind: input, shape index: {}]   ;;  %s6511_s5 = inlined_call_operand.hbm [shape: bf16[128,128], index: 5, kind: input, shape index: {}]   ;;  %s6512_s6 = inlined_call_operand.vmem [shape: f32[1,128], index: 6, kind: input, shape index: {}]   ;;  %s6513_s7 = inlined_call_operand.vmem [shape: f32[2,8,128], index: 7, kind: input, shape index: {}]   ;;  %s6514_s8 = inlined_call_operand.hbm [shape: f32[2,8,128], index: 8, kind: input, shape index: {}]   ;;  %s6515_s9 = inlined_call_operand.hbm [shape: f32[8,8,128], index: 9, kind: output, shape index: {0}]   ;;  %s6516_s10 = inlined_call_operand.hbm [shape: f32[2,8,128], index: 10, kind: output, shape index: {1}]   ;;  %s6517_s11 = inlined_call_operand.hbm [shape: f32[2,8,128], index: 11, kind: output, shape index: {2}]  }
   0x1   :  { %18 = vsyncpa [#allocation7], 0 }
   0x2   :  { %19 = vsyncpa [#allocation10], 0 }
   0x3   :  { %20 = vsyncpa [#allocation5], 0 }
   0x4   :  { %21 = vsyncpa [#allocation14], 0  ;;  %s4382_s17 = smov [#allocation6]   ;;  %s4196_s21 = scalar_lea.hbm %s6507_s1, 8192 }
   0x5   :  { %s39_s18 = sshll.u32 %s4382_s17, 4  ;;  %p4197_p0 = scmp.ne.s32.totalorder %s6507_s1, %s4196_s21  ;;  %s40_s18 = int_to_ptr.vmem [resolvable:$true] %s39_s18 }
   0x6   :  { %p4200_p1 = scmp.lt.u32.totalorder %s4196_s21, %s6507_s1 }
   0x8   :  { %p4202_p2 = pnand %p4200_p1, %p4197_p0 }
   0xa   :  { %4205 = shalt.err (!%p4202_p2)
}
   0xb   :  { %s4206_s26 = scalar_lea.vmem %s40_s18, 8192  ;;  %p4211_p4 = scmp.lt.s32.totalorder %s40_s18, %s40_s18 }
   0xc   :  { %p4207_p3 = scmp.ne.s32.totalorder %s40_s18, %s4206_s26  ;;  %p4212_p5 = scmp.lt.s32.totalorder %s4206_s26, %s4206_s26 }
   0xe   :  { %p4213_p6 = por %p4212_p5, %p4211_p4 }
  0x10   :  { %p4214_p7 = pnand %p4213_p6, %p4207_p3 }
  0x12   :  { %4217 = shalt.err (!%p4214_p7)
}
  0x13   :  { %s4383_s27 = smov 256   ;;  %s4384_s28 = smov 16  }
  0x14   :  { %45 = dma.hbm_to_vmem [thread:$0]  %s6507_s1, 8192, %s40_s18, [#allocation7], %s4383_s27, %s4383_s27, %s4384_s28  }
  0x15   :  { %s4385_s12 = smov [#allocation9]   ;;  %s4218_s16 = scalar_lea.hbm %s6511_s5, 1024 }
  0x16   :  { %s67_s13 = sshll.u32 %s4385_s12, 4  ;;  %p4219_p8 = scmp.ne.s32.totalorder %s6511_s5, %s4218_s16  ;;  %s68_s13 = int_to_ptr.vmem [resolvable:$true] %s67_s13 }
  0x17   :  { %p4222_p9 = scmp.lt.u32.totalorder %s4218_s16, %s6511_s5 }
  0x19   :  { %p4224_p10 = pnand %p4222_p9, %p4219_p8 }
  0x1b   :  { %4227 = shalt.err (!%p4224_p10)
}
  0x1c   :  { %s4228_s22 = scalar_lea.vmem %s68_s13, 1024  ;;  %p4233_p12 = scmp.lt.s32.totalorder %s68_s13, %s68_s13 }
  0x1d   :  { %p4229_p11 = scmp.ne.s32.totalorder %s68_s13, %s4228_s22  ;;  %p4234_p13 = scmp.lt.s32.totalorder %s4228_s22, %s4228_s22 }
  0x1f   :  { %p4235_p0 = por %p4234_p13, %p4233_p12 }
  0x21   :  { %p4236_p1 = pnand %p4235_p0, %p4229_p11 }
  0x23   :  { %4239 = shalt.err (!%p4236_p1)
}
  0x24   :  { %s4386_s1 = smov 64   ;;  %s4387_s18 = smov 4  }
  0x25   :  { %73 = dma.hbm_to_vmem [thread:$0]  %s6511_s5, 1024, %s68_s13, [#allocation10], %s4386_s1, %s4386_s1, %s4387_s18  }
  0x26   :  { %s4388_s25 = smov [#allocation3]   ;;  %s4240_s12 = scalar_lea.hbm %s6506_s0, 1024 }
  0x27   :  { %s27_s26 = sshll.u32 %s4388_s25, 4  ;;  %p4241_p2 = scmp.ne.s32.totalorder %s6506_s0, %s4240_s12  ;;  %s28_s26 = int_to_ptr.vmem [resolvable:$true] %s27_s26 }
  0x28   :  { %p4244_p3 = scmp.lt.u32.totalorder %s4240_s12, %s6506_s0 }
  0x2a   :  { %p4246_p4 = pnand %p4244_p3, %p4241_p2 }
  0x2c   :  { %4249 = shalt.err (!%p4246_p4)
}
  0x2d   :  { %s4250_s19 = scalar_lea.vmem %s28_s26, 1024  ;;  %p4255_p6 = scmp.lt.s32.totalorder %s28_s26, %s28_s26 }
  0x2e   :  { %p4251_p5 = scmp.ne.s32.totalorder %s28_s26, %s4250_s19  ;;  %p4256_p7 = scmp.lt.s32.totalorder %s4250_s19, %s4250_s19 }
  0x30   :  { %p4257_p8 = por %p4256_p7, %p4255_p6 }
  0x32   :  { %p4258_p9 = pnand %p4257_p8, %p4251_p5 }
  0x34   :  { %4261 = shalt.err (!%p4258_p9)
}
  0x35   :  { %s4389_s5 = smov 128   ;;  %s4390_s13 = smov 8  }
  0x36   :  { %33 = dma.hbm_to_vmem [thread:$0]  %s6506_s0, 1024, %s28_s26, [#allocation4], %s4389_s5, %s4389_s5, %s4390_s13  }
  0x37   :  { %s4391_s22 = smov [#allocation8]   ;;  %s4392_s18 = smov [#allocation11]  }
  0x38   :  { %s53_s1 = sshll.u32 %s4391_s22, 4  ;;  %s83_s23 = sshll.u32 %s4392_s18, 4  ;;  %s54_s1 = int_to_ptr.vmem [resolvable:$true] %s53_s1  ;;  %s84_s23 = int_to_ptr.vmem [resolvable:$true] %s83_s23 }
  0x39   :  { %s4262_s29 = scalar_lea.hbm %s6509_s3, 8192 }
  0x3a   :  { %p4263_p10 = scmp.ne.s32.totalorder %s6509_s3, %s4262_s29  ;;  %p4266_p11 = scmp.lt.u32.totalorder %s4262_s29, %s6509_s3 }
  0x3c   :  { %p4268_p12 = pnand %p4266_p11, %p4263_p10 }
  0x3e   :  { %4271 = shalt.err (!%p4268_p12)
}
  0x3f   :  { %s4272_s0 = scalar_lea.vmem %s54_s1, 8192  ;;  %p4277_p0 = scmp.lt.s32.totalorder %s54_s1, %s54_s1 }
  0x40   :  { %p4273_p13 = scmp.ne.s32.totalorder %s54_s1, %s4272_s0  ;;  %p4278_p1 = scmp.lt.s32.totalorder %s4272_s0, %s4272_s0 }
  0x42   :  { %p4279_p2 = por %p4278_p1, %p4277_p0 }
  0x44   :  { %p4280_p3 = pnand %p4279_p2, %p4273_p13 }
  0x46   :  { %4283 = shalt.err (!%p4280_p3)
}
  0x47   :  { %59 = dma.hbm_to_vmem [thread:$0]  %s6509_s3, 8192, %s54_s1, [#allocation7], %s4383_s27, %s4383_s27, %s4384_s28  }
  0x48   :  { %s4284_s20 = scalar_lea.hbm %s6514_s8, 256 }
  0x49   :  { %p4285_p4 = scmp.ne.s32.totalorder %s6514_s8, %s4284_s20  ;;  %p4288_p5 = scmp.lt.u32.totalorder %s4284_s20, %s6514_s8 }
  0x4b   :  { %p4290_p6 = pnand %p4288_p5, %p4285_p4 }
  0x4d   :  { %4293 = shalt.err (!%p4290_p6)
}
  0x4e   :  { %s4294_s25 = scalar_lea.vmem %s84_s23, 256  ;;  %p4299_p8 = scmp.lt.s32.totalorder %s84_s23, %s84_s23 }
  0x4f   :  { %p4295_p7 = scmp.ne.s32.totalorder %s84_s23, %s4294_s25  ;;  %p4300_p9 = scmp.lt.s32.totalorder %s4294_s25, %s4294_s25 }
  0x51   :  { %p4301_p10 = por %p4300_p9, %p4299_p8 }
  0x53   :  { %p4302_p11 = pnand %p4301_p10, %p4295_p7 }
  0x55   :  { %4305 = shalt.err (!%p4302_p11)
}
  0x56   :  { %89 = dma.hbm_to_vmem [thread:$0]  %s6514_s8, 256, %s84_s23, [#allocation10], %s4389_s5, %s4389_s5, %s4390_s13  }
  0x57   :  { %4372 = dma.done.wait [#allocation4], 1024  }
  0x58   :  { %4373 = vsyncadd [#allocation4], 4294966272 }
  0x59   :  { %4374 = dma.done.wait [#allocation7], 16384  }
  0x5a   :  { %4375 = vsyncadd [#allocation7], 4294950912 }
  0x5b   :  { %4376 = dma.done.wait [#allocation10], 1280  }
  0x5c   :  { %4377 = vsyncadd [#allocation10], 4294966016  ;;  %v4530_v0 = vld [vmem:[#allocation6 + $0x4] ss:$16 sps:$4 sm:$0xff]   ;;  %v4532_v1 = vld [vmem:[#allocation6] ss:$16 sps:$4 sm:$0xff]  }
  0x5d   :  { %6777 = vst [vmem:[#allocation21_spill] sm:$0xff] %v4530_v0  ;;  %540 = vmatprep.subr.bf16.mxu0 %v4530_v0  ;;  %v4535_v2 = vld [vmem:[#allocation6 + $0x24] ss:$16 sps:$4 sm:$0xff]   ;;  %v4538_v3 = vld [vmem:[#allocation6 + $0x20] ss:$16 sps:$4 sm:$0xff]   ;;  %vm4394_vm0 = vmmov 0  }
  0x5e   :  { %541 = vmatpush1.bf16.msra.mxu0 %v4532_v1  ;;  %v4541_v4 = vld [vmem:[#allocation6 + $0x44] ss:$16 sps:$4 sm:$0xff]   ;;  %v4543_v5 = vld [vmem:[#allocation6 + $0xc] ss:$16 sps:$4 sm:$0xff]   ;;  %v4545_v6 = vld [vmem:[#allocation6 + $0x8] ss:$16 sps:$4 sm:$0xff]  }
  0x5f   :  { %542 = vmatprep.subr.bf16.mxu0 %v4535_v2  ;;  %6778 = vst [vmem:[#allocation22_spill] sm:$0xff] %v4543_v5  ;;  %v4548_v7 = vld [vmem:[#allocation6 + $0x40] ss:$16 sps:$4 sm:$0xff]   ;;  %581 = vmatprep.subr.bf16.mxu1 %v4543_v5  ;;  %v4552_v8 = vld [vmem:[#allocation6 + $0x64] ss:$16 sps:$4 sm:$0xff]  }
  0x60   :  { %582 = vmatpush1.bf16.msra.mxu1 %v4545_v6  ;;  %v4555_v9 = vld [vmem:[#allocation6 + $0x2c] ss:$16 sps:$4 sm:$0xff]   ;;  %v4557_v10 = vld [vmem:[#allocation6 + $0x28] ss:$16 sps:$4 sm:$0xff]   ;;  %v4561_v11 = vld [vmem:[#allocation6 + $0x60] ss:$16 sps:$4 sm:$0xff]  }
  0x61   :  { %583 = vmatprep.subr.bf16.mxu1 %v4555_v9  ;;  %v4563_v12 = vld [vmem:[#allocation6 + $0x84] ss:$16 sps:$4 sm:$0xff]   ;;  %v4565_v13 = vld [vmem:[#allocation6 + $0x4c] ss:$16 sps:$4 sm:$0xff]   ;;  %v4569_v14 = vld [vmem:[#allocation6 + $0x48] ss:$16 sps:$4 sm:$0xff]  }
  0x62   :  { %543 = vmatpush1.bf16.msra.mxu0 %v4538_v3  ;;  %v4572_v15 = vld [vmem:[#allocation6 + $0x6c] ss:$16 sps:$4 sm:$0xff]   ;;  %v4575_v16 = vld [vmem:[#allocation6 + $0x80] ss:$16 sps:$4 sm:$0xff]   ;;  %v4578_v17 = vld [vmem:[#allocation6 + $0xa4] ss:$16 sps:$4 sm:$0xff]  }
  0x63   :  { %544 = vmatprep.subr.bf16.mxu0 %v4541_v4  ;;  %v4581_v18 = vld [vmem:[#allocation6 + $0x68] ss:$16 sps:$4 sm:$0xff]   ;;  %v4584_v19 = vld [vmem:[#allocation6 + $0x8c] ss:$16 sps:$4 sm:$0xff]   ;;  %v4587_v20 = vld [vmem:[#allocation6 + $0xa0] ss:$16 sps:$4 sm:$0xff]  }
  0x64   :  { %584 = vmatpush1.bf16.msra.mxu1 %v4557_v10  ;;  %v4589_v21 = vld [vmem:[#allocation6 + $0xc4] ss:$16 sps:$4 sm:$0xff]   ;;  %v4593_v22 = vld [vmem:[#allocation6 + $0x88] ss:$16 sps:$4 sm:$0xff]   ;;  %v4596_v23 = vld [vmem:[#allocation6 + $0xac] ss:$16 sps:$4 sm:$0xff]  }
  0x65   :  { %585 = vmatprep.subr.bf16.mxu1 %v4565_v13  ;;  %v4599_v24 = vld [vmem:[#allocation6 + $0xc0] ss:$16 sps:$4 sm:$0xff]   ;;  %v4602_v25 = vld [vmem:[#allocation6 + $0xe4] ss:$16 sps:$4 sm:$0xff]   ;;  %v4605_v26 = vld [vmem:[#allocation6 + $0xa8] ss:$16 sps:$4 sm:$0xff]  }
  0x66   :  { %545 = vmatpush1.bf16.msra.mxu0 %v4548_v7  ;;  %v4608_v27 = vld [vmem:[#allocation6 + $0xcc] ss:$16 sps:$4 sm:$0xff]   ;;  %v4611_v28 = vld [vmem:[#allocation6 + $0xe0] ss:$16 sps:$4 sm:$0xff]   ;;  %v4613_v29 = vld [vmem:[#allocation6 + $0x104] ss:$16 sps:$4 sm:$0xff]  }
  0x67   :  { %546 = vmatprep.subr.bf16.mxu0 %v4552_v8  ;;  %v4617_v30 = vld [vmem:[#allocation6 + $0xc8] ss:$16 sps:$4 sm:$0xff]   ;;  %v4620_v31 = vld [vmem:[#allocation6 + $0xec] ss:$16 sps:$4 sm:$0xff]   ;;  %v4623_v32 = vld [vmem:[#allocation6 + $0x100] ss:$16 sps:$4 sm:$0xff]  }
  0x68   :  { %586 = vmatpush1.bf16.msra.mxu1 %v4569_v14  ;;  %v4626_v33 = vld [vmem:[#allocation6 + $0x124] ss:$16 sps:$4 sm:$0xff]   ;;  %v4629_v34 = vld [vmem:[#allocation6 + $0xe8] ss:$16 sps:$4 sm:$0xff]   ;;  %v4632_v35 = vld [vmem:[#allocation6 + $0x10c] ss:$16 sps:$4 sm:$0xff]  }
  0x69   :  { %587 = vmatprep.subr.bf16.mxu1 %v4572_v15  ;;  %v4635_v36 = vld [vmem:[#allocation6 + $0x120] ss:$16 sps:$4 sm:$0xff]   ;;  %v4637_v37 = vld [vmem:[#allocation6 + $0x144] ss:$16 sps:$4 sm:$0xff]   ;;  %v4641_v38 = vld [vmem:[#allocation6 + $0x108] ss:$16 sps:$4 sm:$0xff]  }
  0x6a   :  { %547 = vmatpush1.bf16.msra.mxu0 %v4561_v11  ;;  %v4644_v39 = vld [vmem:[#allocation6 + $0x12c] ss:$16 sps:$4 sm:$0xff]   ;;  %v215_v40 = vld [vmem:[%s6513_s7] sm:$0xff]  ;;  %v4656_v44 = vld [vmem:[#allocation6 + $0x128] ss:$16 sps:$4 sm:$0xff]  }
  0x6b   :  { %548 = vmatprep.subr.bf16.mxu0 %v4563_v12  ;;  %v4650_v41 = vld [vmem:[#allocation6 + $0x140] ss:$16 sps:$4 sm:$0xff]   ;;  %v219_v42 = vpack.c.bf16 %v215_v40, %v215_v40  ;;  %v4653_v43 = vld [vmem:[#allocation6 + $0x164] ss:$16 sps:$4 sm:$0xff]   ;;  %v4661_v46 = vld [vmem:[#allocation6 + $0x14c] ss:$16 sps:$4 sm:$0xff]  }
  0x6c   :  { %588 = vmatpush1.bf16.msra.mxu1 %v4581_v18  ;;  %6779 = vst [vmem:[#allocation23_spill] sm:$0xff] %v4653_v43  ;;  %v4658_v45 = vld [vmem:[#allocation6 + $0x160] ss:$16 sps:$4 sm:$0xff]   ;;  %v4663_v47 = vld [vmem:[#allocation6 + $0x184] ss:$16 sps:$4 sm:$0xff]  }
  0x6d   :  { %589 = vmatprep.subr.bf16.mxu1 %v4584_v19  ;;  %6780 = vst [vmem:[#allocation24_spill] sm:$0xff] %v4658_v45  ;;  %572 = vmatprep.mubr.bf16.mxu0 %v219_v42  ;;  %6781 = vst [vmem:[#allocation25_spill] sm:$0xff] %v4663_v47  ;;  %v4666_v48 = vld [vmem:[#allocation6 + $0x148] ss:$16 sps:$4 sm:$0xff]   ;;  %v4668_v49 = vld [vmem:[#allocation6 + $0x16c] ss:$16 sps:$4 sm:$0xff]  }
  0x6e   :  { %549 = vmatpush1.bf16.msra.mxu0 %v4575_v16  ;;  %613 = vmatprep.mubr.bf16.mxu1 %v219_v42  ;;  %6782 = vst [vmem:[#allocation26_spill] sm:$0xff] %v4668_v49  ;;  %v4672_v50 = vld [vmem:[#allocation6 + $0x180] ss:$16 sps:$4 sm:$0xff]   ;;  %v4675_v51 = vld [vmem:[#allocation6 + $0x1a4] ss:$16 sps:$4 sm:$0xff]  }
  0x6f   :  { %550 = vmatprep.subr.bf16.mxu0 %v4578_v17  ;;  %6783 = vst [vmem:[#allocation27_spill] sm:$0xff] %v4672_v50  ;;  %6784 = vst [vmem:[#allocation28_spill] sm:$0xff] %v4675_v51  ;;  %v4677_v52 = vld [vmem:[#allocation6 + $0x168] ss:$16 sps:$4 sm:$0xff]   ;;  %v4680_v53 = vld [vmem:[#allocation6 + $0x18c] ss:$16 sps:$4 sm:$0xff]  }
  0x70   :  { %590 = vmatpush1.bf16.msra.mxu1 %v4593_v22  ;;  %6785 = vst [vmem:[#allocation29_spill] sm:$0xff] %v4677_v52  ;;  %6786 = vst [vmem:[#allocation30_spill] sm:$0xff] %v4680_v53  ;;  %v4684_v54 = vld [vmem:[#allocation6 + $0x1a0] ss:$16 sps:$4 sm:$0xff]   ;;  %v4687_v55 = vld [vmem:[#allocation6 + $0x1c4] ss:$16 sps:$4 sm:$0xff]  }
  0x71   :  { %591 = vmatprep.subr.bf16.mxu1 %v4596_v23  ;;  %6787 = vst [vmem:[#allocation31_spill] sm:$0xff] %v4684_v54  ;;  %6788 = vst [vmem:[#allocation32_spill] sm:$0xff] %v4687_v55  ;;  %v4689_v56 = vld [vmem:[#allocation6 + $0x188] ss:$16 sps:$4 sm:$0xff]   ;;  %v4692_v57 = vld [vmem:[#allocation6 + $0x1ac] ss:$16 sps:$4 sm:$0xff]  }
  0x72   :  { %551 = vmatpush1.bf16.msra.mxu0 %v4587_v20  ;;  %6789 = vst [vmem:[#allocation33_spill] sm:$0xff] %v4689_v56  ;;  %6790 = vst [vmem:[#allocation34_spill] sm:$0xff] %v4692_v57  ;;  %v4696_v58 = vld [vmem:[#allocation6 + $0x1c0] ss:$16 sps:$4 sm:$0xff]   ;;  %v4699_v59 = vld [vmem:[#allocation6 + $0x1e4] ss:$16 sps:$4 sm:$0xff]  }
  0x73   :  { %552 = vmatprep.subr.bf16.mxu0 %v4589_v21  ;;  %6791 = vst [vmem:[#allocation35_spill] sm:$0xff] %v4696_v58  ;;  %6792 = vst [vmem:[#allocation36_spill] sm:$0xff] %v4699_v59  ;;  %v4701_v60 = vld [vmem:[#allocation6 + $0x1a8] ss:$16 sps:$4 sm:$0xff]   ;;  %v4704_v61 = vld [vmem:[#allocation6 + $0x1cc] ss:$16 sps:$4 sm:$0xff]  }
  0x74   :  { %592 = vmatpush1.bf16.msra.mxu1 %v4605_v26  ;;  %6793 = vst [vmem:[#allocation37_spill] sm:$0xff] %v4701_v60  ;;  %6794 = vst [vmem:[#allocation38_spill] sm:$0xff] %v4704_v61  ;;  %v4708_v62 = vld [vmem:[#allocation6 + $0x1e0] ss:$16 sps:$4 sm:$0xff]   ;;  %v4711_v40 = vld [vmem:[#allocation6 + $0x1c8] ss:$16 sps:$4 sm:$0xff]  }
  0x75   :  { %593 = vmatprep.subr.bf16.mxu1 %v4608_v27  ;;  %6795 = vst [vmem:[#allocation39_spill] sm:$0xff] %v4708_v62  ;;  %v217_v63 = vld [vmem:[#allocation3] sm:$0xff]  ;;  %6796 = vst [vmem:[#allocation40_spill] sm:$0xff] %v4711_v40  ;;  %v4714_v42 = vld [vmem:[#allocation6 + $0x1ec] ss:$16 sps:$4 sm:$0xff]  }
  0x76   :  { %553 = vmatpush1.bf16.msra.mxu0 %v4599_v24  ;;  %6797 = vst [vmem:[#allocation41_spill] sm:$0xff] %v4714_v42 }
  0x77   :  { %554 = vmatprep.subr.bf16.mxu0 %v4602_v25 }
  0x78   :  { %594 = vmatpush1.bf16.msra.mxu1 %v4617_v30 }
  0x79   :  { %595 = vmatprep.subr.bf16.mxu1 %v4620_v31 }
  0x7a   :  { %555 = vmatpush1.bf16.msra.mxu0 %v4611_v28 }
  0x7b   :  { %556 = vmatprep.subr.bf16.mxu0 %v4613_v29 }
  0x7c   :  { %596 = vmatpush1.bf16.msra.mxu1 %v4629_v34 }
  0x7d   :  { %597 = vmatprep.subr.bf16.mxu1 %v4632_v35 }
  0x7e   :  { %557 = vmatpush1.bf16.msra.mxu0 %v4623_v32 }
  0x7f   :  { %558 = vmatprep.subr.bf16.mxu0 %v4626_v33 }
  0x80   :  { %598 = vmatpush1.bf16.msra.mxu1 %v4641_v38 }
  0x81   :  { %599 = vmatprep.subr.bf16.mxu1 %v4644_v39 }
  0x82   :  { %559 = vmatpush1.bf16.msra.mxu0 %v4635_v36 }
  0x83   :  { %560 = vmatprep.subr.bf16.mxu0 %v4637_v37 }
  0x84   :  { %600 = vmatpush1.bf16.msra.mxu1 %v4656_v44 }
  0x85   :  { %601 = vmatprep.subr.bf16.mxu1 %v4661_v46 }
  0x86   :  { %561 = vmatpush1.bf16.msra.mxu0 %v4650_v41 }
  0x87   :  { %562 = vmatprep.subr.bf16.mxu0 %v4653_v43 }
  0x88   :  { %602 = vmatpush1.bf16.msra.mxu1 %v4666_v48 }
  0x89   :  { %603 = vmatprep.subr.bf16.mxu1 %v4668_v49 }
  0x8a   :  { %563 = vmatpush1.bf16.msra.mxu0 %v4658_v45 }
  0x8b   :  { %564 = vmatprep.subr.bf16.mxu0 %v4663_v47 }
  0x8c   :  { %604 = vmatpush1.bf16.msra.mxu1 %v4677_v52 }
  0x8d   :  { %605 = vmatprep.subr.bf16.mxu1 %v4680_v53 }
  0x8e   :  { %565 = vmatpush1.bf16.msra.mxu0 %v4672_v50 }
  0x8f   :  { %566 = vmatprep.subr.bf16.mxu0 %v4675_v51 }
  0x90   :  { %606 = vmatpush1.bf16.msra.mxu1 %v4689_v56 }
  0x91   :  { %607 = vmatprep.subr.bf16.mxu1 %v4692_v57 }
  0x92   :  { %567 = vmatpush1.bf16.msra.mxu0 %v4684_v54  ;;  %v4719_v54 = vld [vmem:[#allocation6 + $0x1e8] ss:$16 sps:$4 sm:$0xff]  }
  0x93   :  { %568 = vmatprep.subr.bf16.mxu0 %v4687_v55  ;;  %v218_v55 = vpack.c.bf16 %v217_v63, %v217_v63  ;;  %6798 = vst [vmem:[#allocation42_spill] sm:$0xff] %v4719_v54  ;;  %v6800_v63 = vld [vmem:[#allocation32_spill] sm:$0xff] }
  0x94   :  { %608 = vmatpush1.bf16.msra.mxu1 %v4701_v60 }
  0x95   :  { %609 = vmatprep.subr.bf16.mxu1 %v4704_v61 }
  0x96   :  { %569 = vmatpush1.bf16.msra.mxu0 %v4696_v58 }
  0x97   :  { %570 = vmatprep.subr.bf16.mxu0 %v4699_v59 }
  0x98   :  { %610 = vmatpush1.bf16.msra.mxu1 %v4711_v40 }
  0x99   :  { %611 = vmatprep.subr.bf16.mxu1 %v4714_v42 }
  0x9a   :  { %571 = vmatpush1.bf16.msra.mxu0 %v4708_v62 }
  0x9b   :  { %651 = vmatprep.subr.bf16.mxu0 %v4530_v0 }
  0x9c   :  { %612 = vmatpush1.bf16.msra.mxu1 %v4719_v54 }
  0x9d   :  { %573 = vmatmul.mubr.bf16.vlgmr.msra.gmra.mrb[0].mxu0 %v218_v55  ;;  %692 = vmatprep.subr.bf16.mxu1 %v4543_v5 }
  0x9e   :  { %652 = vmatpush1.bf16.msra.mxu0 %v4532_v1 }
  0x9f   :  { %653 = vmatprep.subr.bf16.mxu0 %v4535_v2  ;;  %614 = vmatmul.mubr.bf16.vlgmr.msra.gmra.mrb[0].mxu1 %v218_v55  ;;  %v6799_v55 = vld [vmem:[#allocation31_spill] sm:$0xff] }
  0xa0   :  { %693 = vmatpush1.bf16.msra.mxu1 %v4545_v6 }
  0xa1   :  { %694 = vmatprep.subr.bf16.mxu1 %v4555_v9 }
  0xa2   :  { %654 = vmatpush1.bf16.msra.mxu0 %v4538_v3 }
  0xa3   :  { %655 = vmatprep.subr.bf16.mxu0 %v4541_v4 }
  0xa4   :  { %695 = vmatpush1.bf16.msra.mxu1 %v4557_v10 }
  0xa5   :  { %696 = vmatprep.subr.bf16.mxu1 %v4565_v13 }
  0xa6   :  { %656 = vmatpush1.bf16.msra.mxu0 %v4548_v7 }
  0xa7   :  { %657 = vmatprep.subr.bf16.mxu0 %v4552_v8 }
  0xa8   :  { %697 = vmatpush1.bf16.msra.mxu1 %v4569_v14 }
  0xa9   :  { %698 = vmatprep.subr.bf16.mxu1 %v4572_v15 }
  0xaa   :  { %658 = vmatpush1.bf16.msra.mxu0 %v4561_v11 }
  0xab   :  { %659 = vmatprep.subr.bf16.mxu0 %v4563_v12 }
  0xac   :  { %699 = vmatpush1.bf16.msra.mxu1 %v4581_v18 }
  0xad   :  { %700 = vmatprep.subr.bf16.mxu1 %v4584_v19 }
  0xae   :  { %660 = vmatpush1.bf16.msra.mxu0 %v4575_v16 }
  0xaf   :  { %661 = vmatprep.subr.bf16.mxu0 %v4578_v17 }
  0xb0   :  { %701 = vmatpush1.bf16.msra.mxu1 %v4593_v22 }
  0xb1   :  { %702 = vmatprep.subr.bf16.mxu1 %v4596_v23 }
  0xb2   :  { %662 = vmatpush1.bf16.msra.mxu0 %v4587_v20 }
  0xb3   :  { %663 = vmatprep.subr.bf16.mxu0 %v4589_v21 }
  0xb4   :  { %703 = vmatpush1.bf16.msra.mxu1 %v4605_v26 }
  0xb5   :  { %704 = vmatprep.subr.bf16.mxu1 %v4608_v27 }
  0xb6   :  { %664 = vmatpush1.bf16.msra.mxu0 %v4599_v24 }
  0xb7   :  { %665 = vmatprep.subr.bf16.mxu0 %v4602_v25 }
  0xb8   :  { %705 = vmatpush1.bf16.msra.mxu1 %v4617_v30 }
  0xb9   :  { %706 = vmatprep.subr.bf16.mxu1 %v4620_v31 }
  0xba   :  { %666 = vmatpush1.bf16.msra.mxu0 %v4611_v28 }
  0xbb   :  { %667 = vmatprep.subr.bf16.mxu0 %v4613_v29 }
  0xbc   :  { %707 = vmatpush1.bf16.msra.mxu1 %v4629_v34 }
  0xbd   :  { %708 = vmatprep.subr.bf16.mxu1 %v4632_v35 }
  0xbe   :  { %668 = vmatpush1.bf16.msra.mxu0 %v4623_v32 }
  0xbf   :  { %669 = vmatprep.subr.bf16.mxu0 %v4626_v33 }
  0xc0   :  { %709 = vmatpush1.bf16.msra.mxu1 %v4641_v38 }
  0xc1   :  { %710 = vmatprep.subr.bf16.mxu1 %v4644_v39 }
  0xc2   :  { %670 = vmatpush1.bf16.msra.mxu0 %v4635_v36 }
  0xc3   :  { %671 = vmatprep.subr.bf16.mxu0 %v4637_v37 }
  0xc4   :  { %711 = vmatpush1.bf16.msra.mxu1 %v4656_v44 }
  0xc5   :  { %712 = vmatprep.subr.bf16.mxu1 %v4661_v46 }
  0xc6   :  { %672 = vmatpush1.bf16.msra.mxu0 %v4650_v41 }
  0xc7   :  { %673 = vmatprep.subr.bf16.mxu0 %v4653_v43 }
  0xc8   :  { %713 = vmatpush1.bf16.msra.mxu1 %v4666_v48 }
  0xc9   :  { %714 = vmatprep.subr.bf16.mxu1 %v4668_v49 }
  0xca   :  { %674 = vmatpush1.bf16.msra.mxu0 %v4658_v45 }
  0xcb   :  { %675 = vmatprep.subr.bf16.mxu0 %v4663_v47 }
  0xcc   :  { %715 = vmatpush1.bf16.msra.mxu1 %v4677_v52 }
  0xcd   :  { %716 = vmatprep.subr.bf16.mxu1 %v4680_v53 }
  0xce   :  { %676 = vmatpush1.bf16.msra.mxu0 %v4672_v50 }
  0xcf   :  { %677 = vmatprep.subr.bf16.mxu0 %v4675_v51 }
  0xd0   :  { %717 = vmatpush1.bf16.msra.mxu1 %v4689_v56 }
  0xd1   :  { %718 = vmatprep.subr.bf16.mxu1 %v4692_v57 }
  0xd2   :  { %678 = vmatpush1.bf16.msra.mxu0 %v6799_v55 }
  0xd3   :  { %679 = vmatprep.subr.bf16.mxu0 %v6800_v63  ;;  %v195_v63 = vlaneseq }
  0xd4   :  { %719 = vmatpush1.bf16.msra.mxu1 %v4701_v60 }
  0xd5   :  { %720 = vmatprep.subr.bf16.mxu1 %v4704_v61  ;;  %v193_v61 = vld [vmem:[%s6508_s2] sm:$0xf] }
  0xd6   :  { %680 = vmatpush1.bf16.msra.mxu0 %v4696_v58  ;;  %v4791_v58 = vshrl.u32 %v195_v63, 7 }
  0xd7   :  { %681 = vmatprep.subr.bf16.mxu0 %v4699_v59 }
  0xd8   :  { %721 = vmatpush1.bf16.msra.mxu1 %v4711_v40  ;;  %6801 = vst [vmem:[#allocation43_spill] sm:$0xff] %v4791_v58  ;;  %v6546_v59 = vsub.s32 0, %v4791_v58  ;;  %v6563_v50 = vsub.s32 2, %v4791_v58 }
  0xd9   :  { %722 = vmatprep.subr.bf16.mxu1 %v4714_v42 }
  0xda   :  { %682 = vmatpush1.bf16.msra.mxu0 %v4708_v62  ;;  %v6549_v62 = vsub.s32 1, %v4791_v58 }
  0xdb   :  { %763 = vmatprep.subr.bf16.mxu0 %v4530_v0  ;;  %v4800_v0 = vrot.slane %v193_v61, %v6546_v59 }
  0xdc   :  { %723 = vmatpush1.bf16.msra.mxu1 %v4719_v54  ;;  %v4804_v54 = vrot.slane %v193_v61, %v6549_v62 }
  0xdd   :  { %804 = vmatprep.subr.bf16.mxu1 %v4543_v5  ;;  %6802 = vst [vmem:[#allocation44_spill] sm:$0xff] %v4800_v0  ;;  %v6554_v5 = vsub.s32 3, %v4791_v58 }
  0xde   :  { %6803 = vst [vmem:[#allocation45_spill] sm:$0xff] %v4804_v54 }
  0xdf   :  { %v4811_v56 = vrot.slane %v193_v61, %v6554_v5 }
  0xe1   :  { %6804 = vst [vmem:[#allocation46_spill] sm:$0xff] %v4811_v56 }
 0x170   :  { %v574_v63 = vpop.f32.mrb[0].mxu0 }
 0x171   :  { %v575_v42 = vadd.f32 %v574_v63, %v4800_v0  ;;  %v576_v40 = vpop.f32.mrb[1].mxu0 }
 0x172   :  { %v577_v60 = vadd.f32 %v576_v40, %v4804_v54  ;;  %v578_v55 = vpop.f32.mrb[2].mxu0  ;;  %v615_v62 = vpop.f32.mrb[0].mxu1  ;;  %v4817_v40 = vrot.slane %v193_v61, %v6563_v50 }
 0x173   :  { %v3218_v57 = vmul.f32 -1.442695, %v575_v42  ;;  %v579_v51 = vpop.f32.mrb[3].mxu0  ;;  %v617_v53 = vpop.f32.mrb[1].mxu1 }
 0x174   :  { %v3219_v59 = vmul.f32 -1.442695, %v577_v60  ;;  %v618_v47 = vadd.f32 %v617_v53, %v4811_v56  ;;  %v619_v63 = vpop.f32.mrb[2].mxu1  ;;  %v616_v55 = vadd.f32 %v615_v62, %v4817_v40  ;;  %v216_v53 = vld [vmem:[#allocation11] sm:$0xff]  ;;  %v648_v62 = vld [vmem:[#allocation3 + $0x8] sm:$0xff] }
 0x175   :  { %3787 = vpow2.f32 %v3218_v57  ;;  %v620_v42 = vpop.f32.mrb[3].mxu1 }
 0x176   :  { %3789 = vpow2.f32 %v3219_v59  ;;  %v3220_v51 = vmul.f32 -1.442695, %v618_v47 }
 0x178   :  { %3791 = vpow2.f32 %v3220_v51 }
 0x179   :  { %3793 = vtanh.f32 %v616_v55  ;;  %v649_v55 = vpack.c.bf16 %v648_v62, %v648_v62  ;;  %v6817_v62 = vld [vmem:[#allocation40_spill] sm:$0xff] }
 0x17f   :  { %v3788_v5 = vpop.eup %3787 }
 0x180   :  { %v3790_v60 = vpop.eup %3789  ;;  %v625_v54 = vadd.f32 1.0, %v3788_v5 }
 0x181   :  { %v631_v57 = vadd.f32 1.0, %v3790_v60  ;;  %v6810_v60 = vld [vmem:[#allocation28_spill] sm:$0xff] }
 0x182   :  { %3795 = vrcp.f32 %v625_v54  ;;  %v3792_v59 = vpop.eup %3791 }
 0x183   :  { %3797 = vrcp.f32 %v631_v57  ;;  %v3794_v0 = vpop.eup %3793  ;;  %v638_v56 = vadd.f32 1.0, %v3792_v59  ;;  %v6811_v57 = vld [vmem:[#allocation34_spill] sm:$0xff]  ;;  %v6812_v59 = vld [vmem:[#allocation31_spill] sm:$0xff] }
 0x185   :  { %3799 = vrcp.f32 %v638_v56  ;;  %v6808_v56 = vld [vmem:[#allocation27_spill] sm:$0xff] }
 0x18c   :  { %v3796_v63 = vpop.eup %3795 }
 0x18d   :  { %v3798_v58 = vpop.eup %3797  ;;  %v642_v61 = vmul.f32 %v3796_v63, %v3794_v0  ;;  %v6806_v0 = vld [vmem:[#allocation25_spill] sm:$0xff]  ;;  %v6814_v63 = vld [vmem:[#allocation32_spill] sm:$0xff] }
 0x18e   :  { %v641_v50 = vmul.f32 %v3798_v58, %v216_v53  ;;  %v6809_v58 = vld [vmem:[#allocation33_spill] sm:$0xff] }
 0x18f   :  { %v3800_v47 = vpop.eup %3799  ;;  %v6813_v53 = vld [vmem:[#allocation37_spill] sm:$0xff] }
 0x190   :  { %v4820_v42 = vadd.f32 %v642_v61, %v641_v50  ;;  %v6807_v50 = vld [vmem:[#allocation30_spill] sm:$0xff] }
 0x191   :  { %v6815_v61 = vld [vmem:[#allocation38_spill] sm:$0xff] }
 0x192   :  { %3801 = vtanh.f32 %v4820_v42 }
 0x19c   :  { %v3802_v5 = vpop.eup %3801 }
 0x19d   :  { %v645_v51 = vmul.f32 %v3802_v5, %v3800_v47  ;;  %v6816_v47 = vld [vmem:[#allocation35_spill] sm:$0xff]  ;;  %v6818_v5 = vld [vmem:[#allocation36_spill] sm:$0xff] }
 0x19f   :  { %v4823_v54 = vpack.c.bf16 %v645_v51, %v645_v51  ;;  %v6819_v51 = vld [vmem:[#allocation41_spill] sm:$0xff] }
 0x1a1   :  { %6805 = vst [vmem:[#allocation47_spill] sm:$0xff] %v4823_v54  ;;  %683 = vmatprep.mubr.bf16.mxu0 %v4823_v54  ;;  %724 = vmatprep.mubr.bf16.mxu1 %v4823_v54  ;;  %v6821_v54 = vld [vmem:[#allocation42_spill] sm:$0xff] }
 0x1a2   :  { %684 = vmatmul.mubr.bf16.vlgmr.msra.gmra.mrb[4].mxu0 %v649_v55  ;;  %725 = vmatmul.mubr.bf16.vlgmr.msra.gmra.mrb[4].mxu1 %v649_v55  ;;  %v6820_v55 = vld [vmem:[#allocation39_spill] sm:$0xff] }
 0x1a3   :  { %764 = vmatpush1.bf16.msra.mxu0 %v4532_v1  ;;  %805 = vmatpush1.bf16.msra.mxu1 %v4545_v6 }
 0x1a4   :  { %765 = vmatprep.subr.bf16.mxu0 %v4535_v2  ;;  %806 = vmatprep.subr.bf16.mxu1 %v4555_v9 }
 0x1a7   :  { %766 = vmatpush1.bf16.msra.mxu0 %v4538_v3  ;;  %807 = vmatpush1.bf16.msra.mxu1 %v4557_v10 }
 0x1a8   :  { %767 = vmatprep.subr.bf16.mxu0 %v4541_v4  ;;  %808 = vmatprep.subr.bf16.mxu1 %v4565_v13 }
 0x1ab   :  { %768 = vmatpush1.bf16.msra.mxu0 %v4548_v7  ;;  %809 = vmatpush1.bf16.msra.mxu1 %v4569_v14 }
 0x1ac   :  { %769 = vmatprep.subr.bf16.mxu0 %v4552_v8  ;;  %810 = vmatprep.subr.bf16.mxu1 %v4572_v15 }
 0x1af   :  { %770 = vmatpush1.bf16.msra.mxu0 %v4561_v11  ;;  %811 = vmatpush1.bf16.msra.mxu1 %v4581_v18 }
 0x1b0   :  { %771 = vmatprep.subr.bf16.mxu0 %v4563_v12  ;;  %812 = vmatprep.subr.bf16.mxu1 %v4584_v19 }
 0x1b3   :  { %772 = vmatpush1.bf16.msra.mxu0 %v4575_v16  ;;  %813 = vmatpush1.bf16.msra.mxu1 %v4593_v22 }
 0x1b4   :  { %773 = vmatprep.subr.bf16.mxu0 %v4578_v17  ;;  %814 = vmatprep.subr.bf16.mxu1 %v4596_v23 }
 0x1b7   :  { %774 = vmatpush1.bf16.msra.mxu0 %v4587_v20  ;;  %815 = vmatpush1.bf16.msra.mxu1 %v4605_v26 }
 0x1b8   :  { %775 = vmatprep.subr.bf16.mxu0 %v4589_v21  ;;  %816 = vmatprep.subr.bf16.mxu1 %v4608_v27 }
 0x1bb   :  { %776 = vmatpush1.bf16.msra.mxu0 %v4599_v24  ;;  %817 = vmatpush1.bf16.msra.mxu1 %v4617_v30 }
 0x1bc   :  { %777 = vmatprep.subr.bf16.mxu0 %v4602_v25  ;;  %818 = vmatprep.subr.bf16.mxu1 %v4620_v31 }
 0x1bf   :  { %778 = vmatpush1.bf16.msra.mxu0 %v4611_v28  ;;  %819 = vmatpush1.bf16.msra.mxu1 %v4629_v34 }
 0x1c0   :  { %779 = vmatprep.subr.bf16.mxu0 %v4613_v29  ;;  %820 = vmatprep.subr.bf16.mxu1 %v4632_v35 }
 0x1c3   :  { %780 = vmatpush1.bf16.msra.mxu0 %v4623_v32  ;;  %821 = vmatpush1.bf16.msra.mxu1 %v4641_v38 }
 0x1c4   :  { %781 = vmatprep.subr.bf16.mxu0 %v4626_v33  ;;  %822 = vmatprep.subr.bf16.mxu1 %v4644_v39 }
 0x1c7   :  { %782 = vmatpush1.bf16.msra.mxu0 %v4635_v36  ;;  %823 = vmatpush1.bf16.msra.mxu1 %v4656_v44 }
 0x1c8   :  { %783 = vmatprep.subr.bf16.mxu0 %v4637_v37  ;;  %824 = vmatprep.subr.bf16.mxu1 %v4661_v46 }
 0x1cb   :  { %784 = vmatpush1.bf16.msra.mxu0 %v4650_v41  ;;  %825 = vmatpush1.bf16.msra.mxu1 %v4666_v48 }
 0x1cc   :  { %785 = vmatprep.subr.bf16.mxu0 %v4653_v43  ;;  %826 = vmatprep.subr.bf16.mxu1 %v4668_v49 }
 0x1cf   :  { %786 = vmatpush1.bf16.msra.mxu0 %v4658_v45  ;;  %827 = vmatpush1.bf16.msra.mxu1 %v4677_v52 }
 0x1d0   :  { %787 = vmatprep.subr.bf16.mxu0 %v6806_v0  ;;  %828 = vmatprep.subr.bf16.mxu1 %v6807_v50 }
 0x1d3   :  { %788 = vmatpush1.bf16.msra.mxu0 %v6808_v56  ;;  %829 = vmatpush1.bf16.msra.mxu1 %v6809_v58  ;;  %v6825_v56 = vld [vmem:[#allocation45_spill] sm:$0xff] }
 0x1d4   :  { %789 = vmatprep.subr.bf16.mxu0 %v6810_v60  ;;  %830 = vmatprep.subr.bf16.mxu1 %v6811_v57  ;;  %v6822_v57 = vld [vmem:[#allocation21_spill] sm:$0xff]  ;;  %v6824_v60 = vld [vmem:[#allocation44_spill] sm:$0xff] }
 0x1d7   :  { %790 = vmatpush1.bf16.msra.mxu0 %v6812_v59  ;;  %831 = vmatpush1.bf16.msra.mxu1 %v6813_v53  ;;  %v6823_v59 = vld [vmem:[#allocation22_spill] sm:$0xff] }
 0x1d8   :  { %791 = vmatprep.subr.bf16.mxu0 %v6814_v63  ;;  %832 = vmatprep.subr.bf16.mxu1 %v6815_v61 }
 0x1db   :  { %792 = vmatpush1.bf16.msra.mxu0 %v6816_v47  ;;  %833 = vmatpush1.bf16.msra.mxu1 %v6817_v62 }
 0x1dc   :  { %793 = vmatprep.subr.bf16.mxu0 %v6818_v5  ;;  %834 = vmatprep.subr.bf16.mxu1 %v6819_v51 }
 0x1df   :  { %794 = vmatpush1.bf16.msra.mxu0 %v6820_v55  ;;  %835 = vmatpush1.bf16.msra.mxu1 %v6821_v54  ;;  %v6826_v54 = vld [vmem:[#allocation46_spill] sm:$0xff] }
 0x1e0   :  { %875 = vmatprep.subr.bf16.mxu0 %v6822_v57  ;;  %916 = vmatprep.subr.bf16.mxu1 %v6823_v59 }
 0x275   :  { %v685_v53 = vpop.f32.mrb[4].mxu0  ;;  %v726_v63 = vpop.f32.mrb[4].mxu1 }
 0x276   :  { %v686_v61 = vadd.f32 %v685_v53, %v6824_v60  ;;  %v687_v58 = vpop.f32.mrb[5].mxu0  ;;  %v728_v47 = vpop.f32.mrb[5].mxu1  ;;  %v727_v59 = vadd.f32 %v726_v63, %v4817_v40  ;;  %v760_v63 = vld [vmem:[#allocation3 + $0x10] sm:$0xff] }
 0x277   :  { %v688_v62 = vadd.f32 %v687_v58, %v6825_v56  ;;  %v689_v50 = vpop.f32.mrb[6].mxu0  ;;  %v730_v5 = vpop.f32.mrb[6].mxu1  ;;  %v729_v57 = vadd.f32 %v728_v47, %v6826_v54 }
 0x278   :  { %v3221_v0 = vmul.f32 -1.442695, %v686_v61  ;;  %v690_v51 = vpop.f32.mrb[7].mxu0  ;;  %v731_v52 = vpop.f32.mrb[7].mxu1 }
 0x279   :  { %v3222_v55 = vmul.f32 -1.442695, %v688_v62  ;;  %v3223_v45 = vmul.f32 -1.442695, %v729_v57 }
 0x27a   :  { %3803 = vpow2.f32 %v3221_v0 }
 0x27b   :  { %3805 = vpow2.f32 %v3222_v55  ;;  %v761_v55 = vpack.c.bf16 %v760_v63, %v760_v63 }
 0x27c   :  { %3807 = vpow2.f32 %v3223_v45 }
 0x27d   :  { %3809 = vtanh.f32 %v727_v59 }
 0x284   :  { %v3804_v49 = vpop.eup %3803 }
 0x285   :  { %v3806_v53 = vpop.eup %3805  ;;  %v736_v60 = vadd.f32 1.0, %v3804_v49 }
 0x286   :  { %v742_v43 = vadd.f32 1.0, %v3806_v53  ;;  %v3808_v50 = vpop.eup %3807 }
 0x287   :  { %3811 = vrcp.f32 %v736_v60  ;;  %v3810_v58 = vpop.eup %3809  ;;  %v749_v52 = vadd.f32 1.0, %v3808_v50 }
 0x288   :  { %3813 = vrcp.f32 %v742_v43 }
 0x289   :  { %3815 = vrcp.f32 %v749_v52 }
 0x291   :  { %v3812_v61 = vpop.eup %3811 }
 0x292   :  { %v3814_v62 = vpop.eup %3813  ;;  %v753_v0 = vmul.f32 %v3812_v61, %v3810_v58 }
 0x293   :  { %v752_v5 = vmul.f32 %v3814_v62, %v4820_v42  ;;  %v3816_v45 = vpop.eup %3815 }
 0x295   :  { %v4896_v47 = vadd.f32 %v753_v0, %v752_v5  ;;  %v872_v0 = vld [vmem:[#allocation3 + $0x18] sm:$0xff] }
 0x296   :  { %v873_v63 = vpack.c.bf16 %v872_v0, %v872_v0  ;;  %v5082_v0 = vld [vmem:[#allocation6 + $0x108] ss:$16 sps:$4 sm:$0xff]  }
 0x297   :  { %3817 = vtanh.f32 %v4896_v47 }
 0x2a1   :  { %v3818_v49 = vpop.eup %3817 }
 0x2a2   :  { %v756_v51 = vmul.f32 %v3818_v49, %v3816_v45 }
 0x2a4   :  { %v4899_v60 = vpack.c.bf16 %v756_v51, %v756_v51  ;;  %v4983_v51 = vld [vmem:[#allocation6] ss:$16 sps:$4 sm:$0xff]  }
 0x2a6   :  { %6827 = vst [vmem:[#allocation21_spill] sm:$0xff] %v4899_v60  ;;  %795 = vmatprep.mubr.bf16.mxu0 %v4899_v60  ;;  %836 = vmatprep.mubr.bf16.mxu1 %v4899_v60  ;;  %v5097_v60 = vld [vmem:[#allocation6 + $0x144] ss:$16 sps:$4 sm:$0xff]  }
 0x2a7   :  { %796 = vmatmul.mubr.bf16.vlgmr.msra.gmra.mrb[8].mxu0 %v761_v55  ;;  %837 = vmatmul.mubr.bf16.vlgmr.msra.gmra.mrb[8].mxu1 %v761_v55  ;;  %v4989_v55 = vld [vmem:[#allocation6 + $0x24] ss:$16 sps:$4 sm:$0xff]  }
 0x2a8   :  { %876 = vmatpush1.bf16.msra.mxu0 %v4532_v1  ;;  %917 = vmatpush1.bf16.msra.mxu1 %v4545_v6  ;;  %v6828_v1 = vld [vmem:[#allocation23_spill] sm:$0xff]  ;;  %v6832_v6 = vld [vmem:[#allocation25_spill] sm:$0xff] }
 0x2a9   :  { %877 = vmatprep.subr.bf16.mxu0 %v4535_v2  ;;  %918 = vmatprep.subr.bf16.mxu1 %v4555_v9  ;;  %v6829_v2 = vld [vmem:[#allocation26_spill] sm:$0xff]  ;;  %v6835_v9 = vld [vmem:[#allocation33_spill] sm:$0xff]  ;;  %6852 = vst [vmem:[#allocation23_spill] sm:$0xff] %v5082_v0  ;;  %6856 = vst [vmem:[#allocation25_spill] sm:$0xff] %v5097_v60 }
 0x2ac   :  { %878 = vmatpush1.bf16.msra.mxu0 %v4538_v3  ;;  %919 = vmatpush1.bf16.msra.mxu1 %v4557_v10  ;;  %v6830_v3 = vld [vmem:[#allocation24_spill] sm:$0xff] }
 0x2ad   :  { %879 = vmatprep.subr.bf16.mxu0 %v4541_v4  ;;  %920 = vmatprep.subr.bf16.mxu1 %v4565_v13  ;;  %v6831_v4 = vld [vmem:[#allocation29_spill] sm:$0xff]  ;;  %v6836_v10 = vld [vmem:[#allocation28_spill] sm:$0xff] }
 0x2ae   :  { %v6839_v13 = vld [vmem:[#allocation37_spill] sm:$0xff] }
 0x2b0   :  { %880 = vmatpush1.bf16.msra.mxu0 %v4548_v7  ;;  %921 = vmatpush1.bf16.msra.mxu1 %v4569_v14  ;;  %v6833_v7 = vld [vmem:[#allocation30_spill] sm:$0xff]  ;;  %v6840_v14 = vld [vmem:[#allocation32_spill] sm:$0xff] }
 0x2b1   :  { %881 = vmatprep.subr.bf16.mxu0 %v4552_v8  ;;  %922 = vmatprep.subr.bf16.mxu1 %v4572_v15  ;;  %v6834_v8 = vld [vmem:[#allocation27_spill] sm:$0xff]  ;;  %v6841_v15 = vld [vmem:[#allocation38_spill] sm:$0xff] }
 0x2b4   :  { %882 = vmatpush1.bf16.msra.mxu0 %v4561_v11  ;;  %923 = vmatpush1.bf16.msra.mxu1 %v4581_v18  ;;  %v6837_v11 = vld [vmem:[#allocation34_spill] sm:$0xff]  ;;  %v6844_v18 = vld [vmem:[#allocation36_spill] sm:$0xff] }
 0x2b5   :  { %883 = vmatprep.subr.bf16.mxu0 %v4563_v12  ;;  %924 = vmatprep.subr.bf16.mxu1 %v4584_v19  ;;  %v6838_v12 = vld [vmem:[#allocation31_spill] sm:$0xff]  ;;  %v6845_v19 = vld [vmem:[#allocation41_spill] sm:$0xff] }
 0x2b8   :  { %884 = vmatpush1.bf16.msra.mxu0 %v4575_v16  ;;  %925 = vmatpush1.bf16.msra.mxu1 %v4593_v22  ;;  %v6842_v16 = vld [vmem:[#allocation35_spill] sm:$0xff] }
 0x2b9   :  { %885 = vmatprep.subr.bf16.mxu0 %v4578_v17  ;;  %926 = vmatprep.subr.bf16.mxu1 %v4596_v23  ;;  %v6843_v17 = vld [vmem:[#allocation40_spill] sm:$0xff]  ;;  %v4965_v22 = vld [vmem:[#allocation6 + $0x4] ss:$16 sps:$4 sm:$0xff]  }
 0x2ba   :  { %6848 = vst [vmem:[#allocation22_spill] sm:$0xff] %v4965_v22  ;;  %v4968_v23 = vld [vmem:[#allocation6 + $0xc] ss:$16 sps:$4 sm:$0xff]  }
 0x2bb   :  { %6849 = vst [vmem:[#allocation45_spill] sm:$0xff] %v4968_v23 }
 0x2bc   :  { %886 = vmatpush1.bf16.msra.mxu0 %v4587_v20  ;;  %927 = vmatpush1.bf16.msra.mxu1 %v4605_v26  ;;  %v6846_v20 = vld [vmem:[#allocation39_spill] sm:$0xff]  ;;  %v6850_v26 = vld [vmem:[#allocation44_spill] sm:$0xff] }
 0x2bd   :  { %887 = vmatprep.subr.bf16.mxu0 %v4589_v21  ;;  %928 = vmatprep.subr.bf16.mxu1 %v4608_v27  ;;  %v6847_v21 = vld [vmem:[#allocation42_spill] sm:$0xff] }
 0x2c0   :  { %888 = vmatpush1.bf16.msra.mxu0 %v4599_v24  ;;  %929 = vmatpush1.bf16.msra.mxu1 %v4617_v30 }
 0x2c1   :  { %889 = vmatprep.subr.bf16.mxu0 %v4602_v25  ;;  %930 = vmatprep.subr.bf16.mxu1 %v4620_v31 }
 0x2c4   :  { %890 = vmatpush1.bf16.msra.mxu0 %v4611_v28  ;;  %931 = vmatpush1.bf16.msra.mxu1 %v4629_v34 }
 0x2c5   :  { %891 = vmatprep.subr.bf16.mxu0 %v4613_v29  ;;  %932 = vmatprep.subr.bf16.mxu1 %v4632_v35 }
 0x2c8   :  { %892 = vmatpush1.bf16.msra.mxu0 %v4623_v32  ;;  %933 = vmatpush1.bf16.msra.mxu1 %v4641_v38 }
 0x2c9   :  { %893 = vmatprep.subr.bf16.mxu0 %v4626_v33  ;;  %934 = vmatprep.subr.bf16.mxu1 %v4644_v39 }
 0x2cc   :  { %894 = vmatpush1.bf16.msra.mxu0 %v4635_v36  ;;  %935 = vmatpush1.bf16.msra.mxu1 %v4656_v44 }
 0x2cd   :  { %895 = vmatprep.subr.bf16.mxu0 %v4637_v37  ;;  %936 = vmatprep.subr.bf16.mxu1 %v4661_v46 }
 0x2d0   :  { %896 = vmatpush1.bf16.msra.mxu0 %v4650_v41  ;;  %937 = vmatpush1.bf16.msra.mxu1 %v4666_v48 }
 0x2d1   :  { %897 = vmatprep.subr.bf16.mxu0 %v6828_v1  ;;  %938 = vmatprep.subr.bf16.mxu1 %v6829_v2  ;;  %v4992_v1 = vld [vmem:[#allocation6 + $0x2c] ss:$16 sps:$4 sm:$0xff]  }
 0x2d4   :  { %898 = vmatpush1.bf16.msra.mxu0 %v6830_v3  ;;  %939 = vmatpush1.bf16.msra.mxu1 %v6831_v4  ;;  %v4995_v3 = vld [vmem:[#allocation6 + $0x20] ss:$16 sps:$4 sm:$0xff]  }
 0x2d5   :  { %899 = vmatprep.subr.bf16.mxu0 %v6832_v6  ;;  %940 = vmatprep.subr.bf16.mxu1 %v6833_v7  ;;  %v4998_v6 = vld [vmem:[#allocation6 + $0x28] ss:$16 sps:$4 sm:$0xff]  }
 0x2d8   :  { %900 = vmatpush1.bf16.msra.mxu0 %v6834_v8  ;;  %941 = vmatpush1.bf16.msra.mxu1 %v6835_v9 }
 0x2d9   :  { %901 = vmatprep.subr.bf16.mxu0 %v6836_v10  ;;  %942 = vmatprep.subr.bf16.mxu1 %v6837_v11 }
 0x2dc   :  { %902 = vmatpush1.bf16.msra.mxu0 %v6838_v12  ;;  %943 = vmatpush1.bf16.msra.mxu1 %v6839_v13 }
 0x2dd   :  { %903 = vmatprep.subr.bf16.mxu0 %v6840_v14  ;;  %944 = vmatprep.subr.bf16.mxu1 %v6841_v15 }
 0x2e0   :  { %904 = vmatpush1.bf16.msra.mxu0 %v6842_v16  ;;  %945 = vmatpush1.bf16.msra.mxu1 %v6843_v17 }
 0x2e1   :  { %905 = vmatprep.subr.bf16.mxu0 %v6844_v18  ;;  %946 = vmatprep.subr.bf16.mxu1 %v6845_v19 }
 0x2e4   :  { %906 = vmatpush1.bf16.msra.mxu0 %v6846_v20  ;;  %947 = vmatpush1.bf16.msra.mxu1 %v6847_v21 }
 0x2e5   :  { %987 = vmatprep.subr.bf16.mxu0 %v4965_v22  ;;  %1028 = vmatprep.subr.bf16.mxu1 %v4968_v23 }
 0x37a   :  { %v797_v24 = vpop.f32.mrb[8].mxu0  ;;  %v838_v25 = vpop.f32.mrb[8].mxu1 }
 0x37b   :  { %v798_v27 = vadd.f32 %v797_v24, %v6850_v26  ;;  %v799_v28 = vpop.f32.mrb[9].mxu0  ;;  %v840_v29 = vpop.f32.mrb[9].mxu1  ;;  %v839_v39 = vadd.f32 %v838_v25, %v4817_v40  ;;  %v5001_v24 = vld [vmem:[#allocation6 + $0x44] ss:$16 sps:$4 sm:$0xff]   ;;  %v5004_v25 = vld [vmem:[#allocation6 + $0x4c] ss:$16 sps:$4 sm:$0xff]  }
 0x37c   :  { %v800_v30 = vadd.f32 %v799_v28, %v6825_v56  ;;  %v801_v31 = vpop.f32.mrb[10].mxu0  ;;  %v842_v32 = vpop.f32.mrb[10].mxu1  ;;  %v841_v37 = vadd.f32 %v840_v29, %v6826_v54  ;;  %v5010_v28 = vld [vmem:[#allocation6 + $0x48] ss:$16 sps:$4 sm:$0xff]   ;;  %v5013_v29 = vld [vmem:[#allocation6 + $0x64] ss:$16 sps:$4 sm:$0xff]  }
 0x37d   :  { %v3224_v33 = vmul.f32 -1.442695, %v798_v27  ;;  %v802_v34 = vpop.f32.mrb[11].mxu0  ;;  %v843_v35 = vpop.f32.mrb[11].mxu1  ;;  %v5007_v27 = vld [vmem:[#allocation6 + $0x40] ss:$16 sps:$4 sm:$0xff]  }
 0x37e   :  { %v3225_v36 = vmul.f32 -1.442695, %v800_v30  ;;  %v3226_v38 = vmul.f32 -1.442695, %v841_v37  ;;  %v5016_v30 = vld [vmem:[#allocation6 + $0x6c] ss:$16 sps:$4 sm:$0xff]  }
 0x37f   :  { %3819 = vpow2.f32 %v3224_v33  ;;  %v5019_v31 = vld [vmem:[#allocation6 + $0x60] ss:$16 sps:$4 sm:$0xff]   ;;  %v5022_v32 = vld [vmem:[#allocation6 + $0x68] ss:$16 sps:$4 sm:$0xff]   ;;  %v5025_v33 = vld [vmem:[#allocation6 + $0x84] ss:$16 sps:$4 sm:$0xff]  }
 0x380   :  { %3821 = vpow2.f32 %v3225_v36  ;;  %v5028_v34 = vld [vmem:[#allocation6 + $0x8c] ss:$16 sps:$4 sm:$0xff]   ;;  %v5031_v35 = vld [vmem:[#allocation6 + $0x80] ss:$16 sps:$4 sm:$0xff]   ;;  %v5034_v36 = vld [vmem:[#allocation6 + $0x88] ss:$16 sps:$4 sm:$0xff]  }
 0x381   :  { %3823 = vpow2.f32 %v3226_v38  ;;  %v5037_v37 = vld [vmem:[#allocation6 + $0xa4] ss:$16 sps:$4 sm:$0xff]   ;;  %v5040_v38 = vld [vmem:[#allocation6 + $0xac] ss:$16 sps:$4 sm:$0xff]  }
 0x382   :  { %3825 = vtanh.f32 %v839_v39  ;;  %v5043_v39 = vld [vmem:[#allocation6 + $0xa0] ss:$16 sps:$4 sm:$0xff]  }
 0x389   :  { %v3820_v41 = vpop.eup %3819 }
 0x38a   :  { %v3822_v43 = vpop.eup %3821  ;;  %v848_v44 = vadd.f32 1.0, %v3820_v41  ;;  %v5046_v41 = vld [vmem:[#allocation6 + $0xa8] ss:$16 sps:$4 sm:$0xff]  }
 0x38b   :  { %v854_v46 = vadd.f32 1.0, %v3822_v43  ;;  %v3824_v42 = vpop.eup %3823  ;;  %v5049_v43 = vld [vmem:[#allocation6 + $0xc4] ss:$16 sps:$4 sm:$0xff]  }
 0x38c   :  { %3827 = vrcp.f32 %v848_v44  ;;  %v3826_v57 = vpop.eup %3825  ;;  %v861_v53 = vadd.f32 1.0, %v3824_v42  ;;  %v5052_v44 = vld [vmem:[#allocation6 + $0xcc] ss:$16 sps:$4 sm:$0xff]   ;;  %v5058_v42 = vld [vmem:[#allocation6 + $0xc8] ss:$16 sps:$4 sm:$0xff]  }
 0x38d   :  { %3829 = vrcp.f32 %v854_v46  ;;  %v5055_v46 = vld [vmem:[#allocation6 + $0xc0] ss:$16 sps:$4 sm:$0xff]  }
 0x38e   :  { %3831 = vrcp.f32 %v861_v53  ;;  %v5067_v53 = vld [vmem:[#allocation6 + $0xe0] ss:$16 sps:$4 sm:$0xff]  }
 0x396   :  { %v3828_v59 = vpop.eup %3827 }
 0x397   :  { %v3830_v50 = vpop.eup %3829  ;;  %v865_v58 = vmul.f32 %v3828_v59, %v3826_v57  ;;  %v5061_v57 = vld [vmem:[#allocation6 + $0xe4] ss:$16 sps:$4 sm:$0xff]   ;;  %v5064_v59 = vld [vmem:[#allocation6 + $0xec] ss:$16 sps:$4 sm:$0xff]  }
 0x398   :  { %v864_v61 = vmul.f32 %v3830_v50, %v4896_v47  ;;  %v3832_v62 = vpop.eup %3831  ;;  %v4986_v47 = vld [vmem:[#allocation6 + $0x8] ss:$16 sps:$4 sm:$0xff]  }
 0x399   :  { %v5070_v50 = vld [vmem:[#allocation6 + $0xe8] ss:$16 sps:$4 sm:$0xff]  }
 0x39a   :  { %v4976_v52 = vadd.f32 %v865_v58, %v864_v61  ;;  %v5073_v58 = vld [vmem:[#allocation6 + $0x104] ss:$16 sps:$4 sm:$0xff]   ;;  %v5076_v61 = vld [vmem:[#allocation6 + $0x10c] ss:$16 sps:$4 sm:$0xff]  }
 0x39c   :  { %3833 = vtanh.f32 %v4976_v52 }
 0x3a6   :  { %v3834_v5 = vpop.eup %3833 }
 0x3a7   :  { %v868_v45 = vmul.f32 %v3834_v5, %v3832_v62  ;;  %v5079_v62 = vld [vmem:[#allocation6 + $0x100] ss:$16 sps:$4 sm:$0xff]   ;;  %v5085_v5 = vld [vmem:[#allocation6 + $0x124] ss:$16 sps:$4 sm:$0xff]  }
 0x3a8   :  { %6853 = vst [vmem:[#allocation26_spill] sm:$0xff] %v5085_v5 }
 0x3a9   :  { %v4979_v49 = vpack.c.bf16 %v868_v45, %v868_v45  ;;  %v5088_v45 = vld [vmem:[#allocation6 + $0x12c] ss:$16 sps:$4 sm:$0xff]  }
 0x3aa   :  { %6854 = vst [vmem:[#allocation24_spill] sm:$0xff] %v5088_v45 }
 0x3ab   :  { %6851 = vst [vmem:[#allocation46_spill] sm:$0xff] %v4979_v49  ;;  %907 = vmatprep.mubr.bf16.mxu0 %v4979_v49  ;;  %948 = vmatprep.mubr.bf16.mxu1 %v4979_v49  ;;  %v5094_v49 = vld [vmem:[#allocation6 + $0x128] ss:$16 sps:$4 sm:$0xff]  }
 0x3ac   :  { %908 = vmatmul.mubr.bf16.vlgmr.msra.gmra.mrb[12].mxu0 %v873_v63  ;;  %949 = vmatmul.mubr.bf16.vlgmr.msra.gmra.mrb[12].mxu1 %v873_v63  ;;  %v5091_v63 = vld [vmem:[#allocation6 + $0x120] ss:$16 sps:$4 sm:$0xff]   ;;  %6855 = vst [vmem:[#allocation29_spill] sm:$0xff] %v5094_v49 }
 0x3ad   :  { %988 = vmatpush1.bf16.msra.mxu0 %v4983_v51  ;;  %1029 = vmatpush1.bf16.msra.mxu1 %v4986_v47 }
 0x3ae   :  { %989 = vmatprep.subr.bf16.mxu0 %v4989_v55  ;;  %1030 = vmatprep.subr.bf16.mxu1 %v4992_v1 }
 0x3b1   :  { %990 = vmatpush1.bf16.msra.mxu0 %v4995_v3  ;;  %1031 = vmatpush1.bf16.msra.mxu1 %v4998_v6 }
 0x3b2   :  { %991 = vmatprep.subr.bf16.mxu0 %v5001_v24  ;;  %1032 = vmatprep.subr.bf16.mxu1 %v5004_v25 }
 0x3b5   :  { %992 = vmatpush1.bf16.msra.mxu0 %v5007_v27  ;;  %1033 = vmatpush1.bf16.msra.mxu1 %v5010_v28 }
 0x3b6   :  { %993 = vmatprep.subr.bf16.mxu0 %v5013_v29  ;;  %1034 = vmatprep.subr.bf16.mxu1 %v5016_v30 }
 0x3b9   :  { %994 = vmatpush1.bf16.msra.mxu0 %v5019_v31  ;;  %1035 = vmatpush1.bf16.msra.mxu1 %v5022_v32 }
 0x3ba   :  { %995 = vmatprep.subr.bf16.mxu0 %v5025_v33  ;;  %1036 = vmatprep.subr.bf16.mxu1 %v5028_v34 }
 0x3bd   :  { %996 = vmatpush1.bf16.msra.mxu0 %v5031_v35  ;;  %1037 = vmatpush1.bf16.msra.mxu1 %v5034_v36 }
 0x3be   :  { %997 = vmatprep.subr.bf16.mxu0 %v5037_v37  ;;  %1038 = vmatprep.subr.bf16.mxu1 %v5040_v38 }
 0x3c1   :  { %998 = vmatpush1.bf16.msra.mxu0 %v5043_v39  ;;  %1039 = vmatpush1.bf16.msra.mxu1 %v5046_v41 }
 0x3c2   :  { %999 = vmatprep.subr.bf16.mxu0 %v5049_v43  ;;  %1040 = vmatprep.subr.bf16.mxu1 %v5052_v44 }
 0x3c5   :  { %1000 = vmatpush1.bf16.msra.mxu0 %v5055_v46  ;;  %1041 = vmatpush1.bf16.msra.mxu1 %v5058_v42 }
 0x3c6   :  { %1001 = vmatprep.subr.bf16.mxu0 %v5061_v57  ;;  %1042 = vmatprep.subr.bf16.mxu1 %v5064_v59 }
 0x3c9   :  { %1002 = vmatpush1.bf16.msra.mxu0 %v5067_v53  ;;  %1043 = vmatpush1.bf16.msra.mxu1 %v5070_v50 }
 0x3ca   :  { %1003 = vmatprep.subr.bf16.mxu0 %v5073_v58  ;;  %1044 = vmatprep.subr.bf16.mxu1 %v5076_v61 }
 0x3cd   :  { %1004 = vmatpush1.bf16.msra.mxu0 %v5079_v62  ;;  %1045 = vmatpush1.bf16.msra.mxu1 %v5082_v0  ;;  %v5100_v0 = vld [vmem:[#allocation6 + $0x14c] ss:$16 sps:$4 sm:$0xff]  }
 0x3ce   :  { %1005 = vmatprep.subr.bf16.mxu0 %v5085_v5  ;;  %1046 = vmatprep.subr.bf16.mxu1 %v5088_v45  ;;  %v5103_v5 = vld [vmem:[#allocation6 + $0x140] ss:$16 sps:$4 sm:$0xff]   ;;  %v5107_v45 = vld [vmem:[#allocation6 + $0x164] ss:$16 sps:$4 sm:$0xff]  }
 0x3cf   :  { %6857 = vst [vmem:[#allocation30_spill] sm:$0xff] %v5107_v45 }
 0x3d1   :  { %1006 = vmatpush1.bf16.msra.mxu0 %v5091_v63  ;;  %1047 = vmatpush1.bf16.msra.mxu1 %v5094_v49  ;;  %v5111_v49 = vld [vmem:[#allocation6 + $0x160] ss:$16 sps:$4 sm:$0xff]  }
 0x3d2   :  { %1007 = vmatprep.subr.bf16.mxu0 %v5097_v60  ;;  %1048 = vmatprep.subr.bf16.mxu1 %v5100_v0  ;;  %6858 = vst [vmem:[#allocation27_spill] sm:$0xff] %v5111_v49  ;;  %v5115_v60 = vld [vmem:[#allocation6 + $0x184] ss:$16 sps:$4 sm:$0xff]  }
 0x3d3   :  { %6859 = vst [vmem:[#allocation33_spill] sm:$0xff] %v5115_v60 }
 0x3d5   :  { %1008 = vmatpush1.bf16.msra.mxu0 %v5103_v5  ;;  %1049 = vmatpush1.bf16.msra.mxu1 %v4666_v48 }
 0x3d6   :  { %1009 = vmatprep.subr.bf16.mxu0 %v5107_v45  ;;  %1050 = vmatprep.subr.bf16.mxu1 %v6829_v2 }
 0x3d9   :  { %1010 = vmatpush1.bf16.msra.mxu0 %v5111_v49  ;;  %1051 = vmatpush1.bf16.msra.mxu1 %v6831_v4 }
 0x3da   :  { %1011 = vmatprep.subr.bf16.mxu0 %v5115_v60  ;;  %1052 = vmatprep.subr.bf16.mxu1 %v6833_v7 }
 0x3dd   :  { %1012 = vmatpush1.bf16.msra.mxu0 %v6834_v8  ;;  %1053 = vmatpush1.bf16.msra.mxu1 %v6835_v9 }
 0x3de   :  { %1013 = vmatprep.subr.bf16.mxu0 %v6836_v10  ;;  %1054 = vmatprep.subr.bf16.mxu1 %v6837_v11 }
 0x3e1   :  { %1014 = vmatpush1.bf16.msra.mxu0 %v6838_v12  ;;  %1055 = vmatpush1.bf16.msra.mxu1 %v6839_v13 }
 0x3e2   :  { %1015 = vmatprep.subr.bf16.mxu0 %v6840_v14  ;;  %1056 = vmatprep.subr.bf16.mxu1 %v6841_v15 }
 0x3e5   :  { %1016 = vmatpush1.bf16.msra.mxu0 %v6842_v16  ;;  %1057 = vmatpush1.bf16.msra.mxu1 %v6843_v17 }
 0x3e6   :  { %1017 = vmatprep.subr.bf16.mxu0 %v6844_v18  ;;  %1058 = vmatprep.subr.bf16.mxu1 %v6845_v19 }
 0x3e9   :  { %1018 = vmatpush1.bf16.msra.mxu0 %v6846_v20  ;;  %1059 = vmatpush1.bf16.msra.mxu1 %v6847_v21 }
 0x3ea   :  { %1099 = vmatprep.subr.bf16.mxu0 %v4965_v22  ;;  %1140 = vmatprep.subr.bf16.mxu1 %v4968_v23 }
 0x47f   :  { %v909_v48 = vpop.f32.mrb[12].mxu0  ;;  %v950_v2 = vpop.f32.mrb[12].mxu1 }
 0x480   :  { %v910_v4 = vadd.f32 %v909_v48, %v6850_v26  ;;  %v911_v7 = vpop.f32.mrb[13].mxu0  ;;  %v952_v8 = vpop.f32.mrb[13].mxu1  ;;  %v951_v18 = vadd.f32 %v950_v2, %v4817_v40 }
 0x481   :  { %v912_v9 = vadd.f32 %v911_v7, %v6825_v56  ;;  %v913_v10 = vpop.f32.mrb[14].mxu0  ;;  %v954_v11 = vpop.f32.mrb[14].mxu1  ;;  %v953_v16 = vadd.f32 %v952_v8, %v6826_v54 }
 0x482   :  { %v3227_v12 = vmul.f32 -1.442695, %v910_v4  ;;  %v914_v13 = vpop.f32.mrb[15].mxu0  ;;  %v955_v14 = vpop.f32.mrb[15].mxu1 }
 0x483   :  { %v3228_v15 = vmul.f32 -1.442695, %v912_v9  ;;  %v3229_v17 = vmul.f32 -1.442695, %v953_v16  ;;  %v984_v14 = vld [vmem:[#allocation3 + $0x20] sm:$0xff] }
 0x484   :  { %3835 = vpow2.f32 %v3227_v12 }
 0x485   :  { %3837 = vpow2.f32 %v3228_v15 }
 0x486   :  { %3839 = vpow2.f32 %v3229_v17  ;;  %v985_v17 = vpack.c.bf16 %v984_v14, %v984_v14  ;;  %v5215_v14 = vld [vmem:[#allocation6 + $0x1a0] ss:$16 sps:$4 sm:$0xff]  }
 0x487   :  { %3841 = vtanh.f32 %v951_v18  ;;  %6873 = vst [vmem:[#allocation36_spill] sm:$0xff] %v5215_v14 }
 0x48e   :  { %v3836_v19 = vpop.eup %3835 }
 0x48f   :  { %v3838_v20 = vpop.eup %3837  ;;  %v960_v21 = vadd.f32 1.0, %v3836_v19  ;;  %v6862_v19 = vld [vmem:[#allocation26_spill] sm:$0xff] }
 0x490   :  { %v966_v48 = vadd.f32 1.0, %v3838_v20  ;;  %v3840_v7 = vpop.eup %3839  ;;  %v6863_v20 = vld [vmem:[#allocation24_spill] sm:$0xff] }
 0x491   :  { %3843 = vrcp.f32 %v960_v21  ;;  %v3842_v4 = vpop.eup %3841  ;;  %v973_v11 = vadd.f32 1.0, %v3840_v7  ;;  %v6864_v21 = vld [vmem:[#allocation29_spill] sm:$0xff]  ;;  %v5188_v7 = vld [vmem:[#allocation6 + $0x148] ss:$16 sps:$4 sm:$0xff]  }
 0x492   :  { %3845 = vrcp.f32 %v966_v48  ;;  %v6865_v48 = vld [vmem:[#allocation25_spill] sm:$0xff] }
 0x493   :  { %3847 = vrcp.f32 %v973_v11  ;;  %v5200_v11 = vld [vmem:[#allocation6 + $0x18c] ss:$16 sps:$4 sm:$0xff]  }
 0x494   :  { %6868 = vst [vmem:[#allocation37_spill] sm:$0xff] %v5200_v11 }
 0x49b   :  { %v3844_v10 = vpop.eup %3843 }
 0x49c   :  { %v3846_v9 = vpop.eup %3845  ;;  %v977_v12 = vmul.f32 %v3844_v10, %v3842_v4  ;;  %v5192_v4 = vld [vmem:[#allocation6 + $0x16c] ss:$16 sps:$4 sm:$0xff]   ;;  %v5196_v10 = vld [vmem:[#allocation6 + $0x168] ss:$16 sps:$4 sm:$0xff]  }
 0x49d   :  { %v976_v13 = vmul.f32 %v3846_v9, %v4976_v52  ;;  %v3848_v2 = vpop.eup %3847  ;;  %v6861_v52 = vld [vmem:[#allocation23_spill] sm:$0xff]  ;;  %6866 = vst [vmem:[#allocation34_spill] sm:$0xff] %v5192_v4  ;;  %6867 = vst [vmem:[#allocation31_spill] sm:$0xff] %v5196_v10 }
 0x49e   :  { %v5203_v9 = vld [vmem:[#allocation6 + $0x180] ss:$16 sps:$4 sm:$0xff]  }
 0x49f   :  { %v5140_v8 = vadd.f32 %v977_v12, %v976_v13  ;;  %6869 = vst [vmem:[#allocation32_spill] sm:$0xff] %v5203_v9  ;;  %v5206_v12 = vld [vmem:[#allocation6 + $0x188] ss:$16 sps:$4 sm:$0xff]   ;;  %v5209_v13 = vld [vmem:[#allocation6 + $0x1a4] ss:$16 sps:$4 sm:$0xff]  }
 0x4a0   :  { %6870 = vst [vmem:[#allocation38_spill] sm:$0xff] %v5206_v12  ;;  %6871 = vst [vmem:[#allocation35_spill] sm:$0xff] %v5209_v13 }
 0x4a1   :  { %3849 = vtanh.f32 %v5140_v8 }
 0x4ab   :  { %v3850_v15 = vpop.eup %3849 }
 0x4ac   :  { %v980_v16 = vmul.f32 %v3850_v15, %v3848_v2  ;;  %v5212_v2 = vld [vmem:[#allocation6 + $0x1ac] ss:$16 sps:$4 sm:$0xff]   ;;  %v5218_v15 = vld [vmem:[#allocation6 + $0x1a8] ss:$16 sps:$4 sm:$0xff]  }
 0x4ad   :  { %6872 = vst [vmem:[#allocation40_spill] sm:$0xff] %v5212_v2  ;;  %6874 = vst [vmem:[#allocation41_spill] sm:$0xff] %v5218_v15 }
 0x4ae   :  { %v5143_v18 = vpack.c.bf16 %v980_v16, %v980_v16  ;;  %v5221_v16 = vld [vmem:[#allocation6 + $0x1c4] ss:$16 sps:$4 sm:$0xff]  }
 0x4af   :  { %6875 = vst [vmem:[#allocation39_spill] sm:$0xff] %v5221_v16 }
 0x4b0   :  { %6860 = vst [vmem:[#allocation28_spill] sm:$0xff] %v5143_v18  ;;  %1019 = vmatprep.mubr.bf16.mxu0 %v5143_v18  ;;  %1060 = vmatprep.mubr.bf16.mxu1 %v5143_v18  ;;  %v5227_v18 = vld [vmem:[#allocation6 + $0x1c0] ss:$16 sps:$4 sm:$0xff]  }
 0x4b1   :  { %1020 = vmatmul.mubr.bf16.vlgmr.msra.gmra.mrb[16].mxu0 %v985_v17  ;;  %1061 = vmatmul.mubr.bf16.vlgmr.msra.gmra.mrb[16].mxu1 %v985_v17  ;;  %v5224_v17 = vld [vmem:[#allocation6 + $0x1cc] ss:$16 sps:$4 sm:$0xff]   ;;  %6877 = vst [vmem:[#allocation23_spill] sm:$0xff] %v5227_v18 }
 0x4b2   :  { %1100 = vmatpush1.bf16.msra.mxu0 %v4983_v51  ;;  %1141 = vmatpush1.bf16.msra.mxu1 %v4986_v47  ;;  %6876 = vst [vmem:[#allocation42_spill] sm:$0xff] %v5224_v17 }
 0x4b3   :  { %1101 = vmatprep.subr.bf16.mxu0 %v4989_v55  ;;  %1142 = vmatprep.subr.bf16.mxu1 %v4992_v1 }
 0x4b6   :  { %1102 = vmatpush1.bf16.msra.mxu0 %v4995_v3  ;;  %1143 = vmatpush1.bf16.msra.mxu1 %v4998_v6 }
 0x4b7   :  { %1103 = vmatprep.subr.bf16.mxu0 %v5001_v24  ;;  %1144 = vmatprep.subr.bf16.mxu1 %v5004_v25 }
 0x4ba   :  { %1104 = vmatpush1.bf16.msra.mxu0 %v5007_v27  ;;  %1145 = vmatpush1.bf16.msra.mxu1 %v5010_v28 }
 0x4bb   :  { %1105 = vmatprep.subr.bf16.mxu0 %v5013_v29  ;;  %1146 = vmatprep.subr.bf16.mxu1 %v5016_v30 }
 0x4be   :  { %1106 = vmatpush1.bf16.msra.mxu0 %v5019_v31  ;;  %1147 = vmatpush1.bf16.msra.mxu1 %v5022_v32 }
 0x4bf   :  { %1107 = vmatprep.subr.bf16.mxu0 %v5025_v33  ;;  %1148 = vmatprep.subr.bf16.mxu1 %v5028_v34 }
 0x4c2   :  { %1108 = vmatpush1.bf16.msra.mxu0 %v5031_v35  ;;  %1149 = vmatpush1.bf16.msra.mxu1 %v5034_v36 }
 0x4c3   :  { %1109 = vmatprep.subr.bf16.mxu0 %v5037_v37  ;;  %1150 = vmatprep.subr.bf16.mxu1 %v5040_v38 }
 0x4c6   :  { %1110 = vmatpush1.bf16.msra.mxu0 %v5043_v39  ;;  %1151 = vmatpush1.bf16.msra.mxu1 %v5046_v41 }
 0x4c7   :  { %1111 = vmatprep.subr.bf16.mxu0 %v5049_v43  ;;  %1152 = vmatprep.subr.bf16.mxu1 %v5052_v44 }
 0x4ca   :  { %1112 = vmatpush1.bf16.msra.mxu0 %v5055_v46  ;;  %1153 = vmatpush1.bf16.msra.mxu1 %v5058_v42 }
 0x4cb   :  { %1113 = vmatprep.subr.bf16.mxu0 %v5061_v57  ;;  %1154 = vmatprep.subr.bf16.mxu1 %v5064_v59 }
 0x4ce   :  { %1114 = vmatpush1.bf16.msra.mxu0 %v5067_v53  ;;  %1155 = vmatpush1.bf16.msra.mxu1 %v5070_v50 }
 0x4cf   :  { %1115 = vmatprep.subr.bf16.mxu0 %v5073_v58  ;;  %1156 = vmatprep.subr.bf16.mxu1 %v5076_v61 }
 0x4d2   :  { %1116 = vmatpush1.bf16.msra.mxu0 %v5079_v62  ;;  %1157 = vmatpush1.bf16.msra.mxu1 %v6861_v52 }
 0x4d3   :  { %1117 = vmatprep.subr.bf16.mxu0 %v6862_v19  ;;  %1158 = vmatprep.subr.bf16.mxu1 %v6863_v20 }
 0x4d6   :  { %1118 = vmatpush1.bf16.msra.mxu0 %v5091_v63  ;;  %1159 = vmatpush1.bf16.msra.mxu1 %v6864_v21 }
 0x4d7   :  { %1119 = vmatprep.subr.bf16.mxu0 %v6865_v48  ;;  %1160 = vmatprep.subr.bf16.mxu1 %v5100_v0 }
 0x4da   :  { %1120 = vmatpush1.bf16.msra.mxu0 %v5103_v5  ;;  %1161 = vmatpush1.bf16.msra.mxu1 %v5188_v7 }
 0x4db   :  { %1121 = vmatprep.subr.bf16.mxu0 %v5107_v45  ;;  %1162 = vmatprep.subr.bf16.mxu1 %v5192_v4 }
 0x4de   :  { %1122 = vmatpush1.bf16.msra.mxu0 %v5111_v49  ;;  %1163 = vmatpush1.bf16.msra.mxu1 %v5196_v10 }
 0x4df   :  { %1123 = vmatprep.subr.bf16.mxu0 %v5115_v60  ;;  %1164 = vmatprep.subr.bf16.mxu1 %v5200_v11 }
 0x4e2   :  { %1124 = vmatpush1.bf16.msra.mxu0 %v5203_v9  ;;  %1165 = vmatpush1.bf16.msra.mxu1 %v5206_v12 }
 0x4e3   :  { %1125 = vmatprep.subr.bf16.mxu0 %v5209_v13  ;;  %1166 = vmatprep.subr.bf16.mxu1 %v5212_v2  ;;  %v5230_v2 = vld [vmem:[#allocation6 + $0x1c8] ss:$16 sps:$4 sm:$0xff]  }
 0x4e4   :  { %6878 = vst [vmem:[#allocation26_spill] sm:$0xff] %v5230_v2 }
 0x4e6   :  { %1126 = vmatpush1.bf16.msra.mxu0 %v5215_v14  ;;  %1167 = vmatpush1.bf16.msra.mxu1 %v5218_v15  ;;  %v5233_v14 = vld [vmem:[#allocation6 + $0x1e4] ss:$16 sps:$4 sm:$0xff]   ;;  %v5236_v15 = vld [vmem:[#allocation6 + $0x1ec] ss:$16 sps:$4 sm:$0xff]  }
 0x4e7   :  { %1127 = vmatprep.subr.bf16.mxu0 %v5221_v16  ;;  %1168 = vmatprep.subr.bf16.mxu1 %v5224_v17  ;;  %6879 = vst [vmem:[#allocation24_spill] sm:$0xff] %v5233_v14  ;;  %6880 = vst [vmem:[#allocation29_spill] sm:$0xff] %v5236_v15  ;;  %v5239_v16 = vld [vmem:[#allocation6 + $0x1e0] ss:$16 sps:$4 sm:$0xff]   ;;  %v5242_v17 = vld [vmem:[#allocation6 + $0x1e8] ss:$16 sps:$4 sm:$0xff]  }
 0x4e8   :  { %6881 = vst [vmem:[#allocation25_spill] sm:$0xff] %v5239_v16  ;;  %6882 = vst [vmem:[#allocation48_spill] sm:$0xff] %v5242_v17 }
 0x4ea   :  { %1128 = vmatpush1.bf16.msra.mxu0 %v5227_v18  ;;  %1169 = vmatpush1.bf16.msra.mxu1 %v5230_v2 }
 0x4eb   :  { %1129 = vmatprep.subr.bf16.mxu0 %v5233_v14  ;;  %1170 = vmatprep.subr.bf16.mxu1 %v5236_v15 }
 0x4ee   :  { %1130 = vmatpush1.bf16.msra.mxu0 %v5239_v16  ;;  %1171 = vmatpush1.bf16.msra.mxu1 %v5242_v17 }
 0x4ef   :  { %1211 = vmatprep.subr.bf16.mxu0 %v4965_v22  ;;  %1252 = vmatprep.subr.bf16.mxu1 %v4968_v23 }
 0x584   :  { %v1021_v2 = vpop.f32.mrb[16].mxu0  ;;  %v1062_v18 = vpop.f32.mrb[16].mxu1 }
 0x585   :  { %v1022_v14 = vadd.f32 %v1021_v2, %v6850_v26  ;;  %v1023_v13 = vpop.f32.mrb[17].mxu0  ;;  %v1064_v12 = vpop.f32.mrb[17].mxu1  ;;  %v1063_v23 = vadd.f32 %v1062_v18, %v4817_v40  ;;  %v1096_v18 = vld [vmem:[#allocation3 + $0x28] sm:$0xff] }
 0x586   :  { %v1024_v15 = vadd.f32 %v1023_v13, %v6825_v56  ;;  %v1025_v9 = vpop.f32.mrb[18].mxu0  ;;  %v1066_v11 = vpop.f32.mrb[18].mxu1  ;;  %v1065_v22 = vadd.f32 %v1064_v12, %v6826_v54 }
 0x587   :  { %v3230_v60 = vmul.f32 -1.442695, %v1022_v14  ;;  %v1026_v16 = vpop.f32.mrb[19].mxu0  ;;  %v1067_v10 = vpop.f32.mrb[19].mxu1 }
 0x588   :  { %v3231_v49 = vmul.f32 -1.442695, %v1024_v15  ;;  %v3232_v17 = vmul.f32 -1.442695, %v1065_v22  ;;  %v1097_v15 = vpack.c.bf16 %v1096_v18, %v1096_v18  ;;  %v6886_v16 = vld [vmem:[#allocation27_spill] sm:$0xff]  ;;  %v6897_v18 = vld [vmem:[#allocation42_spill] sm:$0xff] }
 0x589   :  { %3851 = vpow2.f32 %v3230_v60 }
 0x58a   :  { %3853 = vpow2.f32 %v3231_v49 }
 0x58b   :  { %3855 = vpow2.f32 %v3232_v17  ;;  %v6887_v17 = vld [vmem:[#allocation31_spill] sm:$0xff] }
 0x58c   :  { %3857 = vtanh.f32 %v1063_v23 }
 0x593   :  { %v3852_v4 = vpop.eup %3851 }
 0x594   :  { %v3854_v2 = vpop.eup %3853  ;;  %v1072_v26 = vadd.f32 1.0, %v3852_v4 }
 0x595   :  { %v1078_v45 = vadd.f32 1.0, %v3854_v2  ;;  %v3856_v11 = vpop.eup %3855  ;;  %v6888_v2 = vld [vmem:[#allocation33_spill] sm:$0xff] }
 0x596   :  { %3859 = vrcp.f32 %v1072_v26  ;;  %v3858_v9 = vpop.eup %3857  ;;  %v1085_v10 = vadd.f32 1.0, %v3856_v11  ;;  %v6889_v11 = vld [vmem:[#allocation37_spill] sm:$0xff] }
 0x597   :  { %3861 = vrcp.f32 %v1078_v45  ;;  %v6884_v45 = vld [vmem:[#allocation30_spill] sm:$0xff] }
 0x598   :  { %3863 = vrcp.f32 %v1085_v10  ;;  %v6892_v10 = vld [vmem:[#allocation35_spill] sm:$0xff] }
 0x5a0   :  { %v3860_v13 = vpop.eup %3859 }
 0x5a1   :  { %v3862_v14 = vpop.eup %3861  ;;  %v1089_v60 = vmul.f32 %v3860_v13, %v3858_v9  ;;  %v6890_v9 = vld [vmem:[#allocation32_spill] sm:$0xff]  ;;  %v6891_v13 = vld [vmem:[#allocation38_spill] sm:$0xff] }
 0x5a2   :  { %v1088_v49 = vmul.f32 %v3862_v14, %v5140_v8  ;;  %v3864_v22 = vpop.eup %3863  ;;  %v6885_v8 = vld [vmem:[#allocation34_spill] sm:$0xff]  ;;  %v6893_v14 = vld [vmem:[#allocation40_spill] sm:$0xff] }
 0x5a4   :  { %v5252_v12 = vadd.f32 %v1089_v60, %v1088_v49  ;;  %v6894_v60 = vld [vmem:[#allocation36_spill] sm:$0xff]  ;;  %v6895_v49 = vld [vmem:[#allocation41_spill] sm:$0xff] }
 0x5a6   :  { %3865 = vtanh.f32 %v5252_v12 }
 0x5b0   :  { %v3866_v4 = vpop.eup %3865 }
 0x5b1   :  { %v1092_v23 = vmul.f32 %v3866_v4, %v3864_v22  ;;  %v6896_v22 = vld [vmem:[#allocation39_spill] sm:$0xff] }
 0x5b2   :  { %v6898_v4 = vld [vmem:[#allocation23_spill] sm:$0xff] }
 0x5b3   :  { %v5255_v26 = vpack.c.bf16 %v1092_v23, %v1092_v23  ;;  %v6899_v23 = vld [vmem:[#allocation26_spill] sm:$0xff] }
 0x5b5   :  { %6883 = vst [vmem:[#allocation49_spill] sm:$0xff] %v5255_v26  ;;  %1131 = vmatprep.mubr.bf16.mxu0 %v5255_v26  ;;  %1172 = vmatprep.mubr.bf16.mxu1 %v5255_v26  ;;  %v6901_v26 = vld [vmem:[#allocation29_spill] sm:$0xff] }
 0x5b6   :  { %1132 = vmatmul.mubr.bf16.vlgmr.msra.gmra.mrb[20].mxu0 %v1097_v15  ;;  %1173 = vmatmul.mubr.bf16.vlgmr.msra.gmra.mrb[20].mxu1 %v1097_v15  ;;  %v6900_v15 = vld [vmem:[#allocation24_spill] sm:$0xff] }
 0x5b7   :  { %1212 = vmatpush1.bf16.msra.mxu0 %v4983_v51  ;;  %1253 = vmatpush1.bf16.msra.mxu1 %v4986_v47 }
 0x5b8   :  { %1213 = vmatprep.subr.bf16.mxu0 %v4989_v55  ;;  %1254 = vmatprep.subr.bf16.mxu1 %v4992_v1 }
 0x5bb   :  { %1214 = vmatpush1.bf16.msra.mxu0 %v4995_v3  ;;  %1255 = vmatpush1.bf16.msra.mxu1 %v4998_v6 }
 0x5bc   :  { %1215 = vmatprep.subr.bf16.mxu0 %v5001_v24  ;;  %1256 = vmatprep.subr.bf16.mxu1 %v5004_v25 }
 0x5bf   :  { %1216 = vmatpush1.bf16.msra.mxu0 %v5007_v27  ;;  %1257 = vmatpush1.bf16.msra.mxu1 %v5010_v28 }
 0x5c0   :  { %1217 = vmatprep.subr.bf16.mxu0 %v5013_v29  ;;  %1258 = vmatprep.subr.bf16.mxu1 %v5016_v30 }
 0x5c3   :  { %1218 = vmatpush1.bf16.msra.mxu0 %v5019_v31  ;;  %1259 = vmatpush1.bf16.msra.mxu1 %v5022_v32 }
 0x5c4   :  { %1219 = vmatprep.subr.bf16.mxu0 %v5025_v33  ;;  %1260 = vmatprep.subr.bf16.mxu1 %v5028_v34 }
 0x5c7   :  { %1220 = vmatpush1.bf16.msra.mxu0 %v5031_v35  ;;  %1261 = vmatpush1.bf16.msra.mxu1 %v5034_v36 }
 0x5c8   :  { %1221 = vmatprep.subr.bf16.mxu0 %v5037_v37  ;;  %1262 = vmatprep.subr.bf16.mxu1 %v5040_v38 }
 0x5cb   :  { %1222 = vmatpush1.bf16.msra.mxu0 %v5043_v39  ;;  %1263 = vmatpush1.bf16.msra.mxu1 %v5046_v41 }
 0x5cc   :  { %1223 = vmatprep.subr.bf16.mxu0 %v5049_v43  ;;  %1264 = vmatprep.subr.bf16.mxu1 %v5052_v44 }
 0x5cf   :  { %1224 = vmatpush1.bf16.msra.mxu0 %v5055_v46  ;;  %1265 = vmatpush1.bf16.msra.mxu1 %v5058_v42 }
 0x5d0   :  { %1225 = vmatprep.subr.bf16.mxu0 %v5061_v57  ;;  %1266 = vmatprep.subr.bf16.mxu1 %v5064_v59 }
 0x5d3   :  { %1226 = vmatpush1.bf16.msra.mxu0 %v5067_v53  ;;  %1267 = vmatpush1.bf16.msra.mxu1 %v5070_v50 }
 0x5d4   :  { %1227 = vmatprep.subr.bf16.mxu0 %v5073_v58  ;;  %1268 = vmatprep.subr.bf16.mxu1 %v5076_v61 }
 0x5d7   :  { %1228 = vmatpush1.bf16.msra.mxu0 %v5079_v62  ;;  %1269 = vmatpush1.bf16.msra.mxu1 %v6861_v52 }
 0x5d8   :  { %1229 = vmatprep.subr.bf16.mxu0 %v6862_v19  ;;  %1270 = vmatprep.subr.bf16.mxu1 %v6863_v20 }
 0x5db   :  { %1230 = vmatpush1.bf16.msra.mxu0 %v5091_v63  ;;  %1271 = vmatpush1.bf16.msra.mxu1 %v6864_v21 }
 0x5dc   :  { %1231 = vmatprep.subr.bf16.mxu0 %v6865_v48  ;;  %1272 = vmatprep.subr.bf16.mxu1 %v5100_v0 }
 0x5df   :  { %1232 = vmatpush1.bf16.msra.mxu0 %v5103_v5  ;;  %1273 = vmatpush1.bf16.msra.mxu1 %v5188_v7 }
 0x5e0   :  { %1233 = vmatprep.subr.bf16.mxu0 %v6884_v45  ;;  %1274 = vmatprep.subr.bf16.mxu1 %v6885_v8 }
 0x5e3   :  { %1234 = vmatpush1.bf16.msra.mxu0 %v6886_v16  ;;  %1275 = vmatpush1.bf16.msra.mxu1 %v6887_v17 }
 0x5e4   :  { %1235 = vmatprep.subr.bf16.mxu0 %v6888_v2  ;;  %1276 = vmatprep.subr.bf16.mxu1 %v6889_v11 }
 0x5e7   :  { %1236 = vmatpush1.bf16.msra.mxu0 %v6890_v9  ;;  %1277 = vmatpush1.bf16.msra.mxu1 %v6891_v13  ;;  %v6902_v13 = vld [vmem:[#allocation25_spill] sm:$0xff]  ;;  %v6906_v9 = vld [vmem:[#allocation44_spill] sm:$0xff] }
 0x5e8   :  { %1237 = vmatprep.subr.bf16.mxu0 %v6892_v10  ;;  %1278 = vmatprep.subr.bf16.mxu1 %v6893_v14  ;;  %v6903_v10 = vld [vmem:[#allocation48_spill] sm:$0xff]  ;;  %v6904_v14 = vld [vmem:[#allocation22_spill] sm:$0xff] }
 0x5eb   :  { %1238 = vmatpush1.bf16.msra.mxu0 %v6894_v60  ;;  %1279 = vmatpush1.bf16.msra.mxu1 %v6895_v49  ;;  %v6905_v60 = vld [vmem:[#allocation45_spill] sm:$0xff] }
 0x5ec   :  { %1239 = vmatprep.subr.bf16.mxu0 %v6896_v22  ;;  %1280 = vmatprep.subr.bf16.mxu1 %v6897_v18 }
 0x5ef   :  { %1240 = vmatpush1.bf16.msra.mxu0 %v6898_v4  ;;  %1281 = vmatpush1.bf16.msra.mxu1 %v6899_v23 }
 0x5f0   :  { %1241 = vmatprep.subr.bf16.mxu0 %v6900_v15  ;;  %1282 = vmatprep.subr.bf16.mxu1 %v6901_v26 }
 0x5f3   :  { %1242 = vmatpush1.bf16.msra.mxu0 %v6902_v13  ;;  %1283 = vmatpush1.bf16.msra.mxu1 %v6903_v10 }
 0x5f4   :  { %1323 = vmatprep.subr.bf16.mxu0 %v6904_v14  ;;  %1364 = vmatprep.subr.bf16.mxu1 %v6905_v60 }
 0x689   :  { %v1133_v49 = vpop.f32.mrb[20].mxu0  ;;  %v1174_v22 = vpop.f32.mrb[20].mxu1 }
 0x68a   :  { %v1134_v18 = vadd.f32 %v1133_v49, %v6906_v9  ;;  %v1135_v11 = vpop.f32.mrb[21].mxu0  ;;  %v1176_v4 = vpop.f32.mrb[21].mxu1  ;;  %v1175_v60 = vadd.f32 %v1174_v22, %v4817_v40  ;;  %v1208_v22 = vld [vmem:[#allocation3 + $0x30] sm:$0xff] }
 0x68b   :  { %v1136_v23 = vadd.f32 %v1135_v11, %v6825_v56  ;;  %v1137_v2 = vpop.f32.mrb[22].mxu0  ;;  %v1178_v15 = vpop.f32.mrb[22].mxu1  ;;  %v1177_v14 = vadd.f32 %v1176_v4, %v6826_v54 }
 0x68c   :  { %v3233_v17 = vmul.f32 -1.442695, %v1134_v18  ;;  %v1138_v26 = vpop.f32.mrb[23].mxu0  ;;  %v1179_v16 = vpop.f32.mrb[23].mxu1  ;;  %v1209_v15 = vpack.c.bf16 %v1208_v22, %v1208_v22  ;;  %v3242_v22 = vld [vmem:[%s6513_s7 + $0x8] sm:$0xff] }
 0x68d   :  { %v3234_v13 = vmul.f32 -1.442695, %v1136_v23  ;;  %v3235_v10 = vmul.f32 -1.442695, %v1177_v14 }
 0x68e   :  { %3867 = vpow2.f32 %v3233_v17 }
 0x68f   :  { %3869 = vpow2.f32 %v3234_v13 }
 0x690   :  { %3871 = vpow2.f32 %v3235_v10 }
 0x691   :  { %3873 = vtanh.f32 %v1175_v60 }
 0x698   :  { %v3868_v8 = vpop.eup %3867 }
 0x699   :  { %v3870_v49 = vpop.eup %3869  ;;  %v1184_v9 = vadd.f32 1.0, %v3868_v8 }
 0x69a   :  { %v1190_v45 = vadd.f32 1.0, %v3870_v49  ;;  %v3872_v2 = vpop.eup %3871 }
 0x69b   :  { %3875 = vrcp.f32 %v1184_v9  ;;  %v3874_v11 = vpop.eup %3873  ;;  %v1197_v16 = vadd.f32 1.0, %v3872_v2 }
 0x69c   :  { %3877 = vrcp.f32 %v1190_v45 }
 0x69d   :  { %3879 = vrcp.f32 %v1197_v16 }
 0x6a5   :  { %v3876_v26 = vpop.eup %3875 }
 0x6a6   :  { %v3878_v18 = vpop.eup %3877  ;;  %v1201_v17 = vmul.f32 %v3876_v26, %v3874_v11 }
 0x6a7   :  { %v1200_v13 = vmul.f32 %v3878_v18, %v5252_v12  ;;  %v3880_v10 = vpop.eup %3879  ;;  %v1320_v18 = vld [vmem:[#allocation3 + $0x38] sm:$0xff] }
 0x6a9   :  { %v5328_v4 = vadd.f32 %v1201_v17, %v1200_v13 }
 0x6ab   :  { %3881 = vtanh.f32 %v5328_v4 }
 0x6b5   :  { %v3882_v8 = vpop.eup %3881 }
 0x6b6   :  { %v1204_v23 = vmul.f32 %v3882_v8, %v3880_v10  ;;  %v1321_v10 = vpack.c.bf16 %v1320_v18, %v1320_v18  ;;  %v5562_v18 = vld [vmem:[#allocation8 + $0x188] ss:$16 sps:$4 sm:$0xff]  }
 0x6b7   :  { %6958 = vst [vmem:[#allocation57_spill] sm:$0xff] %v5562_v18 }
 0x6b8   :  { %v5331_v9 = vpack.c.bf16 %v1204_v23, %v1204_v23  ;;  %v5416_v23 = vld [vmem:[#allocation8] ss:$16 sps:$4 sm:$0xff]  }
 0x6ba   :  { %6907 = vst [vmem:[#allocation22_spill] sm:$0xff] %v5331_v9  ;;  %1243 = vmatprep.mubr.bf16.mxu0 %v5331_v9  ;;  %1284 = vmatprep.mubr.bf16.mxu1 %v5331_v9  ;;  %v5584_v9 = vld [vmem:[#allocation8 + $0x1c0] ss:$16 sps:$4 sm:$0xff]  }
 0x6bb   :  { %1244 = vmatmul.mubr.bf16.vlgmr.msra.gmra.mrb[24].mxu0 %v1209_v15  ;;  %1285 = vmatmul.mubr.bf16.vlgmr.msra.gmra.mrb[24].mxu1 %v1209_v15  ;;  %v5418_v15 = vld [vmem:[#allocation8 + $0x8] ss:$16 sps:$4 sm:$0xff]   ;;  %6964 = vst [vmem:[#allocation63_spill] sm:$0xff] %v5584_v9 }
 0x6bc   :  { %1324 = vmatpush1.bf16.msra.mxu0 %v4983_v51  ;;  %1365 = vmatpush1.bf16.msra.mxu1 %v4986_v47  ;;  %v6908_v51 = vld [vmem:[#allocation30_spill] sm:$0xff] }
 0x6bd   :  { %1325 = vmatprep.subr.bf16.mxu0 %v4989_v55  ;;  %1366 = vmatprep.subr.bf16.mxu1 %v4992_v1  ;;  %v6909_v47 = vld [vmem:[#allocation34_spill] sm:$0xff]  ;;  %v6910_v55 = vld [vmem:[#allocation27_spill] sm:$0xff]  ;;  %6930 = vst [vmem:[#allocation30_spill] sm:$0xff] %v5416_v23 }
 0x6be   :  { %v6911_v1 = vld [vmem:[#allocation31_spill] sm:$0xff] }
 0x6c0   :  { %1326 = vmatpush1.bf16.msra.mxu0 %v4995_v3  ;;  %1367 = vmatpush1.bf16.msra.mxu1 %v4998_v6  ;;  %v6912_v3 = vld [vmem:[#allocation33_spill] sm:$0xff] }
 0x6c1   :  { %1327 = vmatprep.subr.bf16.mxu0 %v5001_v24  ;;  %1368 = vmatprep.subr.bf16.mxu1 %v5004_v25  ;;  %v6913_v6 = vld [vmem:[#allocation37_spill] sm:$0xff]  ;;  %v6914_v24 = vld [vmem:[#allocation32_spill] sm:$0xff]  ;;  %v6915_v25 = vld [vmem:[#allocation38_spill] sm:$0xff] }
 0x6c4   :  { %1328 = vmatpush1.bf16.msra.mxu0 %v5007_v27  ;;  %1369 = vmatpush1.bf16.msra.mxu1 %v5010_v28  ;;  %v6916_v27 = vld [vmem:[#allocation35_spill] sm:$0xff]  ;;  %v6917_v28 = vld [vmem:[#allocation40_spill] sm:$0xff] }
 0x6c5   :  { %1329 = vmatprep.subr.bf16.mxu0 %v5013_v29  ;;  %1370 = vmatprep.subr.bf16.mxu1 %v5016_v30  ;;  %v6918_v29 = vld [vmem:[#allocation36_spill] sm:$0xff]  ;;  %v6919_v30 = vld [vmem:[#allocation41_spill] sm:$0xff] }
 0x6c8   :  { %1330 = vmatpush1.bf16.msra.mxu0 %v5019_v31  ;;  %1371 = vmatpush1.bf16.msra.mxu1 %v5022_v32  ;;  %v6920_v31 = vld [vmem:[#allocation39_spill] sm:$0xff]  ;;  %v6921_v32 = vld [vmem:[#allocation42_spill] sm:$0xff] }
 0x6c9   :  { %1331 = vmatprep.subr.bf16.mxu0 %v5025_v33  ;;  %1372 = vmatprep.subr.bf16.mxu1 %v5028_v34  ;;  %v6922_v33 = vld [vmem:[#allocation23_spill] sm:$0xff]  ;;  %v6923_v34 = vld [vmem:[#allocation26_spill] sm:$0xff] }
 0x6cc   :  { %1332 = vmatpush1.bf16.msra.mxu0 %v5031_v35  ;;  %1373 = vmatpush1.bf16.msra.mxu1 %v5034_v36  ;;  %v6924_v35 = vld [vmem:[#allocation24_spill] sm:$0xff]  ;;  %v6925_v36 = vld [vmem:[#allocation29_spill] sm:$0xff] }
 0x6cd   :  { %1333 = vmatprep.subr.bf16.mxu0 %v5037_v37  ;;  %1374 = vmatprep.subr.bf16.mxu1 %v5040_v38  ;;  %v6926_v37 = vld [vmem:[#allocation25_spill] sm:$0xff]  ;;  %v6927_v38 = vld [vmem:[#allocation48_spill] sm:$0xff] }
 0x6d0   :  { %1334 = vmatpush1.bf16.msra.mxu0 %v5043_v39  ;;  %1375 = vmatpush1.bf16.msra.mxu1 %v5046_v41  ;;  %v5397_v39 = vld [vmem:[#allocation8 + $0x4] ss:$16 sps:$4 sm:$0xff]   ;;  %v5399_v41 = vld [vmem:[#allocation8 + $0xc] ss:$16 sps:$4 sm:$0xff]  }
 0x6d1   :  { %1335 = vmatprep.subr.bf16.mxu0 %v5049_v43  ;;  %1376 = vmatprep.subr.bf16.mxu1 %v5052_v44 }
 0x6d4   :  { %1336 = vmatpush1.bf16.msra.mxu0 %v5055_v46  ;;  %1377 = vmatpush1.bf16.msra.mxu1 %v5058_v42  ;;  %v6928_v46 = vld [vmem:[#allocation44_spill] sm:$0xff] }
 0x6d5   :  { %1337 = vmatprep.subr.bf16.mxu0 %v5061_v57  ;;  %1378 = vmatprep.subr.bf16.mxu1 %v5064_v59 }
 0x6d8   :  { %1338 = vmatpush1.bf16.msra.mxu0 %v5067_v53  ;;  %1379 = vmatpush1.bf16.msra.mxu1 %v5070_v50 }
 0x6d9   :  { %1339 = vmatprep.subr.bf16.mxu0 %v5073_v58  ;;  %1380 = vmatprep.subr.bf16.mxu1 %v5076_v61 }
 0x6dc   :  { %1340 = vmatpush1.bf16.msra.mxu0 %v5079_v62  ;;  %1381 = vmatpush1.bf16.msra.mxu1 %v6861_v52 }
 0x6dd   :  { %1341 = vmatprep.subr.bf16.mxu0 %v6862_v19  ;;  %1382 = vmatprep.subr.bf16.mxu1 %v6863_v20 }
 0x6e0   :  { %1342 = vmatpush1.bf16.msra.mxu0 %v5091_v63  ;;  %1383 = vmatpush1.bf16.msra.mxu1 %v6864_v21 }
 0x6e1   :  { %1343 = vmatprep.subr.bf16.mxu0 %v6865_v48  ;;  %1384 = vmatprep.subr.bf16.mxu1 %v5100_v0 }
 0x6e4   :  { %1344 = vmatpush1.bf16.msra.mxu0 %v5103_v5  ;;  %1385 = vmatpush1.bf16.msra.mxu1 %v5188_v7 }
 0x6e5   :  { %1345 = vmatprep.subr.bf16.mxu0 %v6908_v51  ;;  %1386 = vmatprep.subr.bf16.mxu1 %v6909_v47  ;;  %v5422_v51 = vld [vmem:[#allocation8 + $0x2c] ss:$16 sps:$4 sm:$0xff]   ;;  %v1525_v47 = vpack.c.bf16 %v3242_v22, %v3242_v22  ;;  %v5574_v22 = vld [vmem:[#allocation8 + $0x1a8] ss:$16 sps:$4 sm:$0xff]  }
 0x6e8   :  { %1346 = vmatpush1.bf16.msra.mxu0 %v6910_v55  ;;  %1387 = vmatpush1.bf16.msra.mxu1 %v6911_v1  ;;  %v5428_v55 = vld [vmem:[#allocation8 + $0x20] ss:$16 sps:$4 sm:$0xff]   ;;  %v5430_v1 = vld [vmem:[#allocation8 + $0x28] ss:$16 sps:$4 sm:$0xff]  }
 0x6e9   :  { %1347 = vmatprep.subr.bf16.mxu0 %v6912_v3  ;;  %1388 = vmatprep.subr.bf16.mxu1 %v6913_v6  ;;  %6932 = vst [vmem:[#allocation27_spill] sm:$0xff] %v5428_v55  ;;  %v5434_v3 = vld [vmem:[#allocation8 + $0x44] ss:$16 sps:$4 sm:$0xff]   ;;  %v5436_v6 = vld [vmem:[#allocation8 + $0x4c] ss:$16 sps:$4 sm:$0xff]  }
 0x6ea   :  { %6933 = vst [vmem:[#allocation31_spill] sm:$0xff] %v5434_v3 }
 0x6ec   :  { %1348 = vmatpush1.bf16.msra.mxu0 %v6914_v24  ;;  %1389 = vmatpush1.bf16.msra.mxu1 %v6915_v25  ;;  %v5440_v24 = vld [vmem:[#allocation8 + $0x40] ss:$16 sps:$4 sm:$0xff]   ;;  %v5442_v25 = vld [vmem:[#allocation8 + $0x48] ss:$16 sps:$4 sm:$0xff]  }
 0x6ed   :  { %1349 = vmatprep.subr.bf16.mxu0 %v6916_v27  ;;  %1390 = vmatprep.subr.bf16.mxu1 %v6917_v28  ;;  %6934 = vst [vmem:[#allocation33_spill] sm:$0xff] %v5440_v24  ;;  %v5446_v27 = vld [vmem:[#allocation8 + $0x64] ss:$16 sps:$4 sm:$0xff]   ;;  %v5448_v28 = vld [vmem:[#allocation8 + $0x6c] ss:$16 sps:$4 sm:$0xff]  }
 0x6ee   :  { %6935 = vst [vmem:[#allocation37_spill] sm:$0xff] %v5446_v27 }
 0x6f0   :  { %1350 = vmatpush1.bf16.msra.mxu0 %v6918_v29  ;;  %1391 = vmatpush1.bf16.msra.mxu1 %v6919_v30  ;;  %v5452_v29 = vld [vmem:[#allocation8 + $0x60] ss:$16 sps:$4 sm:$0xff]   ;;  %v5454_v30 = vld [vmem:[#allocation8 + $0x68] ss:$16 sps:$4 sm:$0xff]  }
 0x6f1   :  { %1351 = vmatprep.subr.bf16.mxu0 %v6920_v31  ;;  %1392 = vmatprep.subr.bf16.mxu1 %v6921_v32  ;;  %6936 = vst [vmem:[#allocation32_spill] sm:$0xff] %v5452_v29  ;;  %v5458_v31 = vld [vmem:[#allocation8 + $0x84] ss:$16 sps:$4 sm:$0xff]   ;;  %v5460_v32 = vld [vmem:[#allocation8 + $0x8c] ss:$16 sps:$4 sm:$0xff]  }
 0x6f2   :  { %6937 = vst [vmem:[#allocation38_spill] sm:$0xff] %v5458_v31 }
 0x6f4   :  { %1352 = vmatpush1.bf16.msra.mxu0 %v6922_v33  ;;  %1393 = vmatpush1.bf16.msra.mxu1 %v6923_v34  ;;  %v5464_v33 = vld [vmem:[#allocation8 + $0x80] ss:$16 sps:$4 sm:$0xff]   ;;  %v5466_v34 = vld [vmem:[#allocation8 + $0x88] ss:$16 sps:$4 sm:$0xff]  }
 0x6f5   :  { %1353 = vmatprep.subr.bf16.mxu0 %v6924_v35  ;;  %1394 = vmatprep.subr.bf16.mxu1 %v6925_v36  ;;  %6938 = vst [vmem:[#allocation35_spill] sm:$0xff] %v5464_v33  ;;  %v5470_v35 = vld [vmem:[#allocation8 + $0xa4] ss:$16 sps:$4 sm:$0xff]   ;;  %v5472_v36 = vld [vmem:[#allocation8 + $0xac] ss:$16 sps:$4 sm:$0xff]  }
 0x6f6   :  { %6939 = vst [vmem:[#allocation40_spill] sm:$0xff] %v5470_v35 }
 0x6f8   :  { %1354 = vmatpush1.bf16.msra.mxu0 %v6926_v37  ;;  %1395 = vmatpush1.bf16.msra.mxu1 %v6927_v38  ;;  %v5476_v37 = vld [vmem:[#allocation8 + $0xa0] ss:$16 sps:$4 sm:$0xff]   ;;  %v5478_v38 = vld [vmem:[#allocation8 + $0xa8] ss:$16 sps:$4 sm:$0xff]  }
 0x6f9   :  { %1846 = vmatprep.subr.bf16.mxu0 %v5397_v39  ;;  %1887 = vmatprep.subr.bf16.mxu1 %v5399_v41  ;;  %6940 = vst [vmem:[#allocation36_spill] sm:$0xff] %v5476_v37 }
 0x78e   :  { %v1245_v43 = vpop.f32.mrb[24].mxu0  ;;  %v1286_v44 = vpop.f32.mrb[24].mxu1 }
 0x78f   :  { %v1246_v42 = vadd.f32 %v1245_v43, %v6928_v46  ;;  %v1247_v57 = vpop.f32.mrb[25].mxu0  ;;  %v1288_v59 = vpop.f32.mrb[25].mxu1  ;;  %v1287_v19 = vadd.f32 %v1286_v44, %v4817_v40  ;;  %v5482_v43 = vld [vmem:[#allocation8 + $0xc4] ss:$16 sps:$4 sm:$0xff]   ;;  %v5484_v44 = vld [vmem:[#allocation8 + $0xcc] ss:$16 sps:$4 sm:$0xff]  }
 0x790   :  { %v1248_v53 = vadd.f32 %v1247_v57, %v6825_v56  ;;  %v1249_v50 = vpop.f32.mrb[26].mxu0  ;;  %v1290_v58 = vpop.f32.mrb[26].mxu1  ;;  %v1289_v63 = vadd.f32 %v1288_v59, %v6826_v54  ;;  %6941 = vst [vmem:[#allocation41_spill] sm:$0xff] %v5482_v43  ;;  %v5490_v57 = vld [vmem:[#allocation8 + $0xc8] ss:$16 sps:$4 sm:$0xff]  }
 0x791   :  { %v3236_v61 = vmul.f32 -1.442695, %v1246_v42  ;;  %v1250_v62 = vpop.f32.mrb[27].mxu0  ;;  %v1291_v0 = vpop.f32.mrb[27].mxu1  ;;  %v5488_v42 = vld [vmem:[#allocation8 + $0xc0] ss:$16 sps:$4 sm:$0xff]  }
 0x792   :  { %v3237_v5 = vmul.f32 -1.442695, %v1248_v53  ;;  %v3238_v52 = vmul.f32 -1.442695, %v1289_v63  ;;  %6942 = vst [vmem:[#allocation39_spill] sm:$0xff] %v5488_v42 }
 0x793   :  { %3883 = vpow2.f32 %v3236_v61  ;;  %v5494_v59 = vld [vmem:[#allocation8 + $0xe4] ss:$16 sps:$4 sm:$0xff]   ;;  %v5496_v53 = vld [vmem:[#allocation8 + $0xec] ss:$16 sps:$4 sm:$0xff]   ;;  %v5500_v50 = vld [vmem:[#allocation8 + $0xe0] ss:$16 sps:$4 sm:$0xff]  }
 0x794   :  { %3885 = vpow2.f32 %v3237_v5  ;;  %6943 = vst [vmem:[#allocation42_spill] sm:$0xff] %v5494_v59  ;;  %6944 = vst [vmem:[#allocation23_spill] sm:$0xff] %v5500_v50  ;;  %v5502_v58 = vld [vmem:[#allocation8 + $0xe8] ss:$16 sps:$4 sm:$0xff]   ;;  %v5506_v61 = vld [vmem:[#allocation8 + $0x104] ss:$16 sps:$4 sm:$0xff]  }
 0x795   :  { %3887 = vpow2.f32 %v3238_v52  ;;  %6945 = vst [vmem:[#allocation26_spill] sm:$0xff] %v5506_v61  ;;  %v5508_v62 = vld [vmem:[#allocation8 + $0x10c] ss:$16 sps:$4 sm:$0xff]   ;;  %v5512_v0 = vld [vmem:[#allocation8 + $0x100] ss:$16 sps:$4 sm:$0xff]  }
 0x796   :  { %3889 = vtanh.f32 %v1287_v19  ;;  %6946 = vst [vmem:[#allocation24_spill] sm:$0xff] %v5512_v0  ;;  %v5514_v5 = vld [vmem:[#allocation8 + $0x108] ss:$16 sps:$4 sm:$0xff]   ;;  %v5518_v63 = vld [vmem:[#allocation8 + $0x124] ss:$16 sps:$4 sm:$0xff]  }
 0x797   :  { %6947 = vst [vmem:[#allocation29_spill] sm:$0xff] %v5518_v63  ;;  %v5520_v52 = vld [vmem:[#allocation8 + $0x12c] ss:$16 sps:$4 sm:$0xff]   ;;  %v5524_v19 = vld [vmem:[#allocation8 + $0x120] ss:$16 sps:$4 sm:$0xff]  }
 0x798   :  { %6948 = vst [vmem:[#allocation25_spill] sm:$0xff] %v5524_v19 }
 0x79d   :  { %v3884_v20 = vpop.eup %3883 }
 0x79e   :  { %v3886_v21 = vpop.eup %3885  ;;  %v1296_v48 = vadd.f32 1.0, %v3884_v20  ;;  %v5526_v20 = vld [vmem:[#allocation8 + $0x128] ss:$16 sps:$4 sm:$0xff]  }
 0x79f   :  { %v1302_v7 = vadd.f32 1.0, %v3886_v21  ;;  %v3888_v12 = vpop.eup %3887  ;;  %v5530_v21 = vld [vmem:[#allocation8 + $0x144] ss:$16 sps:$4 sm:$0xff]  }
 0x7a0   :  { %3891 = vrcp.f32 %v1296_v48  ;;  %v3890_v45 = vpop.eup %3889  ;;  %v1309_v60 = vadd.f32 1.0, %v3888_v12  ;;  %6949 = vst [vmem:[#allocation48_spill] sm:$0xff] %v5530_v21  ;;  %v5532_v48 = vld [vmem:[#allocation8 + $0x14c] ss:$16 sps:$4 sm:$0xff]   ;;  %v5538_v12 = vld [vmem:[#allocation8 + $0x148] ss:$16 sps:$4 sm:$0xff]  }
 0x7a1   :  { %3893 = vrcp.f32 %v1302_v7  ;;  %v5536_v7 = vld [vmem:[#allocation8 + $0x140] ss:$16 sps:$4 sm:$0xff]  }
 0x7a2   :  { %3895 = vrcp.f32 %v1309_v60  ;;  %6950 = vst [vmem:[#allocation44_spill] sm:$0xff] %v5536_v7  ;;  %v5548_v60 = vld [vmem:[#allocation8 + $0x160] ss:$16 sps:$4 sm:$0xff]  }
 0x7a3   :  { %6953 = vst [vmem:[#allocation52_spill] sm:$0xff] %v5548_v60 }
 0x7aa   :  { %v3892_v14 = vpop.eup %3891 }
 0x7ab   :  { %v3894_v49 = vpop.eup %3893  ;;  %v1313_v2 = vmul.f32 %v3892_v14, %v3890_v45  ;;  %v5542_v45 = vld [vmem:[#allocation8 + $0x164] ss:$16 sps:$4 sm:$0xff]   ;;  %v5544_v14 = vld [vmem:[#allocation8 + $0x16c] ss:$16 sps:$4 sm:$0xff]  }
 0x7ac   :  { %v1312_v11 = vmul.f32 %v3894_v49, %v5328_v4  ;;  %v3896_v16 = vpop.eup %3895  ;;  %v5420_v4 = vld [vmem:[#allocation8 + $0x24] ss:$16 sps:$4 sm:$0xff]   ;;  %6951 = vst [vmem:[#allocation50_spill] sm:$0xff] %v5542_v45  ;;  %6952 = vst [vmem:[#allocation51_spill] sm:$0xff] %v5544_v14  ;;  %v5550_v49 = vld [vmem:[#allocation8 + $0x168] ss:$16 sps:$4 sm:$0xff]  }
 0x7ad   :  { %6931 = vst [vmem:[#allocation34_spill] sm:$0xff] %v5420_v4  ;;  %6954 = vst [vmem:[#allocation53_spill] sm:$0xff] %v5550_v49 }
 0x7ae   :  { %v5408_v26 = vadd.f32 %v1313_v2, %v1312_v11  ;;  %v5554_v2 = vld [vmem:[#allocation8 + $0x184] ss:$16 sps:$4 sm:$0xff]   ;;  %v5556_v11 = vld [vmem:[#allocation8 + $0x18c] ss:$16 sps:$4 sm:$0xff]  }
 0x7af   :  { %6955 = vst [vmem:[#allocation54_spill] sm:$0xff] %v5554_v2  ;;  %6956 = vst [vmem:[#allocation55_spill] sm:$0xff] %v5556_v11 }
 0x7b0   :  { %3897 = vtanh.f32 %v5408_v26 }
 0x7ba   :  { %v3898_v17 = vpop.eup %3897 }
 0x7bb   :  { %v1316_v13 = vmul.f32 %v3898_v17, %v3896_v16  ;;  %v5560_v16 = vld [vmem:[#allocation8 + $0x180] ss:$16 sps:$4 sm:$0xff]   ;;  %v5566_v17 = vld [vmem:[#allocation8 + $0x1a4] ss:$16 sps:$4 sm:$0xff]  }
 0x7bc   :  { %6957 = vst [vmem:[#allocation56_spill] sm:$0xff] %v5560_v16  ;;  %6959 = vst [vmem:[#allocation58_spill] sm:$0xff] %v5566_v17 }
 0x7bd   :  { %v5414_v8 = vpack.c.bf16 %v1316_v13, %v1316_v13  ;;  %v5568_v13 = vld [vmem:[#allocation8 + $0x1ac] ss:$16 sps:$4 sm:$0xff]  }
 0x7be   :  { %6960 = vst [vmem:[#allocation59_spill] sm:$0xff] %v5568_v13 }
 0x7bf   :  { %6929 = vst [vmem:[#allocation45_spill] sm:$0xff] %v5414_v8  ;;  %1355 = vmatprep.mubr.bf16.mxu0 %v5414_v8  ;;  %1396 = vmatprep.mubr.bf16.mxu1 %v5414_v8  ;;  %v5580_v8 = vld [vmem:[#allocation8 + $0x1cc] ss:$16 sps:$4 sm:$0xff]  }
 0x7c0   :  { %1356 = vmatmul.mubr.bf16.vlgmr.msra.gmra.mrb[28].mxu0 %v1321_v10  ;;  %1397 = vmatmul.mubr.bf16.vlgmr.msra.gmra.mrb[28].mxu1 %v1321_v10  ;;  %v5572_v10 = vld [vmem:[#allocation8 + $0x1a0] ss:$16 sps:$4 sm:$0xff]   ;;  %6963 = vst [vmem:[#allocation62_spill] sm:$0xff] %v5580_v8 }
 0x7c1   :  { %1847 = vmatpush1.bf16.msra.mxu0 %v5416_v23  ;;  %1888 = vmatpush1.bf16.msra.mxu1 %v5418_v15  ;;  %6961 = vst [vmem:[#allocation60_spill] sm:$0xff] %v5572_v10 }
 0x7c2   :  { %1848 = vmatprep.subr.bf16.mxu0 %v5420_v4  ;;  %1889 = vmatprep.subr.bf16.mxu1 %v5422_v51 }
 0x7c3   :  { %1878 = vmatprep.mubr.bf16.mxu0 %v1525_v47  ;;  %1919 = vmatprep.mubr.bf16.mxu1 %v1525_v47  ;;  %v5578_v47 = vld [vmem:[#allocation8 + $0x1c4] ss:$16 sps:$4 sm:$0xff]  }
 0x7c4   :  { %6962 = vst [vmem:[#allocation61_spill] sm:$0xff] %v5578_v47 }
 0x7c5   :  { %1849 = vmatpush1.bf16.msra.mxu0 %v5428_v55  ;;  %1890 = vmatpush1.bf16.msra.mxu1 %v5430_v1 }
 0x7c6   :  { %1850 = vmatprep.subr.bf16.mxu0 %v5434_v3  ;;  %1891 = vmatprep.subr.bf16.mxu1 %v5436_v6 }
 0x7c9   :  { %1851 = vmatpush1.bf16.msra.mxu0 %v5440_v24  ;;  %1892 = vmatpush1.bf16.msra.mxu1 %v5442_v25 }
 0x7ca   :  { %1852 = vmatprep.subr.bf16.mxu0 %v5446_v27  ;;  %1893 = vmatprep.subr.bf16.mxu1 %v5448_v28 }
 0x7cd   :  { %1853 = vmatpush1.bf16.msra.mxu0 %v5452_v29  ;;  %1894 = vmatpush1.bf16.msra.mxu1 %v5454_v30 }
 0x7ce   :  { %1854 = vmatprep.subr.bf16.mxu0 %v5458_v31  ;;  %1895 = vmatprep.subr.bf16.mxu1 %v5460_v32 }
 0x7d1   :  { %1855 = vmatpush1.bf16.msra.mxu0 %v5464_v33  ;;  %1896 = vmatpush1.bf16.msra.mxu1 %v5466_v34 }
 0x7d2   :  { %1856 = vmatprep.subr.bf16.mxu0 %v5470_v35  ;;  %1897 = vmatprep.subr.bf16.mxu1 %v5472_v36 }
 0x7d5   :  { %1857 = vmatpush1.bf16.msra.mxu0 %v5476_v37  ;;  %1898 = vmatpush1.bf16.msra.mxu1 %v5478_v38 }
 0x7d6   :  { %1858 = vmatprep.subr.bf16.mxu0 %v5482_v43  ;;  %1899 = vmatprep.subr.bf16.mxu1 %v5484_v44 }
 0x7d9   :  { %1859 = vmatpush1.bf16.msra.mxu0 %v5488_v42  ;;  %1900 = vmatpush1.bf16.msra.mxu1 %v5490_v57 }
 0x7da   :  { %1860 = vmatprep.subr.bf16.mxu0 %v5494_v59  ;;  %1901 = vmatprep.subr.bf16.mxu1 %v5496_v53 }
 0x7dd   :  { %1861 = vmatpush1.bf16.msra.mxu0 %v5500_v50  ;;  %1902 = vmatpush1.bf16.msra.mxu1 %v5502_v58 }
 0x7de   :  { %1862 = vmatprep.subr.bf16.mxu0 %v5506_v61  ;;  %1903 = vmatprep.subr.bf16.mxu1 %v5508_v62 }
 0x7e1   :  { %1863 = vmatpush1.bf16.msra.mxu0 %v5512_v0  ;;  %1904 = vmatpush1.bf16.msra.mxu1 %v5514_v5 }
 0x7e2   :  { %1864 = vmatprep.subr.bf16.mxu0 %v5518_v63  ;;  %1905 = vmatprep.subr.bf16.mxu1 %v5520_v52 }
 0x7e5   :  { %1865 = vmatpush1.bf16.msra.mxu0 %v5524_v19  ;;  %1906 = vmatpush1.bf16.msra.mxu1 %v5526_v20 }
 0x7e6   :  { %1866 = vmatprep.subr.bf16.mxu0 %v5530_v21  ;;  %1907 = vmatprep.subr.bf16.mxu1 %v5532_v48 }
 0x7e9   :  { %1867 = vmatpush1.bf16.msra.mxu0 %v5536_v7  ;;  %1908 = vmatpush1.bf16.msra.mxu1 %v5538_v12 }
 0x7ea   :  { %1868 = vmatprep.subr.bf16.mxu0 %v5542_v45  ;;  %1909 = vmatprep.subr.bf16.mxu1 %v5544_v14  ;;  %v5598_v14 = vld [vmem:[#allocation8 + $0x1e8] ss:$16 sps:$4 sm:$0xff]  }
 0x7ed   :  { %1869 = vmatpush1.bf16.msra.mxu0 %v5548_v60  ;;  %1910 = vmatpush1.bf16.msra.mxu1 %v5550_v49  ;;  %v5592_v49 = vld [vmem:[#allocation8 + $0x1ec] ss:$16 sps:$4 sm:$0xff]  }
 0x7ee   :  { %1870 = vmatprep.subr.bf16.mxu0 %v5554_v2  ;;  %1911 = vmatprep.subr.bf16.mxu1 %v5556_v11  ;;  %v5586_v11 = vld [vmem:[#allocation8 + $0x1c8] ss:$16 sps:$4 sm:$0xff]  }
 0x7f1   :  { %1871 = vmatpush1.bf16.msra.mxu0 %v5560_v16  ;;  %1912 = vmatpush1.bf16.msra.mxu1 %v5562_v18  ;;  %v5590_v18 = vld [vmem:[#allocation8 + $0x1e4] ss:$16 sps:$4 sm:$0xff]  }
 0x7f2   :  { %1872 = vmatprep.subr.bf16.mxu0 %v5566_v17  ;;  %1913 = vmatprep.subr.bf16.mxu1 %v5568_v13  ;;  %6965 = vst [vmem:[#allocation64_spill] sm:$0xff] %v5590_v18  ;;  %v5596_v13 = vld [vmem:[#allocation8 + $0x1e0] ss:$16 sps:$4 sm:$0xff]  }
 0x7f3   :  { %6966 = vst [vmem:[#allocation65_spill] sm:$0xff] %v5596_v13 }
 0x7f5   :  { %1873 = vmatpush1.bf16.msra.mxu0 %v5572_v10  ;;  %1914 = vmatpush1.bf16.msra.mxu1 %v5574_v22 }
 0x7f6   :  { %1874 = vmatprep.subr.bf16.mxu0 %v5578_v47  ;;  %1915 = vmatprep.subr.bf16.mxu1 %v5580_v8  ;;  %v6967_v8 = vld [vmem:[#allocation47_spill] sm:$0xff] }
 0x7f9   :  { %1875 = vmatpush1.bf16.msra.mxu0 %v5584_v9  ;;  %1916 = vmatpush1.bf16.msra.mxu1 %v5586_v11 }
 0x7fa   :  { %1876 = vmatprep.subr.bf16.mxu0 %v5590_v18  ;;  %1917 = vmatprep.subr.bf16.mxu1 %v5592_v49 }
 0x7fd   :  { %1877 = vmatpush1.bf16.msra.mxu0 %v5596_v13  ;;  %1918 = vmatpush1.bf16.msra.mxu1 %v5598_v14 }
 0x7fe   :  { %2044 = vmatprep.subr.bf16.mxu1 %v5397_v39 }
 0x800   :  { %1879 = vmatmul.mubr.bf16.vlgmr.msra.gmra.mrb[32].mxu0 %v6967_v8  ;;  %1920 = vmatmul.mubr.bf16.vlgmr.msra.gmra.mrb[32].mxu1 %v6967_v8  ;;  %v5638_v8 = vld [vmem:[#allocation9] sm:$0xff]  }
 0x801   :  { %2045 = vmatpush1.bf16.msra.mxu1 %v5416_v23 }
 0x802   :  { %2046 = vmatprep.subr.bf16.mxu1 %v5420_v4 }
 0x805   :  { %2047 = vmatpush1.bf16.msra.mxu1 %v5428_v55 }
 0x806   :  { %2048 = vmatprep.subr.bf16.mxu1 %v5434_v3 }
 0x809   :  { %2049 = vmatpush1.bf16.msra.mxu1 %v5440_v24 }
 0x80a   :  { %2050 = vmatprep.subr.bf16.mxu1 %v5446_v27 }
 0x80d   :  { %2051 = vmatpush1.bf16.msra.mxu1 %v5452_v29 }
 0x80e   :  { %2052 = vmatprep.subr.bf16.mxu1 %v5458_v31 }
 0x811   :  { %2053 = vmatpush1.bf16.msra.mxu1 %v5464_v33 }
 0x812   :  { %2054 = vmatprep.subr.bf16.mxu1 %v5470_v35 }
 0x815   :  { %2055 = vmatpush1.bf16.msra.mxu1 %v5476_v37 }
 0x816   :  { %2056 = vmatprep.subr.bf16.mxu1 %v5482_v43 }
 0x819   :  { %2057 = vmatpush1.bf16.msra.mxu1 %v5488_v42 }
 0x81a   :  { %2058 = vmatprep.subr.bf16.mxu1 %v5494_v59 }
 0x81d   :  { %2059 = vmatpush1.bf16.msra.mxu1 %v5500_v50 }
 0x81e   :  { %2060 = vmatprep.subr.bf16.mxu1 %v5506_v61 }
 0x821   :  { %2061 = vmatpush1.bf16.msra.mxu1 %v5512_v0 }
 0x822   :  { %2062 = vmatprep.subr.bf16.mxu1 %v5518_v63 }
 0x825   :  { %2063 = vmatpush1.bf16.msra.mxu1 %v5524_v19 }
 0x826   :  { %2064 = vmatprep.subr.bf16.mxu1 %v5530_v21 }
 0x829   :  { %2065 = vmatpush1.bf16.msra.mxu1 %v5536_v7 }
 0x82a   :  { %2066 = vmatprep.subr.bf16.mxu1 %v5542_v45  ;;  %v6689_v45 = vmov 0.0  }
 0x82b   :  { %3411 = vmatprep.subr.bf16.mxu0 %v6689_v45  ;;  %3427 = vmatprep.mubr.msk.bf16.mxu0 %vm4394_vm0, %v6689_v45 }
 0x82c   :  { %3412 = vmatpush3.bf16.msra.mxu0 %v5638_v8 }
 0x82d   :  { %2067 = vmatpush1.bf16.msra.mxu1 %v5548_v60  ;;  %3413 = vmatprep.subr.bf16.mxu0 %v6689_v45 }
 0x82e   :  { %2068 = vmatprep.subr.bf16.mxu1 %v5554_v2 }
 0x831   :  { %2069 = vmatpush1.bf16.msra.mxu1 %v5560_v16  ;;  %v5669_v16 = vld [vmem:[#allocation9 + $0x38] sm:$0xff]  }
 0x832   :  { %2070 = vmatprep.subr.bf16.mxu1 %v5566_v17  ;;  %v5665_v17 = vld [vmem:[#allocation9 + $0x30] sm:$0xff]  }
 0x835   :  { %2071 = vmatpush1.bf16.msra.mxu1 %v5572_v10  ;;  %v5644_v10 = vld [vmem:[#allocation9 + $0x8] sm:$0xff]  }
 0x836   :  { %2072 = vmatprep.subr.bf16.mxu1 %v5578_v47  ;;  %3414 = vmatpush3.bf16.msra.mxu0 %v5644_v10  ;;  %v5661_v47 = vld [vmem:[#allocation9 + $0x28] sm:$0xff]  }
 0x837   :  { %3415 = vmatprep.subr.bf16.mxu0 %v6689_v45 }
 0x839   :  { %2073 = vmatpush1.bf16.msra.mxu1 %v5584_v9  ;;  %v5656_v9 = vld [vmem:[#allocation9 + $0x20] sm:$0xff]  }
 0x83a   :  { %2074 = vmatprep.subr.bf16.mxu1 %v5590_v18  ;;  %v5648_v18 = vld [vmem:[#allocation9 + $0x10] sm:$0xff]  }
 0x83b   :  { %3416 = vmatpush3.bf16.msra.mxu0 %v5648_v18 }
 0x83c   :  { %3417 = vmatprep.subr.bf16.mxu0 %v6689_v45 }
 0x83d   :  { %2075 = vmatpush1.bf16.msra.mxu1 %v5596_v13  ;;  %v5652_v13 = vld [vmem:[#allocation9 + $0x18] sm:$0xff]  }
 0x83e   :  { %3431 = vmatprep.subr.bf16.mxu1 %v6689_v45 }
 0x83f   :  { %3418 = vmatpush3.bf16.msra.mxu0 %v5652_v13 }
 0x840   :  { %3419 = vmatprep.subr.bf16.mxu0 %v6689_v45 }
 0x843   :  { %3420 = vmatpush3.bf16.msra.mxu0 %v5656_v9 }
 0x844   :  { %3421 = vmatprep.subr.bf16.mxu0 %v6689_v45 }
 0x847   :  { %3422 = vmatpush3.bf16.msra.mxu0 %v5661_v47 }
 0x848   :  { %3423 = vmatprep.subr.bf16.mxu0 %v6689_v45 }
 0x84b   :  { %3424 = vmatpush3.bf16.msra.mxu0 %v5665_v17 }
 0x84c   :  { %3425 = vmatprep.subr.bf16.mxu0 %v6689_v45 }
 0x84f   :  { %3426 = vmatpush3.bf16.msra.mxu0 %v5669_v16 }
 0x850   :  { %2085 = vmatprep.subr.bf16.mxu0 %v5399_v41 }
 0x893   :  { %v1357_v2 = vpop.f32.mrb[28].mxu0  ;;  %v1398_v60 = vpop.f32.mrb[28].mxu1 }
 0x894   :  { %v1358_v7 = vadd.f32 %v1357_v2, %v6928_v46  ;;  %v1359_v21 = vpop.f32.mrb[29].mxu0  ;;  %v1400_v19 = vpop.f32.mrb[29].mxu1  ;;  %v1399_v35 = vadd.f32 %v1398_v60, %v4817_v40 }
 0x895   :  { %v1360_v63 = vadd.f32 %v1359_v21, %v6825_v56  ;;  %v1361_v0 = vpop.f32.mrb[30].mxu0  ;;  %v1402_v61 = vpop.f32.mrb[30].mxu1  ;;  %v1401_v45 = vadd.f32 %v1400_v19, %v6826_v54 }
 0x896   :  { %v3239_v50 = vmul.f32 -1.442695, %v1358_v7  ;;  %v1362_v59 = vpop.f32.mrb[31].mxu0  ;;  %v1403_v42 = vpop.f32.mrb[31].mxu1 }
 0x897   :  { %v3240_v43 = vmul.f32 -1.442695, %v1360_v63  ;;  %v3241_v37 = vmul.f32 -1.442695, %v1401_v45 }
 0x898   :  { %3899 = vpow2.f32 %v3239_v50 }
 0x899   :  { %3901 = vpow2.f32 %v3240_v43 }
 0x89a   :  { %3903 = vpow2.f32 %v3241_v37 }
 0x89b   :  { %3905 = vtanh.f32 %v1399_v35 }
 0x8a2   :  { %v3900_v33 = vpop.eup %3899 }
 0x8a3   :  { %v3902_v46 = vpop.eup %3901  ;;  %v1408_v2 = vadd.f32 1.0, %v3900_v33  ;;  %v6968_v33 = vld [vmem:[#allocation43_spill] sm:$0xff] }
 0x8a4   :  { %v1414_v31 = vadd.f32 1.0, %v3902_v46  ;;  %v3904_v56 = vpop.eup %3903  ;;  %v6969_v35 = vsub.s32 0, %v6968_v33  ;;  %v6970_v21 = vsub.s32 1, %v6968_v33 }
 0x8a5   :  { %3907 = vrcp.f32 %v1408_v2  ;;  %v3906_v61 = vpop.eup %3905  ;;  %v1421_v42 = vadd.f32 1.0, %v3904_v56 }
 0x8a6   :  { %3909 = vrcp.f32 %v1414_v31  ;;  %v1497_v31 = vld [vmem:[%s6510_s4] sm:$0xf] }
 0x8a7   :  { %3911 = vrcp.f32 %v1421_v42  ;;  %v5684_v19 = vrot.slane %v1497_v31, %v6969_v35  ;;  %v5688_v7 = vrot.slane %v1497_v31, %v6970_v21 }
 0x8af   :  { %v3908_v59 = vpop.eup %3907 }
 0x8b0   :  { %v3910_v0 = vpop.eup %3909  ;;  %v1425_v50 = vmul.f32 %v3908_v59, %v3906_v61 }
 0x8b1   :  { %v1424_v43 = vmul.f32 %v3910_v0, %v5408_v26  ;;  %v3912_v40 = vpop.eup %3911 }
 0x8b3   :  { %v1426_v54 = vadd.f32 %v1425_v50, %v1424_v43 }
 0x8b5   :  { %3913 = vtanh.f32 %v1426_v54  ;;  %1432 = vst [vmem:[#allocation15] sm:$0xff] %v1426_v54  ;;  %v6971_v54 = vsub.s32 3, %v6968_v33 }
 0x8bf   :  { %v3914_v37 = vpop.eup %3913 }
 0x8c0   :  { %v1428_v63 = vmul.f32 %v3914_v37, %v3912_v40  ;;  %v5694_v40 = vrot.slane %v1497_v31, %v6971_v54 }
 0x8c2   :  { %1431 = vst [vmem:[#allocation13] sm:$0xff] %v1428_v63  ;;  %v6972_v63 = vsub.s32 2, %v6968_v33 }
 0x8c4   :  { %v5699_v35 = vrot.slane %v1497_v31, %v6972_v63 }
 0x8d3   :  { %v1880_v26 = vpop.f32.mrb[32].mxu0  ;;  %v1921_v45 = vpop.f32.mrb[32].mxu1 }
 0x8d4   :  { %v1881_v60 = vadd.f32 %v1880_v26, %v5684_v19  ;;  %v1882_v46 = vpop.f32.mrb[33].mxu0  ;;  %v1923_v2 = vpop.f32.mrb[33].mxu1  ;;  %v1922_v26 = vadd.f32 %v1921_v45, %v5699_v35 }
 0x8d5   :  { %v1883_v56 = vadd.f32 %v1882_v46, %v5688_v7  ;;  %v1884_v61 = vpop.f32.mrb[34].mxu0  ;;  %v1925_v59 = vpop.f32.mrb[34].mxu1  ;;  %v1924_v37 = vadd.f32 %v1923_v2, %v5694_v40 }
 0x8d6   :  { %v3307_v42 = vmul.f32 -1.442695, %v1881_v60  ;;  %v1885_v0 = vpop.f32.mrb[35].mxu0  ;;  %v1926_v50 = vpop.f32.mrb[35].mxu1 }
 0x8d7   :  { %v3308_v43 = vmul.f32 -1.442695, %v1883_v56  ;;  %v3309_v21 = vmul.f32 -1.442695, %v1924_v37  ;;  %v1522_v0 = vld [vmem:[#allocation11 + $0x8] sm:$0xff] }
 0x8d8   :  { %3915 = vpow2.f32 %v3307_v42 }
 0x8d9   :  { %3917 = vpow2.f32 %v3308_v43 }
 0x8da   :  { %3919 = vpow2.f32 %v3309_v21 }
 0x8db   :  { %3921 = vtanh.f32 %v1922_v26  ;;  %v6973_v26 = vld [vmem:[#allocation21_spill] sm:$0xff] }
 0x8e2   :  { %v3916_v46 = vpop.eup %3915 }
 0x8e3   :  { %v3918_v60 = vpop.eup %3917  ;;  %v1931_v61 = vadd.f32 1.0, %v3916_v46  ;;  %v6974_v46 = vmov 0.0  }
 0x8e4   :  { %v1937_v56 = vadd.f32 1.0, %v3918_v60  ;;  %v3920_v59 = vpop.eup %3919  ;;  %v6975_v60 = vld [vmem:[#allocation51_spill] sm:$0xff] }
 0x8e5   :  { %3923 = vrcp.f32 %v1931_v61  ;;  %v3922_v42 = vpop.eup %3921  ;;  %v1944_v33 = vadd.f32 1.0, %v3920_v59  ;;  %v6976_v61 = vld [vmem:[#allocation53_spill] sm:$0xff] }
 0x8e6   :  { %3925 = vrcp.f32 %v1937_v56  ;;  %v6977_v56 = vld [vmem:[#allocation55_spill] sm:$0xff]  ;;  %v6978_v59 = vld [vmem:[#allocation57_spill] sm:$0xff] }
 0x8e7   :  { %3927 = vrcp.f32 %v1944_v33  ;;  %v6984_v33 = vld [vmem:[#allocation36_spill] sm:$0xff] }
 0x8ef   :  { %v3924_v50 = vpop.eup %3923 }
 0x8f0   :  { %v3926_v2 = vpop.eup %3925  ;;  %v1948_v43 = vmul.f32 %v3924_v50, %v3922_v42  ;;  %v6979_v42 = vld [vmem:[#allocation59_spill] sm:$0xff]  ;;  %v6981_v50 = vld [vmem:[#allocation38_spill] sm:$0xff] }
 0x8f1   :  { %v1947_v31 = vmul.f32 %v3926_v2, %v1522_v0  ;;  %v3928_v45 = vpop.eup %3927  ;;  %v6980_v0 = vld [vmem:[#allocation62_spill] sm:$0xff]  ;;  %v6982_v2 = vld [vmem:[#allocation35_spill] sm:$0xff] }
 0x8f3   :  { %v5702_v54 = vadd.f32 %v1948_v43, %v1947_v31  ;;  %v6983_v43 = vld [vmem:[#allocation40_spill] sm:$0xff]  ;;  %v6985_v31 = vld [vmem:[#allocation41_spill] sm:$0xff] }
 0x8f5   :  { %3929 = vtanh.f32 %v5702_v54 }
 0x8ff   :  { %v3930_v37 = vpop.eup %3929 }
 0x900   :  { %v1951_v63 = vmul.f32 %v3930_v37, %v3928_v45  ;;  %v6986_v45 = vld [vmem:[#allocation39_spill] sm:$0xff]  ;;  %v6987_v37 = vld [vmem:[#allocation42_spill] sm:$0xff] }
 0x902   :  { %v1952_v21 = vpack.c.bf16 %v1951_v63, %v1951_v63  ;;  %v6988_v63 = vld [vmem:[#allocation23_spill] sm:$0xff] }
 0x904   :  { %3428 = vmatmul.mubr.bf16.vlgmr.msra.gmra.mrb[36].mxu0 %v1952_v21  ;;  %2076 = vmatprep.mubr.bf16.mxu1 %v1952_v21 }
 0x905   :  { %2086 = vmatpush1.bf16.msra.mxu0 %v5418_v15  ;;  %2077 = vmatmul.mubr.bf16.vlgmr.msra.gmra.mrb[36].mxu1 %v6973_v26 }
 0x906   :  { %2117 = vmatprep.mubr.bf16.mxu0 %v1952_v21  ;;  %2087 = vmatprep.subr.bf16.mxu0 %v5422_v51  ;;  %v6989_v21 = vld [vmem:[#allocation26_spill] sm:$0xff] }
 0x907   :  { %3432 = vmatpush3.bf16.msra.mxu1 %v5638_v8  ;;  %3447 = vmatprep.mubr.msk.bf16.mxu1 %vm4394_vm0, %v6974_v46 }
 0x908   :  { %3433 = vmatprep.subr.bf16.mxu1 %v6974_v46 }
 0x909   :  { %2088 = vmatpush1.bf16.msra.mxu0 %v5430_v1 }
 0x90a   :  { %2089 = vmatprep.subr.bf16.mxu0 %v5436_v6 }
 0x90b   :  { %3434 = vmatpush3.bf16.msra.mxu1 %v5644_v10 }
 0x90c   :  { %3435 = vmatprep.subr.bf16.mxu1 %v6974_v46 }
 0x90d   :  { %2090 = vmatpush1.bf16.msra.mxu0 %v5442_v25 }
 0x90e   :  { %2091 = vmatprep.subr.bf16.mxu0 %v5448_v28 }
 0x90f   :  { %3436 = vmatpush3.bf16.msra.mxu1 %v5648_v18 }
 0x910   :  { %3437 = vmatprep.subr.bf16.mxu1 %v6974_v46 }
 0x911   :  { %2092 = vmatpush1.bf16.msra.mxu0 %v5454_v30 }
 0x912   :  { %2093 = vmatprep.subr.bf16.mxu0 %v5460_v32 }
 0x913   :  { %3438 = vmatpush3.bf16.msra.mxu1 %v5652_v13 }
 0x914   :  { %3439 = vmatprep.subr.bf16.mxu1 %v6974_v46 }
 0x915   :  { %2094 = vmatpush1.bf16.msra.mxu0 %v5466_v34 }
 0x916   :  { %2095 = vmatprep.subr.bf16.mxu0 %v5472_v36 }
 0x917   :  { %3440 = vmatpush3.bf16.msra.mxu1 %v5656_v9 }
 0x918   :  { %3441 = vmatprep.subr.bf16.mxu1 %v6974_v46 }
 0x919   :  { %2096 = vmatpush1.bf16.msra.mxu0 %v5478_v38 }
 0x91a   :  { %2097 = vmatprep.subr.bf16.mxu0 %v5484_v44 }
 0x91b   :  { %3442 = vmatpush3.bf16.msra.mxu1 %v5661_v47 }
 0x91c   :  { %3443 = vmatprep.subr.bf16.mxu1 %v6974_v46 }
 0x91d   :  { %2098 = vmatpush1.bf16.msra.mxu0 %v5490_v57 }
 0x91e   :  { %2099 = vmatprep.subr.bf16.mxu0 %v5496_v53 }
 0x91f   :  { %3444 = vmatpush3.bf16.msra.mxu1 %v5665_v17 }
 0x920   :  { %3445 = vmatprep.subr.bf16.mxu1 %v6974_v46 }
 0x921   :  { %2100 = vmatpush1.bf16.msra.mxu0 %v5502_v58 }
 0x922   :  { %2101 = vmatprep.subr.bf16.mxu0 %v5508_v62 }
 0x923   :  { %3446 = vmatpush3.bf16.msra.mxu1 %v5669_v16 }
 0x924   :  { %2236 = vmatprep.subr.bf16.mxu1 %v5399_v41 }
 0x925   :  { %2102 = vmatpush1.bf16.msra.mxu0 %v5514_v5 }
 0x926   :  { %2103 = vmatprep.subr.bf16.mxu0 %v5520_v52 }
 0x929   :  { %2104 = vmatpush1.bf16.msra.mxu0 %v5526_v20 }
 0x92a   :  { %2105 = vmatprep.subr.bf16.mxu0 %v5532_v48 }
 0x92d   :  { %2106 = vmatpush1.bf16.msra.mxu0 %v5538_v12 }
 0x92e   :  { %2107 = vmatprep.subr.bf16.mxu0 %v6975_v60 }
 0x931   :  { %2108 = vmatpush1.bf16.msra.mxu0 %v6976_v61 }
 0x932   :  { %2109 = vmatprep.subr.bf16.mxu0 %v6977_v56 }
 0x935   :  { %2110 = vmatpush1.bf16.msra.mxu0 %v6978_v59 }
 0x936   :  { %2111 = vmatprep.subr.bf16.mxu0 %v6979_v42 }
 0x939   :  { %2112 = vmatpush1.bf16.msra.mxu0 %v5574_v22 }
 0x93a   :  { %2113 = vmatprep.subr.bf16.mxu0 %v6980_v0 }
 0x93d   :  { %2114 = vmatpush1.bf16.msra.mxu0 %v5586_v11 }
 0x93e   :  { %2115 = vmatprep.subr.bf16.mxu0 %v5592_v49 }
 0x941   :  { %2116 = vmatpush1.bf16.msra.mxu0 %v5598_v14 }
 0x942   :  { %2195 = vmatprep.subr.bf16.mxu0 %v5397_v39 }
 0x944   :  { %2118 = vmatmul.mubr.bf16.vlgmr.msra.gmra.mrb[40].mxu0 %v6973_v26  ;;  %v6990_v26 = vld [vmem:[#allocation24_spill] sm:$0xff] }
 0x945   :  { %2196 = vmatpush1.bf16.msra.mxu0 %v5416_v23 }
 0x946   :  { %2197 = vmatprep.subr.bf16.mxu0 %v5420_v4 }
 0x949   :  { %2198 = vmatpush1.bf16.msra.mxu0 %v5428_v55 }
 0x94a   :  { %2199 = vmatprep.subr.bf16.mxu0 %v5434_v3 }
 0x94d   :  { %2200 = vmatpush1.bf16.msra.mxu0 %v5440_v24 }
 0x94e   :  { %2201 = vmatprep.subr.bf16.mxu0 %v5446_v27 }
 0x951   :  { %2202 = vmatpush1.bf16.msra.mxu0 %v5452_v29  ;;  %v6991_v29 = vld [vmem:[#allocation29_spill] sm:$0xff] }
 0x952   :  { %2203 = vmatprep.subr.bf16.mxu0 %v6981_v50  ;;  %v6992_v50 = vld [vmem:[#allocation25_spill] sm:$0xff] }
 0x955   :  { %2204 = vmatpush1.bf16.msra.mxu0 %v6982_v2  ;;  %v6993_v2 = vld [vmem:[#allocation48_spill] sm:$0xff] }
 0x956   :  { %2205 = vmatprep.subr.bf16.mxu0 %v6983_v43  ;;  %v6994_v43 = vld [vmem:[#allocation44_spill] sm:$0xff] }
 0x959   :  { %2206 = vmatpush1.bf16.msra.mxu0 %v6984_v33  ;;  %v6995_v33 = vld [vmem:[#allocation50_spill] sm:$0xff] }
 0x95a   :  { %2207 = vmatprep.subr.bf16.mxu0 %v6985_v31  ;;  %v6996_v31 = vld [vmem:[#allocation52_spill] sm:$0xff] }
 0x95d   :  { %2208 = vmatpush1.bf16.msra.mxu0 %v6986_v45  ;;  %v6997_v45 = vld [vmem:[#allocation54_spill] sm:$0xff] }
 0x95e   :  { %2209 = vmatprep.subr.bf16.mxu0 %v6987_v37  ;;  %v6998_v37 = vld [vmem:[#allocation56_spill] sm:$0xff] }
 0x961   :  { %2210 = vmatpush1.bf16.msra.mxu0 %v6988_v63  ;;  %v6999_v63 = vld [vmem:[#allocation58_spill] sm:$0xff] }
 0x962   :  { %2211 = vmatprep.subr.bf16.mxu0 %v6989_v21  ;;  %v7000_v21 = vld [vmem:[#allocation60_spill] sm:$0xff] }
 0x965   :  { %2212 = vmatpush1.bf16.msra.mxu0 %v6990_v26  ;;  %v7001_v26 = vld [vmem:[#allocation61_spill] sm:$0xff] }
 0x966   :  { %2213 = vmatprep.subr.bf16.mxu0 %v6991_v29  ;;  %v7002_v29 = vld [vmem:[#allocation63_spill] sm:$0xff] }
 0x969   :  { %2214 = vmatpush1.bf16.msra.mxu0 %v6992_v50  ;;  %v7003_v50 = vld [vmem:[#allocation64_spill] sm:$0xff] }
 0x96a   :  { %2215 = vmatprep.subr.bf16.mxu0 %v6993_v2  ;;  %v7004_v2 = vld [vmem:[#allocation65_spill] sm:$0xff] }
 0x96d   :  { %2216 = vmatpush1.bf16.msra.mxu0 %v6994_v43 }
 0x96e   :  { %2217 = vmatprep.subr.bf16.mxu0 %v6995_v33 }
 0x971   :  { %2218 = vmatpush1.bf16.msra.mxu0 %v6996_v31 }
 0x972   :  { %2219 = vmatprep.subr.bf16.mxu0 %v6997_v45  ;;  %v5792_v45 = vld [vmem:[%s6512_s6] ss:$0 sm:$0xff] }
 0x975   :  { %2220 = vmatpush1.bf16.msra.mxu0 %v6998_v37 }
 0x976   :  { %2221 = vmatprep.subr.bf16.mxu0 %v6999_v63 }
 0x979   :  { %2222 = vmatpush1.bf16.msra.mxu0 %v7000_v21 }
 0x97a   :  { %2223 = vmatprep.subr.bf16.mxu0 %v7001_v26 }
 0x97d   :  { %2224 = vmatpush1.bf16.msra.mxu0 %v7002_v29 }
 0x97e   :  { %2225 = vmatprep.subr.bf16.mxu0 %v7003_v50 }
 0x981   :  { %2226 = vmatpush1.bf16.msra.mxu0 %v7004_v2 }
 0x982   :  { %3451 = vmatprep.subr.bf16.mxu0 %v6974_v46 }
 0x9d7   :  { %v2035_v37 = vpop.f32.mrb[36].mxu0 }
 0x9d8   :  { %v2036_v63 = vadd.f32 %v5792_v45, %v2035_v37  ;;  %v3429_v31 = vpop.f32.mrb[37].mxu0  ;;  %v2078_v21 = vpop.f32.mrb[36].mxu1 }
 0x9d9   :  { %v2038_v33 = vpop.f32.mrb[38].mxu0  ;;  %v2080_v26 = vpop.f32.mrb[37].mxu1  ;;  %v2079_v27 = vadd.f32 %v2078_v21, %v5684_v19 }
 0x9da   :  { %2041 = vst [vmem:[#allocation12] sm:$0xff] %v2036_v63  ;;  %v3430_v29 = vpop.f32.mrb[39].mxu0  ;;  %v2082_v43 = vpop.f32.mrb[38].mxu1  ;;  %v2081_v2 = vadd.f32 %v2080_v26, %v5688_v7 }
 0x9db   :  { %v2083_v50 = vpop.f32.mrb[39].mxu1  ;;  %v3318_v3 = vmul.f32 -1.442695, %v2079_v27 }
 0x9dc   :  { %v3319_v24 = vmul.f32 -1.442695, %v2081_v2 }
 0x9de   :  { %3931 = vpow2.f32 %v3319_v24 }
 0x9df   :  { %3933 = vpow2.f32 %v3318_v3 }
 0x9e8   :  { %v3932_v55 = vpop.eup %3931 }
 0x9e9   :  { %v3934_v4 = vpop.eup %3933  ;;  %v2135_v23 = vadd.f32 1.0, %v3932_v55 }
 0x9ea   :  { %v2129_v37 = vadd.f32 1.0, %v3934_v4 }
 0x9eb   :  { %3935 = vrcp.f32 %v2135_v23 }
 0x9ec   :  { %3937 = vrcp.f32 %v2129_v37 }
 0x9f5   :  { %v3936_v27 = vpop.eup %3935 }
 0x9f6   :  { %v3938_v24 = vpop.eup %3937  ;;  %v2145_v2 = vmul.f32 %v3936_v27, %v5702_v54  ;;  %v7023_v54 = vld [vmem:[#allocation29_spill] sm:$0xff]  ;;  %v7027_v27 = vld [vmem:[#allocation50_spill] sm:$0xff] }
 0xa17   :  { %v2119_v31 = vpop.f32.mrb[40].mxu0 }
 0xa18   :  { %v2120_v33 = vadd.f32 %v2119_v31, %v5699_v35  ;;  %v2121_v63 = vpop.f32.mrb[41].mxu0 }
 0xa19   :  { %v2122_v29 = vadd.f32 %v2121_v63, %v5694_v40  ;;  %v2123_v50 = vpop.f32.mrb[42].mxu0 }
 0xa1a   :  { %3939 = vtanh.f32 %v2120_v33  ;;  %v2124_v43 = vpop.f32.mrb[43].mxu0  ;;  %v7024_v50 = vld [vmem:[#allocation25_spill] sm:$0xff] }
 0xa1b   :  { %v3320_v21 = vmul.f32 -1.442695, %v2122_v29  ;;  %v7005_v29 = vld [vmem:[#allocation46_spill] sm:$0xff]  ;;  %v7025_v43 = vld [vmem:[#allocation48_spill] sm:$0xff] }
 0xa1d   :  { %3941 = vpow2.f32 %v3320_v21  ;;  %v7026_v21 = vld [vmem:[#allocation44_spill] sm:$0xff] }
 0xa24   :  { %v3940_v3 = vpop.eup %3939 }
 0xa25   :  { %v2146_v55 = vmul.f32 %v3940_v3, %v3938_v24  ;;  %v7028_v24 = vld [vmem:[#allocation52_spill] sm:$0xff]  ;;  %v7029_v3 = vld [vmem:[#allocation54_spill] sm:$0xff] }
 0xa27   :  { %v3942_v4 = vpop.eup %3941  ;;  %v5800_v26 = vadd.f32 %v2146_v55, %v2145_v2  ;;  %v7030_v2 = vld [vmem:[#allocation56_spill] sm:$0xff]  ;;  %v7031_v55 = vld [vmem:[#allocation58_spill] sm:$0xff] }
 0xa28   :  { %v2142_v23 = vadd.f32 1.0, %v3942_v4  ;;  %v7032_v4 = vld [vmem:[#allocation60_spill] sm:$0xff] }
 0xa29   :  { %3943 = vtanh.f32 %v5800_v26 }
 0xa2a   :  { %3945 = vrcp.f32 %v2142_v23  ;;  %v7033_v23 = vld [vmem:[#allocation61_spill] sm:$0xff] }
 0xa33   :  { %v3944_v37 = vpop.eup %3943 }
 0xa34   :  { %v3946_v31 = vpop.eup %3945 }
 0xa35   :  { %v2149_v63 = vmul.f32 %v3946_v31, %v3944_v37  ;;  %v7034_v37 = vld [vmem:[#allocation63_spill] sm:$0xff]  ;;  %v7035_v31 = vld [vmem:[#allocation64_spill] sm:$0xff] }
 0xa37   :  { %v2150_v33 = vpack.c.bf16 %v2149_v63, %v2149_v63  ;;  %v7036_v63 = vld [vmem:[#allocation65_spill] sm:$0xff] }
 0xa39   :  { %3448 = vmatmul.mubr.bf16.vlgmr.msra.gmra.mrb[40].mxu1 %v2150_v33  ;;  %2227 = vmatprep.mubr.bf16.mxu0 %v2150_v33 }
 0xa3a   :  { %2237 = vmatpush1.bf16.msra.mxu1 %v5418_v15  ;;  %2228 = vmatmul.mubr.bf16.vlgmr.msra.gmra.mrb[44].mxu0 %v7005_v29  ;;  %v7007_v15 = vld [vmem:[#allocation34_spill] sm:$0xff] }
 0xa3b   :  { %2268 = vmatprep.mubr.bf16.mxu1 %v2150_v33  ;;  %2238 = vmatprep.subr.bf16.mxu1 %v5422_v51  ;;  %v7008_v51 = vld [vmem:[#allocation27_spill] sm:$0xff] }
 0xa3c   :  { %3452 = vmatpush3.bf16.msra.mxu0 %v5638_v8  ;;  %3467 = vmatprep.mubr.msk.bf16.mxu0 %vm4394_vm0, %v6974_v46 }
 0xa3d   :  { %3453 = vmatprep.subr.bf16.mxu0 %v6974_v46 }
 0xa3e   :  { %2239 = vmatpush1.bf16.msra.mxu1 %v5430_v1  ;;  %v7009_v1 = vld [vmem:[#allocation31_spill] sm:$0xff] }
 0xa3f   :  { %2240 = vmatprep.subr.bf16.mxu1 %v5436_v6  ;;  %v7010_v6 = vld [vmem:[#allocation33_spill] sm:$0xff] }
 0xa40   :  { %3454 = vmatpush3.bf16.msra.mxu0 %v5644_v10 }
 0xa41   :  { %3455 = vmatprep.subr.bf16.mxu0 %v6974_v46 }
 0xa42   :  { %2241 = vmatpush1.bf16.msra.mxu1 %v5442_v25  ;;  %v7011_v25 = vld [vmem:[#allocation37_spill] sm:$0xff] }
 0xa43   :  { %2242 = vmatprep.subr.bf16.mxu1 %v5448_v28  ;;  %v7012_v28 = vld [vmem:[#allocation32_spill] sm:$0xff] }
 0xa44   :  { %3456 = vmatpush3.bf16.msra.mxu0 %v5648_v18 }
 0xa45   :  { %3457 = vmatprep.subr.bf16.mxu0 %v6974_v46 }
 0xa46   :  { %2243 = vmatpush1.bf16.msra.mxu1 %v5454_v30  ;;  %v7013_v30 = vld [vmem:[#allocation38_spill] sm:$0xff] }
 0xa47   :  { %2244 = vmatprep.subr.bf16.mxu1 %v5460_v32  ;;  %v7014_v32 = vld [vmem:[#allocation35_spill] sm:$0xff] }
 0xa48   :  { %3458 = vmatpush3.bf16.msra.mxu0 %v5652_v13 }
 0xa49   :  { %3459 = vmatprep.subr.bf16.mxu0 %v6974_v46 }
 0xa4a   :  { %2245 = vmatpush1.bf16.msra.mxu1 %v5466_v34  ;;  %v7016_v34 = vld [vmem:[#allocation36_spill] sm:$0xff] }
 0xa4b   :  { %2246 = vmatprep.subr.bf16.mxu1 %v5472_v36  ;;  %v7017_v36 = vld [vmem:[#allocation41_spill] sm:$0xff] }
 0xa4c   :  { %3460 = vmatpush3.bf16.msra.mxu0 %v5656_v9 }
 0xa4d   :  { %3461 = vmatprep.subr.bf16.mxu0 %v6974_v46 }
 0xa4e   :  { %2247 = vmatpush1.bf16.msra.mxu1 %v5478_v38  ;;  %v7018_v38 = vld [vmem:[#allocation39_spill] sm:$0xff] }
 0xa4f   :  { %2248 = vmatprep.subr.bf16.mxu1 %v5484_v44  ;;  %v7019_v44 = vld [vmem:[#allocation42_spill] sm:$0xff] }
 0xa50   :  { %3462 = vmatpush3.bf16.msra.mxu0 %v5661_v47 }
 0xa51   :  { %3463 = vmatprep.subr.bf16.mxu0 %v6974_v46 }
 0xa52   :  { %2249 = vmatpush1.bf16.msra.mxu1 %v5490_v57  ;;  %v7020_v57 = vld [vmem:[#allocation23_spill] sm:$0xff] }
 0xa53   :  { %2250 = vmatprep.subr.bf16.mxu1 %v5496_v53  ;;  %v7021_v53 = vld [vmem:[#allocation26_spill] sm:$0xff] }
 0xa54   :  { %3464 = vmatpush3.bf16.msra.mxu0 %v5665_v17 }
 0xa55   :  { %3465 = vmatprep.subr.bf16.mxu0 %v6974_v46 }
 0xa56   :  { %2251 = vmatpush1.bf16.msra.mxu1 %v5502_v58  ;;  %v7022_v58 = vld [vmem:[#allocation24_spill] sm:$0xff] }
 0xa57   :  { %2252 = vmatprep.subr.bf16.mxu1 %v5508_v62 }
 0xa58   :  { %3466 = vmatpush3.bf16.msra.mxu0 %v5669_v16 }
 0xa59   :  { %2387 = vmatprep.subr.bf16.mxu0 %v5399_v41  ;;  %v7006_v41 = vld [vmem:[#allocation30_spill] sm:$0xff] }
 0xa5a   :  { %2253 = vmatpush1.bf16.msra.mxu1 %v5514_v5 }
 0xa5b   :  { %2254 = vmatprep.subr.bf16.mxu1 %v5520_v52 }
 0xa5e   :  { %2255 = vmatpush1.bf16.msra.mxu1 %v5526_v20 }
 0xa5f   :  { %2256 = vmatprep.subr.bf16.mxu1 %v5532_v48 }
 0xa62   :  { %2257 = vmatpush1.bf16.msra.mxu1 %v5538_v12 }
 0xa63   :  { %2258 = vmatprep.subr.bf16.mxu1 %v6975_v60 }
 0xa66   :  { %2259 = vmatpush1.bf16.msra.mxu1 %v6976_v61 }
 0xa67   :  { %2260 = vmatprep.subr.bf16.mxu1 %v6977_v56 }
 0xa6a   :  { %2261 = vmatpush1.bf16.msra.mxu1 %v6978_v59 }
 0xa6b   :  { %2262 = vmatprep.subr.bf16.mxu1 %v6979_v42 }
 0xa6e   :  { %2263 = vmatpush1.bf16.msra.mxu1 %v5574_v22 }
 0xa6f   :  { %2264 = vmatprep.subr.bf16.mxu1 %v6980_v0 }
 0xa72   :  { %2265 = vmatpush1.bf16.msra.mxu1 %v5586_v11 }
 0xa73   :  { %2266 = vmatprep.subr.bf16.mxu1 %v5592_v49 }
 0xa76   :  { %2267 = vmatpush1.bf16.msra.mxu1 %v5598_v14 }
 0xa77   :  { %2346 = vmatprep.subr.bf16.mxu1 %v5397_v39  ;;  %v7015_v39 = vld [vmem:[#allocation40_spill] sm:$0xff] }
 0xa79   :  { %2269 = vmatmul.mubr.bf16.vlgmr.msra.gmra.mrb[44].mxu1 %v7005_v29 }
 0xa7a   :  { %2347 = vmatpush1.bf16.msra.mxu1 %v7006_v41 }
 0xa7b   :  { %2348 = vmatprep.subr.bf16.mxu1 %v7007_v15 }
 0xa7e   :  { %2349 = vmatpush1.bf16.msra.mxu1 %v7008_v51 }
 0xa7f   :  { %2350 = vmatprep.subr.bf16.mxu1 %v7009_v1 }
 0xa82   :  { %2351 = vmatpush1.bf16.msra.mxu1 %v7010_v6 }
 0xa83   :  { %2352 = vmatprep.subr.bf16.mxu1 %v7011_v25 }
 0xa86   :  { %2353 = vmatpush1.bf16.msra.mxu1 %v7012_v28 }
 0xa87   :  { %2354 = vmatprep.subr.bf16.mxu1 %v7013_v30 }
 0xa8a   :  { %2355 = vmatpush1.bf16.msra.mxu1 %v7014_v32 }
 0xa8b   :  { %2356 = vmatprep.subr.bf16.mxu1 %v7015_v39 }
 0xa8e   :  { %2357 = vmatpush1.bf16.msra.mxu1 %v7016_v34 }
 0xa8f   :  { %2358 = vmatprep.subr.bf16.mxu1 %v7017_v36 }
 0xa92   :  { %2359 = vmatpush1.bf16.msra.mxu1 %v7018_v38 }
 0xa93   :  { %2360 = vmatprep.subr.bf16.mxu1 %v7019_v44 }
 0xa96   :  { %2361 = vmatpush1.bf16.msra.mxu1 %v7020_v57 }
 0xa97   :  { %2362 = vmatprep.subr.bf16.mxu1 %v7021_v53 }
 0xa9a   :  { %2363 = vmatpush1.bf16.msra.mxu1 %v7022_v58 }
 0xa9b   :  { %2364 = vmatprep.subr.bf16.mxu1 %v7023_v54 }
 0xa9e   :  { %2365 = vmatpush1.bf16.msra.mxu1 %v7024_v50 }
 0xa9f   :  { %2366 = vmatprep.subr.bf16.mxu1 %v7025_v43 }
 0xaa2   :  { %2367 = vmatpush1.bf16.msra.mxu1 %v7026_v21 }
 0xaa3   :  { %2368 = vmatprep.subr.bf16.mxu1 %v7027_v27 }
 0xaa6   :  { %2369 = vmatpush1.bf16.msra.mxu1 %v7028_v24 }
 0xaa7   :  { %2370 = vmatprep.subr.bf16.mxu1 %v7029_v3 }
 0xaaa   :  { %2371 = vmatpush1.bf16.msra.mxu1 %v7030_v2 }
 0xaab   :  { %2372 = vmatprep.subr.bf16.mxu1 %v7031_v55 }
 0xaae   :  { %2373 = vmatpush1.bf16.msra.mxu1 %v7032_v4 }
 0xaaf   :  { %2374 = vmatprep.subr.bf16.mxu1 %v7033_v23 }
 0xab2   :  { %2375 = vmatpush1.bf16.msra.mxu1 %v7034_v37 }
 0xab3   :  { %2376 = vmatprep.subr.bf16.mxu1 %v7035_v31 }
 0xab6   :  { %2377 = vmatpush1.bf16.msra.mxu1 %v7036_v63 }
 0xab7   :  { %3471 = vmatprep.subr.bf16.mxu1 %v6974_v46 }
 0xb0c   :  { %v2185_v33 = vpop.f32.mrb[40].mxu1 }
 0xb0d   :  { %v2186_v29 = vadd.f32 %v5792_v45, %v2185_v33  ;;  %v3449_v41 = vpop.f32.mrb[41].mxu1  ;;  %v2229_v15 = vpop.f32.mrb[44].mxu0 }
 0xb0e   :  { %v2188_v51 = vpop.f32.mrb[42].mxu1  ;;  %v2231_v1 = vpop.f32.mrb[45].mxu0  ;;  %v2230_v32 = vadd.f32 %v2229_v15, %v5684_v19 }
 0xb0f   :  { %2192 = vst [vmem:[#allocation12 + $0x8] sm:$0xff] %v2186_v29  ;;  %v3450_v6 = vpop.f32.mrb[43].mxu1  ;;  %v2233_v25 = vpop.f32.mrb[46].mxu0  ;;  %v2232_v30 = vadd.f32 %v2231_v1, %v5688_v7 }
 0xb10   :  { %v2234_v28 = vpop.f32.mrb[47].mxu0  ;;  %v3321_v34 = vmul.f32 -1.442695, %v2230_v32  ;;  %v5896_v25 = vld [vmem:[#allocation8 + $0x8] ss:$16 sps:$4 sm:$0xff]  }
 0xb11   :  { %v3322_v39 = vmul.f32 -1.442695, %v2232_v30  ;;  %v7037_v28 = vld [vmem:[#allocation28_spill] sm:$0xff] }
 0xb12   :  { %v5907_v30 = vld [vmem:[#allocation8 + $0x28] ss:$16 sps:$4 sm:$0xff]   ;;  %v5910_v32 = vld [vmem:[#allocation8 + $0x4c] ss:$16 sps:$4 sm:$0xff]  }
 0xb13   :  { %3947 = vpow2.f32 %v3322_v39  ;;  %v5915_v39 = vld [vmem:[#allocation8 + $0x48] ss:$16 sps:$4 sm:$0xff]  }
 0xb14   :  { %3949 = vpow2.f32 %v3321_v34  ;;  %v5923_v34 = vld [vmem:[#allocation8 + $0x68] ss:$16 sps:$4 sm:$0xff]  }
 0xb1d   :  { %v3948_v36 = vpop.eup %3947 }
 0xb1e   :  { %v3950_v38 = vpop.eup %3949  ;;  %v2286_v44 = vadd.f32 1.0, %v3948_v36  ;;  %v5926_v36 = vld [vmem:[#allocation8 + $0x8c] ss:$16 sps:$4 sm:$0xff]  }
 0xb1f   :  { %v2280_v57 = vadd.f32 1.0, %v3950_v38  ;;  %v5934_v38 = vld [vmem:[#allocation8 + $0xac] ss:$16 sps:$4 sm:$0xff]  }
 0xb20   :  { %3951 = vrcp.f32 %v2286_v44  ;;  %v5942_v44 = vld [vmem:[#allocation8 + $0xcc] ss:$16 sps:$4 sm:$0xff]  }
 0xb21   :  { %3953 = vrcp.f32 %v2280_v57  ;;  %v5950_v57 = vld [vmem:[#allocation8 + $0xec] ss:$16 sps:$4 sm:$0xff]  }
 0xb2a   :  { %v3952_v24 = vpop.eup %3951 }
 0xb2b   :  { %v3954_v3 = vpop.eup %3953  ;;  %v2296_v55 = vmul.f32 %v3952_v24, %v5800_v26  ;;  %v5900_v26 = vld [vmem:[#allocation8 + $0x2c] ss:$16 sps:$4 sm:$0xff]   ;;  %v6054_v24 = vld [vmem:[#allocation8 + $0x180] ss:$16 sps:$4 sm:$0xff]  }
 0xb2c   :  { %7062 = vst [vmem:[#allocation23_spill] sm:$0xff] %v6054_v24 }
 0xb4c   :  { %v2270_v53 = vpop.f32.mrb[44].mxu1 }
 0xb4d   :  { %v2271_v58 = vadd.f32 %v2270_v53, %v5699_v35  ;;  %v2272_v54 = vpop.f32.mrb[45].mxu1  ;;  %v6033_v53 = vld [vmem:[#allocation8 + $0x124] ss:$16 sps:$4 sm:$0xff]  }
 0xb4e   :  { %v2273_v50 = vadd.f32 %v2272_v54, %v5694_v40  ;;  %v2274_v43 = vpop.f32.mrb[46].mxu1  ;;  %7055 = vst [vmem:[#allocation38_spill] sm:$0xff] %v6033_v53  ;;  %v6039_v54 = vld [vmem:[#allocation8 + $0x144] ss:$16 sps:$4 sm:$0xff]  }
 0xb4f   :  { %3955 = vtanh.f32 %v2271_v58  ;;  %v2275_v21 = vpop.f32.mrb[47].mxu1  ;;  %v6036_v58 = vld [vmem:[#allocation8 + $0x120] ss:$16 sps:$4 sm:$0xff]   ;;  %7057 = vst [vmem:[#allocation40_spill] sm:$0xff] %v6039_v54  ;;  %v6045_v43 = vld [vmem:[#allocation8 + $0x164] ss:$16 sps:$4 sm:$0xff]  }
 0xb50   :  { %v3323_v27 = vmul.f32 -1.442695, %v2273_v50  ;;  %7056 = vst [vmem:[#allocation35_spill] sm:$0xff] %v6036_v58  ;;  %v6042_v50 = vld [vmem:[#allocation8 + $0x140] ss:$16 sps:$4 sm:$0xff]   ;;  %7059 = vst [vmem:[#allocation41_spill] sm:$0xff] %v6045_v43 }
 0xb51   :  { %7058 = vst [vmem:[#allocation36_spill] sm:$0xff] %v6042_v50  ;;  %v6048_v21 = vld [vmem:[#allocation8 + $0x160] ss:$16 sps:$4 sm:$0xff]  }
 0xb52   :  { %3957 = vpow2.f32 %v3323_v27  ;;  %7060 = vst [vmem:[#allocation39_spill] sm:$0xff] %v6048_v21  ;;  %v6051_v27 = vld [vmem:[#allocation8 + $0x184] ss:$16 sps:$4 sm:$0xff]  }
 0xb53   :  { %7061 = vst [vmem:[#allocation42_spill] sm:$0xff] %v6051_v27 }
 0xb59   :  { %v3956_v2 = vpop.eup %3955 }
 0xb5a   :  { %v2297_v4 = vmul.f32 %v3956_v2, %v3954_v3  ;;  %v6057_v3 = vld [vmem:[#allocation8 + $0x1a4] ss:$16 sps:$4 sm:$0xff]   ;;  %v6060_v2 = vld [vmem:[#allocation8 + $0x1a0] ss:$16 sps:$4 sm:$0xff]  }
 0xb5b   :  { %7063 = vst [vmem:[#allocation26_spill] sm:$0xff] %v6057_v3  ;;  %7064 = vst [vmem:[#allocation24_spill] sm:$0xff] %v6060_v2 }
 0xb5c   :  { %v3958_v33 = vpop.eup %3957  ;;  %v5893_v29 = vadd.f32 %v2297_v4, %v2296_v55 }
 0xb5d   :  { %v2293_v41 = vadd.f32 1.0, %v3958_v33 }
 0xb5e   :  { %3959 = vtanh.f32 %v5893_v29 }
 0xb5f   :  { %3961 = vrcp.f32 %v2293_v41 }
 0xb68   :  { %v3960_v15 = vpop.eup %3959 }
 0xb69   :  { %v3962_v51 = vpop.eup %3961 }
 0xb6a   :  { %v2300_v1 = vmul.f32 %v3962_v51, %v3960_v15 }
 0xb6c   :  { %v2301_v6 = vpack.c.bf16 %v2300_v1, %v2300_v1 }
 0xb6e   :  { %3468 = vmatmul.mubr.bf16.vlgmr.msra.gmra.mrb[48].mxu0 %v2301_v6  ;;  %2378 = vmatprep.mubr.bf16.mxu1 %v2301_v6 }
 0xb6f   :  { %2388 = vmatpush1.bf16.msra.mxu0 %v5896_v25  ;;  %2379 = vmatmul.mubr.bf16.vlgmr.msra.gmra.mrb[48].mxu1 %v7037_v28 }
 0xb70   :  { %2419 = vmatprep.mubr.bf16.mxu0 %v2301_v6  ;;  %2389 = vmatprep.subr.bf16.mxu0 %v5900_v26 }
 0xb71   :  { %3472 = vmatpush3.bf16.msra.mxu1 %v5638_v8  ;;  %3487 = vmatprep.mubr.msk.bf16.mxu1 %vm4394_vm0, %v6974_v46  ;;  %v5918_v8 = vld [vmem:[#allocation8 + $0x6c] ss:$16 sps:$4 sm:$0xff]  }
 0xb72   :  { %3473 = vmatprep.subr.bf16.mxu1 %v6974_v46 }
 0xb73   :  { %2390 = vmatpush1.bf16.msra.mxu0 %v5907_v30 }
 0xb74   :  { %2391 = vmatprep.subr.bf16.mxu0 %v5910_v32 }
 0xb75   :  { %3474 = vmatpush3.bf16.msra.mxu1 %v5644_v10  ;;  %v5931_v10 = vld [vmem:[#allocation8 + $0x88] ss:$16 sps:$4 sm:$0xff]  }
 0xb76   :  { %3475 = vmatprep.subr.bf16.mxu1 %v6974_v46 }
 0xb77   :  { %2392 = vmatpush1.bf16.msra.mxu0 %v5915_v39 }
 0xb78   :  { %2393 = vmatprep.subr.bf16.mxu0 %v5918_v8 }
 0xb79   :  { %3476 = vmatpush3.bf16.msra.mxu1 %v5648_v18  ;;  %v5939_v18 = vld [vmem:[#allocation8 + $0xa8] ss:$16 sps:$4 sm:$0xff]  }
 0xb7a   :  { %3477 = vmatprep.subr.bf16.mxu1 %v6974_v46 }
 0xb7b   :  { %2394 = vmatpush1.bf16.msra.mxu0 %v5923_v34 }
 0xb7c   :  { %2395 = vmatprep.subr.bf16.mxu0 %v5926_v36 }
 0xb7d   :  { %3478 = vmatpush3.bf16.msra.mxu1 %v5652_v13  ;;  %v5947_v13 = vld [vmem:[#allocation8 + $0xc8] ss:$16 sps:$4 sm:$0xff]  }
 0xb7e   :  { %3479 = vmatprep.subr.bf16.mxu1 %v6974_v46 }
 0xb7f   :  { %2396 = vmatpush1.bf16.msra.mxu0 %v5931_v10 }
 0xb80   :  { %2397 = vmatprep.subr.bf16.mxu0 %v5934_v38 }
 0xb81   :  { %3480 = vmatpush3.bf16.msra.mxu1 %v5656_v9  ;;  %v5955_v9 = vld [vmem:[#allocation8 + $0xe8] ss:$16 sps:$4 sm:$0xff]  }
 0xb82   :  { %3481 = vmatprep.subr.bf16.mxu1 %v6974_v46 }
 0xb83   :  { %2398 = vmatpush1.bf16.msra.mxu0 %v5939_v18 }
 0xb84   :  { %2399 = vmatprep.subr.bf16.mxu0 %v5942_v44 }
 0xb85   :  { %3482 = vmatpush3.bf16.msra.mxu1 %v5661_v47  ;;  %v5960_v47 = vld [vmem:[#allocation8 + $0xc] ss:$16 sps:$4 sm:$0xff]  }
 0xb86   :  { %3483 = vmatprep.subr.bf16.mxu1 %v6974_v46 }
 0xb87   :  { %2400 = vmatpush1.bf16.msra.mxu0 %v5947_v13 }
 0xb88   :  { %2401 = vmatprep.subr.bf16.mxu0 %v5950_v57 }
 0xb89   :  { %3484 = vmatpush3.bf16.msra.mxu1 %v5665_v17  ;;  %v6009_v17 = vld [vmem:[#allocation8 + $0xa4] ss:$16 sps:$4 sm:$0xff]  }
 0xb8a   :  { %3485 = vmatprep.subr.bf16.mxu1 %v6974_v46  ;;  %7047 = vst [vmem:[#allocation46_spill] sm:$0xff] %v6009_v17 }
 0xb8b   :  { %2402 = vmatpush1.bf16.msra.mxu0 %v5955_v9 }
 0xb8c   :  { %2403 = vmatprep.subr.bf16.mxu0 %v5508_v62  ;;  %v5978_v62 = vld [vmem:[#allocation8 + $0x4] ss:$16 sps:$4 sm:$0xff]  }
 0xb8d   :  { %3486 = vmatpush3.bf16.msra.mxu1 %v5669_v16  ;;  %v6006_v16 = vld [vmem:[#allocation8 + $0x80] ss:$16 sps:$4 sm:$0xff]  }
 0xb8e   :  { %2538 = vmatprep.subr.bf16.mxu1 %v5960_v47  ;;  %7046 = vst [vmem:[#allocation62_spill] sm:$0xff] %v6006_v16 }
 0xb8f   :  { %2404 = vmatpush1.bf16.msra.mxu0 %v5514_v5  ;;  %v5982_v5 = vld [vmem:[#allocation8] ss:$16 sps:$4 sm:$0xff]  }
 0xb90   :  { %2405 = vmatprep.subr.bf16.mxu0 %v5520_v52  ;;  %7038 = vst [vmem:[#allocation47_spill] sm:$0xff] %v5982_v5  ;;  %v5985_v52 = vld [vmem:[#allocation8 + $0x24] ss:$16 sps:$4 sm:$0xff]  }
 0xb91   :  { %7039 = vst [vmem:[#allocation43_spill] sm:$0xff] %v5985_v52 }
 0xb93   :  { %2406 = vmatpush1.bf16.msra.mxu0 %v5526_v20  ;;  %v5988_v20 = vld [vmem:[#allocation8 + $0x20] ss:$16 sps:$4 sm:$0xff]  }
 0xb94   :  { %2407 = vmatprep.subr.bf16.mxu0 %v5532_v48  ;;  %7040 = vst [vmem:[#allocation21_spill] sm:$0xff] %v5988_v20  ;;  %v5991_v48 = vld [vmem:[#allocation8 + $0x44] ss:$16 sps:$4 sm:$0xff]  }
 0xb95   :  { %7041 = vst [vmem:[#allocation51_spill] sm:$0xff] %v5991_v48 }
 0xb97   :  { %2408 = vmatpush1.bf16.msra.mxu0 %v5538_v12  ;;  %v5994_v12 = vld [vmem:[#allocation8 + $0x40] ss:$16 sps:$4 sm:$0xff]  }
 0xb98   :  { %2409 = vmatprep.subr.bf16.mxu0 %v6975_v60  ;;  %7042 = vst [vmem:[#allocation53_spill] sm:$0xff] %v5994_v12  ;;  %v6015_v60 = vld [vmem:[#allocation8 + $0xc4] ss:$16 sps:$4 sm:$0xff]  }
 0xb99   :  { %7049 = vst [vmem:[#allocation34_spill] sm:$0xff] %v6015_v60 }
 0xb9b   :  { %2410 = vmatpush1.bf16.msra.mxu0 %v6976_v61  ;;  %v6018_v61 = vld [vmem:[#allocation8 + $0xc0] ss:$16 sps:$4 sm:$0xff]  }
 0xb9c   :  { %2411 = vmatprep.subr.bf16.mxu0 %v6977_v56  ;;  %7050 = vst [vmem:[#allocation27_spill] sm:$0xff] %v6018_v61  ;;  %v6021_v56 = vld [vmem:[#allocation8 + $0xe4] ss:$16 sps:$4 sm:$0xff]  }
 0xb9d   :  { %7051 = vst [vmem:[#allocation31_spill] sm:$0xff] %v6021_v56 }
 0xb9f   :  { %2412 = vmatpush1.bf16.msra.mxu0 %v6978_v59  ;;  %v6024_v59 = vld [vmem:[#allocation8 + $0xe0] ss:$16 sps:$4 sm:$0xff]  }
 0xba0   :  { %2413 = vmatprep.subr.bf16.mxu0 %v6979_v42  ;;  %7052 = vst [vmem:[#allocation33_spill] sm:$0xff] %v6024_v59  ;;  %v6027_v42 = vld [vmem:[#allocation8 + $0x104] ss:$16 sps:$4 sm:$0xff]  }
 0xba1   :  { %7053 = vst [vmem:[#allocation37_spill] sm:$0xff] %v6027_v42 }
 0xba3   :  { %2414 = vmatpush1.bf16.msra.mxu0 %v5574_v22  ;;  %v6012_v22 = vld [vmem:[#allocation8 + $0xa0] ss:$16 sps:$4 sm:$0xff]  }
 0xba4   :  { %2415 = vmatprep.subr.bf16.mxu0 %v6980_v0  ;;  %7048 = vst [vmem:[#allocation30_spill] sm:$0xff] %v6012_v22  ;;  %v6030_v0 = vld [vmem:[#allocation8 + $0x100] ss:$16 sps:$4 sm:$0xff]  }
 0xba5   :  { %7054 = vst [vmem:[#allocation32_spill] sm:$0xff] %v6030_v0 }
 0xba7   :  { %2416 = vmatpush1.bf16.msra.mxu0 %v5586_v11  ;;  %v6003_v11 = vld [vmem:[#allocation8 + $0x84] ss:$16 sps:$4 sm:$0xff]  }
 0xba8   :  { %2417 = vmatprep.subr.bf16.mxu0 %v5592_v49  ;;  %v6000_v49 = vld [vmem:[#allocation8 + $0x60] ss:$16 sps:$4 sm:$0xff]   ;;  %7045 = vst [vmem:[#allocation59_spill] sm:$0xff] %v6003_v11 }
 0xba9   :  { %7044 = vst [vmem:[#allocation57_spill] sm:$0xff] %v6000_v49 }
 0xbab   :  { %2418 = vmatpush1.bf16.msra.mxu0 %v5598_v14  ;;  %v5997_v14 = vld [vmem:[#allocation8 + $0x64] ss:$16 sps:$4 sm:$0xff]  }
 0xbac   :  { %2497 = vmatprep.subr.bf16.mxu0 %v5978_v62  ;;  %7043 = vst [vmem:[#allocation55_spill] sm:$0xff] %v5997_v14 }
 0xbae   :  { %2420 = vmatmul.mubr.bf16.vlgmr.msra.gmra.mrb[52].mxu0 %v7037_v28 }
 0xbaf   :  { %2498 = vmatpush1.bf16.msra.mxu0 %v5982_v5 }
 0xbb0   :  { %2499 = vmatprep.subr.bf16.mxu0 %v5985_v52 }
 0xbb3   :  { %2500 = vmatpush1.bf16.msra.mxu0 %v5988_v20 }
 0xbb4   :  { %2501 = vmatprep.subr.bf16.mxu0 %v5991_v48 }
 0xbb7   :  { %2502 = vmatpush1.bf16.msra.mxu0 %v5994_v12 }
 0xbb8   :  { %2503 = vmatprep.subr.bf16.mxu0 %v5997_v14 }
 0xbbb   :  { %2504 = vmatpush1.bf16.msra.mxu0 %v6000_v49 }
 0xbbc   :  { %2505 = vmatprep.subr.bf16.mxu0 %v6003_v11 }
 0xbbf   :  { %2506 = vmatpush1.bf16.msra.mxu0 %v6006_v16 }
 0xbc0   :  { %2507 = vmatprep.subr.bf16.mxu0 %v6009_v17 }
 0xbc3   :  { %2508 = vmatpush1.bf16.msra.mxu0 %v6012_v22 }
 0xbc4   :  { %2509 = vmatprep.subr.bf16.mxu0 %v6015_v60 }
 0xbc7   :  { %2510 = vmatpush1.bf16.msra.mxu0 %v6018_v61 }
 0xbc8   :  { %2511 = vmatprep.subr.bf16.mxu0 %v6021_v56 }
 0xbcb   :  { %2512 = vmatpush1.bf16.msra.mxu0 %v6024_v59 }
 0xbcc   :  { %2513 = vmatprep.subr.bf16.mxu0 %v6027_v42 }
 0xbcf   :  { %2514 = vmatpush1.bf16.msra.mxu0 %v6030_v0 }
 0xbd0   :  { %2515 = vmatprep.subr.bf16.mxu0 %v6033_v53 }
 0xbd3   :  { %2516 = vmatpush1.bf16.msra.mxu0 %v6036_v58 }
 0xbd4   :  { %2517 = vmatprep.subr.bf16.mxu0 %v6039_v54 }
 0xbd7   :  { %2518 = vmatpush1.bf16.msra.mxu0 %v6042_v50 }
 0xbd8   :  { %2519 = vmatprep.subr.bf16.mxu0 %v6045_v43 }
 0xbdb   :  { %2520 = vmatpush1.bf16.msra.mxu0 %v6048_v21 }
 0xbdc   :  { %2521 = vmatprep.subr.bf16.mxu0 %v6051_v27 }
 0xbdf   :  { %2522 = vmatpush1.bf16.msra.mxu0 %v6054_v24 }
 0xbe0   :  { %2523 = vmatprep.subr.bf16.mxu0 %v6057_v3 }
 0xbe3   :  { %2524 = vmatpush1.bf16.msra.mxu0 %v6060_v2 }
 0xbe4   :  { %2525 = vmatprep.subr.bf16.mxu0 %v7033_v23 }
 0xbe7   :  { %2526 = vmatpush1.bf16.msra.mxu0 %v7034_v37 }
 0xbe8   :  { %2527 = vmatprep.subr.bf16.mxu0 %v7035_v31 }
 0xbeb   :  { %2528 = vmatpush1.bf16.msra.mxu0 %v7036_v63 }
 0xbec   :  { %3491 = vmatprep.subr.bf16.mxu0 %v6974_v46 }
 0xc41   :  { %v2336_v55 = vpop.f32.mrb[48].mxu0 }
 0xc42   :  { %v2337_v4 = vadd.f32 %v5792_v45, %v2336_v55  ;;  %v3469_v33 = vpop.f32.mrb[49].mxu0  ;;  %v2380_v41 = vpop.f32.mrb[48].mxu1 }
 0xc43   :  { %v2339_v15 = vpop.f32.mrb[50].mxu0  ;;  %v2382_v51 = vpop.f32.mrb[49].mxu1  ;;  %v2381_v37 = vadd.f32 %v2380_v41, %v5684_v19 }
 0xc44   :  { %2343 = vst [vmem:[#allocation12 + $0x10] sm:$0xff] %v2337_v4  ;;  %v3470_v1 = vpop.f32.mrb[51].mxu0  ;;  %v2384_v6 = vpop.f32.mrb[50].mxu1  ;;  %v2383_v23 = vadd.f32 %v2382_v51, %v5688_v7 }
 0xc45   :  { %v2385_v28 = vpop.f32.mrb[51].mxu1  ;;  %v3324_v2 = vmul.f32 -1.442695, %v2381_v37 }
 0xc46   :  { %v3325_v31 = vmul.f32 -1.442695, %v2383_v23 }
 0xc48   :  { %3963 = vpow2.f32 %v3325_v31 }
 0xc49   :  { %3965 = vpow2.f32 %v3324_v2 }
 0xc52   :  { %v3964_v63 = vpop.eup %3963 }
 0xc53   :  { %v3966_v3 = vpop.eup %3965  ;;  %v2437_v24 = vadd.f32 1.0, %v3964_v63 }
 0xc54   :  { %v2431_v55 = vadd.f32 1.0, %v3966_v3 }
 0xc55   :  { %3967 = vrcp.f32 %v2437_v24 }
 0xc56   :  { %3969 = vrcp.f32 %v2431_v55 }
 0xc5f   :  { %v3968_v28 = vpop.eup %3967 }
 0xc60   :  { %v3970_v23 = vpop.eup %3969  ;;  %v2447_v37 = vmul.f32 %v3968_v28, %v5893_v29  ;;  %v6080_v29 = vld [vmem:[#allocation9] sm:$0xff]  }
 0xc61   :  { %v6106_v28 = vld [vmem:[#allocation9 + $0x20] sm:$0xff]  }
 0xc81   :  { %v2421_v33 = vpop.f32.mrb[52].mxu0 }
 0xc82   :  { %v2422_v15 = vadd.f32 %v2421_v33, %v5699_v35  ;;  %v2423_v4 = vpop.f32.mrb[53].mxu0 }
 0xc83   :  { %v2424_v1 = vadd.f32 %v2423_v4, %v5694_v40  ;;  %v2425_v6 = vpop.f32.mrb[54].mxu0 }
 0xc84   :  { %3971 = vtanh.f32 %v2422_v15  ;;  %v2426_v51 = vpop.f32.mrb[55].mxu0  ;;  %v6088_v6 = vld [vmem:[#allocation9 + $0x8] sm:$0xff]  }
 0xc85   :  { %v3326_v41 = vmul.f32 -1.442695, %v2424_v1  ;;  %v7065_v1 = vld [vmem:[#allocation49_spill] sm:$0xff] }
 0xc86   :  { %v6094_v51 = vld [vmem:[#allocation9 + $0x10] sm:$0xff]  }
 0xc87   :  { %3973 = vpow2.f32 %v3326_v41  ;;  %v6100_v41 = vld [vmem:[#allocation9 + $0x18] sm:$0xff]  }
 0xc8e   :  { %v3972_v2 = vpop.eup %3971 }
 0xc8f   :  { %v2448_v31 = vmul.f32 %v3972_v2, %v3970_v23  ;;  %v6112_v23 = vld [vmem:[#allocation9 + $0x28] sm:$0xff]   ;;  %v6118_v2 = vld [vmem:[#allocation9 + $0x30] sm:$0xff]  }
 0xc91   :  { %v3974_v3 = vpop.eup %3973  ;;  %v6074_v63 = vadd.f32 %v2448_v31, %v2447_v37  ;;  %v6123_v37 = vld [vmem:[#allocation8 + $0x10c] ss:$16 sps:$4 sm:$0xff]  }
 0xc92   :  { %v2444_v24 = vadd.f32 1.0, %v3974_v3  ;;  %v6126_v31 = vld [vmem:[#allocation9 + $0x38] sm:$0xff]  }
 0xc93   :  { %3975 = vtanh.f32 %v6074_v63  ;;  %v6130_v3 = vld [vmem:[#allocation8 + $0x108] ss:$16 sps:$4 sm:$0xff]  }
 0xc94   :  { %3977 = vrcp.f32 %v2444_v24  ;;  %7066 = vst [vmem:[#allocation29_spill] sm:$0xff] %v6130_v3  ;;  %v6133_v24 = vld [vmem:[#allocation8 + $0x12c] ss:$16 sps:$4 sm:$0xff]  }
 0xc95   :  { %7067 = vst [vmem:[#allocation25_spill] sm:$0xff] %v6133_v24 }
 0xc9d   :  { %v3976_v55 = vpop.eup %3975 }
 0xc9e   :  { %v3978_v33 = vpop.eup %3977 }
 0xc9f   :  { %v2451_v4 = vmul.f32 %v3978_v33, %v3976_v55  ;;  %v6136_v55 = vld [vmem:[#allocation8 + $0x128] ss:$16 sps:$4 sm:$0xff]   ;;  %v6139_v33 = vld [vmem:[#allocation8 + $0x14c] ss:$16 sps:$4 sm:$0xff]  }
 0xca0   :  { %7068 = vst [vmem:[#allocation48_spill] sm:$0xff] %v6136_v55  ;;  %7069 = vst [vmem:[#allocation44_spill] sm:$0xff] %v6139_v33 }
 0xca1   :  { %v2452_v15 = vpack.c.bf16 %v2451_v4, %v2451_v4  ;;  %v6142_v4 = vld [vmem:[#allocation8 + $0x148] ss:$16 sps:$4 sm:$0xff]  }
 0xca2   :  { %7070 = vst [vmem:[#allocation50_spill] sm:$0xff] %v6142_v4 }
 0xca3   :  { %3488 = vmatmul.mubr.bf16.vlgmr.msra.gmra.mrb[52].mxu1 %v2452_v15  ;;  %2529 = vmatprep.mubr.bf16.mxu0 %v2452_v15 }
 0xca4   :  { %2539 = vmatpush1.bf16.msra.mxu1 %v5896_v25  ;;  %2530 = vmatmul.mubr.bf16.vlgmr.msra.gmra.mrb[56].mxu0 %v7065_v1 }
 0xca5   :  { %2570 = vmatprep.mubr.bf16.mxu1 %v2452_v15  ;;  %2540 = vmatprep.subr.bf16.mxu1 %v5900_v26  ;;  %v6145_v15 = vld [vmem:[#allocation8 + $0x16c] ss:$16 sps:$4 sm:$0xff]  }
 0xca6   :  { %3492 = vmatpush3.bf16.msra.mxu0 %v6080_v29  ;;  %3507 = vmatprep.mubr.msk.bf16.mxu0 %vm4394_vm0, %v6974_v46  ;;  %7071 = vst [vmem:[#allocation52_spill] sm:$0xff] %v6145_v15 }
 0xca7   :  { %3493 = vmatprep.subr.bf16.mxu0 %v6974_v46 }
 0xca8   :  { %2541 = vmatpush1.bf16.msra.mxu1 %v5907_v30 }
 0xca9   :  { %2542 = vmatprep.subr.bf16.mxu1 %v5910_v32 }
 0xcaa   :  { %3494 = vmatpush3.bf16.msra.mxu0 %v6088_v6 }
 0xcab   :  { %3495 = vmatprep.subr.bf16.mxu0 %v6974_v46 }
 0xcac   :  { %2543 = vmatpush1.bf16.msra.mxu1 %v5915_v39 }
 0xcad   :  { %2544 = vmatprep.subr.bf16.mxu1 %v5918_v8 }
 0xcae   :  { %3496 = vmatpush3.bf16.msra.mxu0 %v6094_v51 }
 0xcaf   :  { %3497 = vmatprep.subr.bf16.mxu0 %v6974_v46 }
 0xcb0   :  { %2545 = vmatpush1.bf16.msra.mxu1 %v5923_v34 }
 0xcb1   :  { %2546 = vmatprep.subr.bf16.mxu1 %v5926_v36 }
 0xcb2   :  { %3498 = vmatpush3.bf16.msra.mxu0 %v6100_v41 }
 0xcb3   :  { %3499 = vmatprep.subr.bf16.mxu0 %v6974_v46 }
 0xcb4   :  { %2547 = vmatpush1.bf16.msra.mxu1 %v5931_v10 }
 0xcb5   :  { %2548 = vmatprep.subr.bf16.mxu1 %v5934_v38 }
 0xcb6   :  { %3500 = vmatpush3.bf16.msra.mxu0 %v6106_v28 }
 0xcb7   :  { %3501 = vmatprep.subr.bf16.mxu0 %v6974_v46 }
 0xcb8   :  { %2549 = vmatpush1.bf16.msra.mxu1 %v5939_v18 }
 0xcb9   :  { %2550 = vmatprep.subr.bf16.mxu1 %v5942_v44 }
 0xcba   :  { %3502 = vmatpush3.bf16.msra.mxu0 %v6112_v23 }
 0xcbb   :  { %3503 = vmatprep.subr.bf16.mxu0 %v6974_v46 }
 0xcbc   :  { %2551 = vmatpush1.bf16.msra.mxu1 %v5947_v13 }
 0xcbd   :  { %2552 = vmatprep.subr.bf16.mxu1 %v5950_v57 }
 0xcbe   :  { %3504 = vmatpush3.bf16.msra.mxu0 %v6118_v2 }
 0xcbf   :  { %3505 = vmatprep.subr.bf16.mxu0 %v6974_v46 }
 0xcc0   :  { %2553 = vmatpush1.bf16.msra.mxu1 %v5955_v9 }
 0xcc1   :  { %2554 = vmatprep.subr.bf16.mxu1 %v6123_v37 }
 0xcc2   :  { %3506 = vmatpush3.bf16.msra.mxu0 %v6126_v31 }
 0xcc3   :  { %2689 = vmatprep.subr.bf16.mxu0 %v5960_v47 }
 0xcc4   :  { %2555 = vmatpush1.bf16.msra.mxu1 %v6130_v3  ;;  %v6148_v3 = vld [vmem:[#allocation8 + $0x168] ss:$16 sps:$4 sm:$0xff]  }
 0xcc5   :  { %2556 = vmatprep.subr.bf16.mxu1 %v6133_v24  ;;  %7072 = vst [vmem:[#allocation54_spill] sm:$0xff] %v6148_v3  ;;  %v6151_v24 = vld [vmem:[#allocation8 + $0x18c] ss:$16 sps:$4 sm:$0xff]  }
 0xcc6   :  { %7073 = vst [vmem:[#allocation56_spill] sm:$0xff] %v6151_v24 }
 0xcc8   :  { %2557 = vmatpush1.bf16.msra.mxu1 %v6136_v55  ;;  %v6154_v55 = vld [vmem:[#allocation8 + $0x188] ss:$16 sps:$4 sm:$0xff]  }
 0xcc9   :  { %2558 = vmatprep.subr.bf16.mxu1 %v6139_v33  ;;  %7074 = vst [vmem:[#allocation58_spill] sm:$0xff] %v6154_v55  ;;  %v6157_v33 = vld [vmem:[#allocation8 + $0x1ac] ss:$16 sps:$4 sm:$0xff]  }
 0xccc   :  { %2559 = vmatpush1.bf16.msra.mxu1 %v6142_v4  ;;  %v6160_v4 = vld [vmem:[#allocation8 + $0x1a8] ss:$16 sps:$4 sm:$0xff]  }
 0xccd   :  { %2560 = vmatprep.subr.bf16.mxu1 %v6145_v15  ;;  %v6163_v15 = vld [vmem:[#allocation8 + $0x1cc] ss:$16 sps:$4 sm:$0xff]  }
 0xcd0   :  { %2561 = vmatpush1.bf16.msra.mxu1 %v6148_v3  ;;  %v6166_v3 = vld [vmem:[#allocation8 + $0x1c8] ss:$16 sps:$4 sm:$0xff]  }
 0xcd1   :  { %2562 = vmatprep.subr.bf16.mxu1 %v6151_v24  ;;  %v6169_v24 = vld [vmem:[#allocation8 + $0x1ec] ss:$16 sps:$4 sm:$0xff]  }
 0xcd4   :  { %2563 = vmatpush1.bf16.msra.mxu1 %v6154_v55  ;;  %v6172_v55 = vld [vmem:[#allocation8 + $0x1e8] ss:$16 sps:$4 sm:$0xff]  }
 0xcd5   :  { %2564 = vmatprep.subr.bf16.mxu1 %v6157_v33 }
 0xcd8   :  { %2565 = vmatpush1.bf16.msra.mxu1 %v6160_v4 }
 0xcd9   :  { %2566 = vmatprep.subr.bf16.mxu1 %v6163_v15 }
 0xcdc   :  { %2567 = vmatpush1.bf16.msra.mxu1 %v6166_v3 }
 0xcdd   :  { %2568 = vmatprep.subr.bf16.mxu1 %v6169_v24 }
 0xce0   :  { %2569 = vmatpush1.bf16.msra.mxu1 %v6172_v55 }
 0xce1   :  { %2648 = vmatprep.subr.bf16.mxu1 %v5978_v62 }
 0xce3   :  { %2571 = vmatmul.mubr.bf16.vlgmr.msra.gmra.mrb[56].mxu1 %v7065_v1  ;;  %v7075_v1 = vld [vmem:[#allocation23_spill] sm:$0xff] }
 0xce4   :  { %2649 = vmatpush1.bf16.msra.mxu1 %v5982_v5 }
 0xce5   :  { %2650 = vmatprep.subr.bf16.mxu1 %v5985_v52 }
 0xce8   :  { %2651 = vmatpush1.bf16.msra.mxu1 %v5988_v20 }
 0xce9   :  { %2652 = vmatprep.subr.bf16.mxu1 %v5991_v48 }
 0xcec   :  { %2653 = vmatpush1.bf16.msra.mxu1 %v5994_v12 }
 0xced   :  { %2654 = vmatprep.subr.bf16.mxu1 %v5997_v14 }
 0xcf0   :  { %2655 = vmatpush1.bf16.msra.mxu1 %v6000_v49 }
 0xcf1   :  { %2656 = vmatprep.subr.bf16.mxu1 %v6003_v11 }
 0xcf4   :  { %2657 = vmatpush1.bf16.msra.mxu1 %v6006_v16 }
 0xcf5   :  { %2658 = vmatprep.subr.bf16.mxu1 %v6009_v17 }
 0xcf8   :  { %2659 = vmatpush1.bf16.msra.mxu1 %v6012_v22 }
 0xcf9   :  { %2660 = vmatprep.subr.bf16.mxu1 %v6015_v60 }
 0xcfc   :  { %2661 = vmatpush1.bf16.msra.mxu1 %v6018_v61 }
 0xcfd   :  { %2662 = vmatprep.subr.bf16.mxu1 %v6021_v56 }
 0xd00   :  { %2663 = vmatpush1.bf16.msra.mxu1 %v6024_v59  ;;  %v7076_v59 = vld [vmem:[#allocation26_spill] sm:$0xff] }
 0xd01   :  { %2664 = vmatprep.subr.bf16.mxu1 %v6027_v42  ;;  %v7077_v42 = vld [vmem:[#allocation24_spill] sm:$0xff] }
 0xd04   :  { %2665 = vmatpush1.bf16.msra.mxu1 %v6030_v0  ;;  %v6204_v0 = vld [vmem:[#allocation8 + $0x1c4] ss:$16 sps:$4 sm:$0xff]  }
 0xd05   :  { %2666 = vmatprep.subr.bf16.mxu1 %v6033_v53  ;;  %7078 = vst [vmem:[#allocation60_spill] sm:$0xff] %v6204_v0 }
 0xd08   :  { %2667 = vmatpush1.bf16.msra.mxu1 %v6036_v58  ;;  %v6207_v58 = vld [vmem:[#allocation8 + $0x1c0] ss:$16 sps:$4 sm:$0xff]  }
 0xd09   :  { %2668 = vmatprep.subr.bf16.mxu1 %v6039_v54  ;;  %7079 = vst [vmem:[#allocation61_spill] sm:$0xff] %v6207_v58 }
 0xd0c   :  { %2669 = vmatpush1.bf16.msra.mxu1 %v6042_v50  ;;  %v6210_v50 = vld [vmem:[#allocation8 + $0x1e4] ss:$16 sps:$4 sm:$0xff]  }
 0xd0d   :  { %2670 = vmatprep.subr.bf16.mxu1 %v6045_v43  ;;  %7080 = vst [vmem:[#allocation63_spill] sm:$0xff] %v6210_v50 }
 0xd10   :  { %2671 = vmatpush1.bf16.msra.mxu1 %v6048_v21  ;;  %v6213_v21 = vld [vmem:[#allocation8 + $0x1e0] ss:$16 sps:$4 sm:$0xff]  }
 0xd11   :  { %2672 = vmatprep.subr.bf16.mxu1 %v6051_v27  ;;  %7081 = vst [vmem:[#allocation64_spill] sm:$0xff] %v6213_v21 }
 0xd14   :  { %2673 = vmatpush1.bf16.msra.mxu1 %v7075_v1 }
 0xd15   :  { %2674 = vmatprep.subr.bf16.mxu1 %v7076_v59 }
 0xd18   :  { %2675 = vmatpush1.bf16.msra.mxu1 %v7077_v42 }
 0xd19   :  { %2676 = vmatprep.subr.bf16.mxu1 %v6204_v0 }
 0xd1c   :  { %2677 = vmatpush1.bf16.msra.mxu1 %v6207_v58 }
 0xd1d   :  { %2678 = vmatprep.subr.bf16.mxu1 %v6210_v50 }
 0xd20   :  { %2679 = vmatpush1.bf16.msra.mxu1 %v6213_v21 }
 0xd21   :  { %3511 = vmatprep.subr.bf16.mxu1 %v6974_v46 }
 0xd76   :  { %v2487_v59 = vpop.f32.mrb[52].mxu1 }
 0xd77   :  { %v2488_v42 = vadd.f32 %v5792_v45, %v2487_v59  ;;  %v3489_v1 = vpop.f32.mrb[53].mxu1  ;;  %v2531_v27 = vpop.f32.mrb[56].mxu0 }
 0xd78   :  { %v2490_v0 = vpop.f32.mrb[54].mxu1  ;;  %v2533_v43 = vpop.f32.mrb[57].mxu0  ;;  %v2532_v50 = vadd.f32 %v2531_v27, %v5684_v19 }
 0xd79   :  { %2494 = vst [vmem:[#allocation12 + $0x18] sm:$0xff] %v2488_v42  ;;  %v3490_v54 = vpop.f32.mrb[55].mxu1  ;;  %v2535_v58 = vpop.f32.mrb[58].mxu0  ;;  %v2534_v56 = vadd.f32 %v2533_v43, %v5688_v7 }
 0xd7a   :  { %v2536_v53 = vpop.f32.mrb[59].mxu0  ;;  %v3327_v60 = vmul.f32 -1.442695, %v2532_v50 }
 0xd7b   :  { %v3328_v61 = vmul.f32 -1.442695, %v2534_v56 }
 0xd7d   :  { %3979 = vpow2.f32 %v3328_v61 }
 0xd7e   :  { %3981 = vpow2.f32 %v3327_v60 }
 0xd87   :  { %v3980_v21 = vpop.eup %3979 }
 0xd88   :  { %v3982_v22 = vpop.eup %3981  ;;  %v2588_v17 = vadd.f32 1.0, %v3980_v21 }
 0xd89   :  { %v2582_v45 = vadd.f32 1.0, %v3982_v22 }
 0xd8a   :  { %3983 = vrcp.f32 %v2588_v17 }
 0xd8b   :  { %3985 = vrcp.f32 %v2582_v45 }
 0xd94   :  { %v3984_v56 = vpop.eup %3983 }
 0xd95   :  { %v3986_v61 = vpop.eup %3985  ;;  %v2598_v50 = vmul.f32 %v3984_v56, %v6074_v63  ;;  %v7083_v63 = vld [vmem:[#allocation29_spill] sm:$0xff]  ;;  %v7088_v56 = vld [vmem:[#allocation52_spill] sm:$0xff] }
 0xdb6   :  { %v2572_v59 = vpop.f32.mrb[56].mxu1 }
 0xdb7   :  { %v2573_v0 = vadd.f32 %v2572_v59, %v5699_v35  ;;  %v2574_v42 = vpop.f32.mrb[57].mxu1 }
 0xdb8   :  { %v2575_v53 = vadd.f32 %v2574_v42, %v5694_v40  ;;  %v2576_v58 = vpop.f32.mrb[58].mxu1  ;;  %v7082_v42 = vld [vmem:[#allocation22_spill] sm:$0xff] }
 0xdb9   :  { %3987 = vtanh.f32 %v2573_v0  ;;  %v2577_v54 = vpop.f32.mrb[59].mxu1  ;;  %v7085_v58 = vld [vmem:[#allocation48_spill] sm:$0xff] }
 0xdba   :  { %v3329_v43 = vmul.f32 -1.442695, %v2575_v53  ;;  %v7084_v53 = vld [vmem:[#allocation25_spill] sm:$0xff]  ;;  %v7086_v54 = vld [vmem:[#allocation44_spill] sm:$0xff] }
 0xdbc   :  { %3989 = vpow2.f32 %v3329_v43  ;;  %v7087_v43 = vld [vmem:[#allocation50_spill] sm:$0xff] }
 0xdc3   :  { %v3988_v60 = vpop.eup %3987 }
 0xdc4   :  { %v2599_v21 = vmul.f32 %v3988_v60, %v3986_v61  ;;  %v7089_v61 = vld [vmem:[#allocation54_spill] sm:$0xff]  ;;  %v7090_v60 = vld [vmem:[#allocation56_spill] sm:$0xff] }
 0xdc6   :  { %v3990_v22 = vpop.eup %3989  ;;  %v6223_v27 = vadd.f32 %v2599_v21, %v2598_v50  ;;  %v7091_v50 = vld [vmem:[#allocation58_spill] sm:$0xff] }
 0xdc7   :  { %v2595_v17 = vadd.f32 1.0, %v3990_v22  ;;  %v7092_v21 = vld [vmem:[#allocation46_spill] sm:$0xff] }
 0xdc8   :  { %3991 = vtanh.f32 %v6223_v27  ;;  %v7093_v22 = vld [vmem:[#allocation30_spill] sm:$0xff] }
 0xdc9   :  { %3993 = vrcp.f32 %v2595_v17  ;;  %v7094_v17 = vld [vmem:[#allocation34_spill] sm:$0xff] }
 0xdd2   :  { %v3992_v1 = vpop.eup %3991 }
 0xdd3   :  { %v3994_v45 = vpop.eup %3993 }
 0xdd4   :  { %v2602_v59 = vmul.f32 %v3994_v45, %v3992_v1  ;;  %v7095_v1 = vld [vmem:[#allocation27_spill] sm:$0xff] }
 0xdd5   :  { %v7096_v45 = vld [vmem:[#allocation31_spill] sm:$0xff] }
 0xdd6   :  { %v2603_v0 = vpack.c.bf16 %v2602_v59, %v2602_v59  ;;  %v7097_v59 = vld [vmem:[#allocation33_spill] sm:$0xff] }
 0xdd8   :  { %3508 = vmatmul.mubr.bf16.vlgmr.msra.gmra.mrb[60].mxu0 %v2603_v0  ;;  %2680 = vmatprep.mubr.bf16.mxu1 %v2603_v0 }
 0xdd9   :  { %2690 = vmatpush1.bf16.msra.mxu0 %v5896_v25  ;;  %2681 = vmatmul.mubr.bf16.vlgmr.msra.gmra.mrb[60].mxu1 %v7082_v42 }
 0xdda   :  { %2721 = vmatprep.mubr.bf16.mxu0 %v2603_v0  ;;  %2691 = vmatprep.subr.bf16.mxu0 %v5900_v26  ;;  %v7098_v0 = vld [vmem:[#allocation37_spill] sm:$0xff] }
 0xddb   :  { %3512 = vmatpush3.bf16.msra.mxu1 %v6080_v29  ;;  %3527 = vmatprep.mubr.msk.bf16.mxu1 %vm4394_vm0, %v6974_v46 }
 0xddc   :  { %3513 = vmatprep.subr.bf16.mxu1 %v6974_v46 }
 0xddd   :  { %2692 = vmatpush1.bf16.msra.mxu0 %v5907_v30 }
 0xdde   :  { %2693 = vmatprep.subr.bf16.mxu0 %v5910_v32 }
 0xddf   :  { %3514 = vmatpush3.bf16.msra.mxu1 %v6088_v6 }
 0xde0   :  { %3515 = vmatprep.subr.bf16.mxu1 %v6974_v46 }
 0xde1   :  { %2694 = vmatpush1.bf16.msra.mxu0 %v5915_v39 }
 0xde2   :  { %2695 = vmatprep.subr.bf16.mxu0 %v5918_v8 }
 0xde3   :  { %3516 = vmatpush3.bf16.msra.mxu1 %v6094_v51 }
 0xde4   :  { %3517 = vmatprep.subr.bf16.mxu1 %v6974_v46 }
 0xde5   :  { %2696 = vmatpush1.bf16.msra.mxu0 %v5923_v34 }
 0xde6   :  { %2697 = vmatprep.subr.bf16.mxu0 %v5926_v36 }
 0xde7   :  { %3518 = vmatpush3.bf16.msra.mxu1 %v6100_v41 }
 0xde8   :  { %3519 = vmatprep.subr.bf16.mxu1 %v6974_v46 }
 0xde9   :  { %2698 = vmatpush1.bf16.msra.mxu0 %v5931_v10 }
 0xdea   :  { %2699 = vmatprep.subr.bf16.mxu0 %v5934_v38 }
 0xdeb   :  { %3520 = vmatpush3.bf16.msra.mxu1 %v6106_v28 }
 0xdec   :  { %3521 = vmatprep.subr.bf16.mxu1 %v6974_v46 }
 0xded   :  { %2700 = vmatpush1.bf16.msra.mxu0 %v5939_v18 }
 0xdee   :  { %2701 = vmatprep.subr.bf16.mxu0 %v5942_v44 }
 0xdef   :  { %3522 = vmatpush3.bf16.msra.mxu1 %v6112_v23 }
 0xdf0   :  { %3523 = vmatprep.subr.bf16.mxu1 %v6974_v46 }
 0xdf1   :  { %2702 = vmatpush1.bf16.msra.mxu0 %v5947_v13 }
 0xdf2   :  { %2703 = vmatprep.subr.bf16.mxu0 %v5950_v57 }
 0xdf3   :  { %3524 = vmatpush3.bf16.msra.mxu1 %v6118_v2 }
 0xdf4   :  { %3525 = vmatprep.subr.bf16.mxu1 %v6974_v46 }
 0xdf5   :  { %2704 = vmatpush1.bf16.msra.mxu0 %v5955_v9 }
 0xdf6   :  { %2705 = vmatprep.subr.bf16.mxu0 %v6123_v37 }
 0xdf7   :  { %3526 = vmatpush3.bf16.msra.mxu1 %v6126_v31 }
 0xdf8   :  { %2840 = vmatprep.subr.bf16.mxu1 %v5960_v47 }
 0xdf9   :  { %2706 = vmatpush1.bf16.msra.mxu0 %v7083_v63 }
 0xdfa   :  { %2707 = vmatprep.subr.bf16.mxu0 %v7084_v53 }
 0xdfd   :  { %2708 = vmatpush1.bf16.msra.mxu0 %v7085_v58 }
 0xdfe   :  { %2709 = vmatprep.subr.bf16.mxu0 %v7086_v54 }
 0xe01   :  { %2710 = vmatpush1.bf16.msra.mxu0 %v7087_v43 }
 0xe02   :  { %2711 = vmatprep.subr.bf16.mxu0 %v7088_v56 }
 0xe05   :  { %2712 = vmatpush1.bf16.msra.mxu0 %v7089_v61 }
 0xe06   :  { %2713 = vmatprep.subr.bf16.mxu0 %v7090_v60 }
 0xe09   :  { %2714 = vmatpush1.bf16.msra.mxu0 %v7091_v50 }
 0xe0a   :  { %2715 = vmatprep.subr.bf16.mxu0 %v6157_v33 }
 0xe0d   :  { %2716 = vmatpush1.bf16.msra.mxu0 %v6160_v4 }
 0xe0e   :  { %2717 = vmatprep.subr.bf16.mxu0 %v6163_v15 }
 0xe11   :  { %2718 = vmatpush1.bf16.msra.mxu0 %v6166_v3 }
 0xe12   :  { %2719 = vmatprep.subr.bf16.mxu0 %v6169_v24 }
 0xe15   :  { %2720 = vmatpush1.bf16.msra.mxu0 %v6172_v55 }
 0xe16   :  { %2799 = vmatprep.subr.bf16.mxu0 %v5978_v62 }
 0xe18   :  { %2722 = vmatmul.mubr.bf16.vlgmr.msra.gmra.mrb[64].mxu0 %v7082_v42  ;;  %v7099_v42 = vld [vmem:[#allocation32_spill] sm:$0xff] }
 0xe19   :  { %2800 = vmatpush1.bf16.msra.mxu0 %v5982_v5 }
 0xe1a   :  { %2801 = vmatprep.subr.bf16.mxu0 %v5985_v52 }
 0xe1d   :  { %2802 = vmatpush1.bf16.msra.mxu0 %v5988_v20 }
 0xe1e   :  { %2803 = vmatprep.subr.bf16.mxu0 %v5991_v48 }
 0xe21   :  { %2804 = vmatpush1.bf16.msra.mxu0 %v5994_v12 }
 0xe22   :  { %2805 = vmatprep.subr.bf16.mxu0 %v5997_v14 }
 0xe25   :  { %2806 = vmatpush1.bf16.msra.mxu0 %v6000_v49  ;;  %v7100_v49 = vld [vmem:[#allocation38_spill] sm:$0xff] }
 0xe26   :  { %2807 = vmatprep.subr.bf16.mxu0 %v6003_v11  ;;  %v7101_v11 = vld [vmem:[#allocation35_spill] sm:$0xff] }
 0xe29   :  { %2808 = vmatpush1.bf16.msra.mxu0 %v6006_v16  ;;  %v7102_v16 = vld [vmem:[#allocation40_spill] sm:$0xff] }
 0xe2a   :  { %2809 = vmatprep.subr.bf16.mxu0 %v7092_v21  ;;  %v7103_v21 = vld [vmem:[#allocation36_spill] sm:$0xff] }
 0xe2d   :  { %2810 = vmatpush1.bf16.msra.mxu0 %v7093_v22  ;;  %v7104_v22 = vld [vmem:[#allocation41_spill] sm:$0xff] }
 0xe2e   :  { %2811 = vmatprep.subr.bf16.mxu0 %v7094_v17  ;;  %v7105_v17 = vld [vmem:[#allocation39_spill] sm:$0xff] }
 0xe31   :  { %2812 = vmatpush1.bf16.msra.mxu0 %v7095_v1  ;;  %v7106_v1 = vld [vmem:[#allocation42_spill] sm:$0xff] }
 0xe32   :  { %2813 = vmatprep.subr.bf16.mxu0 %v7096_v45  ;;  %v7107_v45 = vld [vmem:[#allocation23_spill] sm:$0xff] }
 0xe35   :  { %2814 = vmatpush1.bf16.msra.mxu0 %v7097_v59  ;;  %v7108_v59 = vld [vmem:[#allocation26_spill] sm:$0xff] }
 0xe36   :  { %2815 = vmatprep.subr.bf16.mxu0 %v7098_v0  ;;  %v7109_v0 = vld [vmem:[#allocation24_spill] sm:$0xff] }
 0xe39   :  { %2816 = vmatpush1.bf16.msra.mxu0 %v7099_v42  ;;  %v7110_v42 = vld [vmem:[#allocation60_spill] sm:$0xff] }
 0xe3a   :  { %2817 = vmatprep.subr.bf16.mxu0 %v7100_v49  ;;  %v7111_v49 = vld [vmem:[#allocation61_spill] sm:$0xff] }
 0xe3d   :  { %2818 = vmatpush1.bf16.msra.mxu0 %v7101_v11  ;;  %v7112_v11 = vld [vmem:[#allocation63_spill] sm:$0xff] }
 0xe3e   :  { %2819 = vmatprep.subr.bf16.mxu0 %v7102_v16  ;;  %v7113_v16 = vld [vmem:[#allocation64_spill] sm:$0xff] }
 0xe41   :  { %2820 = vmatpush1.bf16.msra.mxu0 %v7103_v21 }
 0xe42   :  { %2821 = vmatprep.subr.bf16.mxu0 %v7104_v22 }
 0xe45   :  { %2822 = vmatpush1.bf16.msra.mxu0 %v7105_v17 }
 0xe46   :  { %2823 = vmatprep.subr.bf16.mxu0 %v7106_v1  ;;  %v6313_v1 = vld [vmem:[%s6512_s6] ss:$0 sm:$0xff]  ;;  %s4395_s6 = smov [#allocation13]  }
 0xe47   :  { %s3120_s0 = sshll.u32 %s4395_s6, 4  ;;  %s3121_s0 = int_to_ptr.vmem [resolvable:$true] %s3120_s0 }
 0xe48   :  { %s4306_s26 = scalar_lea.vmem %s3121_s0, 256  ;;  %p4311_p13 = scmp.lt.s32.totalorder %s3121_s0, %s3121_s0 }
 0xe49   :  { %2824 = vmatpush1.bf16.msra.mxu0 %v7107_v45  ;;  %p4307_p12 = scmp.ne.s32.totalorder %s3121_s0, %s4306_s26  ;;  %p4312_p0 = scmp.lt.s32.totalorder %s4306_s26, %s4306_s26 }
 0xe4a   :  { %2825 = vmatprep.subr.bf16.mxu0 %v7108_v59 }
 0xe4b   :  { %p4313_p1 = por %p4312_p0, %p4311_p13 }
 0xe4d   :  { %2826 = vmatpush1.bf16.msra.mxu0 %v7109_v0  ;;  %p4314_p2 = pnand %p4313_p1, %p4307_p12 }
 0xe4e   :  { %2827 = vmatprep.subr.bf16.mxu0 %v7110_v42 }
 0xe51   :  { %2828 = vmatpush1.bf16.msra.mxu0 %v7111_v49 }
 0xe52   :  { %2829 = vmatprep.subr.bf16.mxu0 %v7112_v11 }
 0xe55   :  { %2830 = vmatpush1.bf16.msra.mxu0 %v7113_v16 }
 0xe56   :  { %3531 = vmatprep.subr.bf16.mxu0 %v6974_v46 }
 0xeab   :  { %v2638_v22 = vpop.f32.mrb[60].mxu0 }
 0xeac   :  { %v2639_v59 = vadd.f32 %v6313_v1, %v2638_v22  ;;  %v3509_v45 = vpop.f32.mrb[61].mxu0  ;;  %v2682_v0 = vpop.f32.mrb[60].mxu1 }
 0xead   :  { %v2641_v17 = vpop.f32.mrb[62].mxu0  ;;  %v2684_v42 = vpop.f32.mrb[61].mxu1  ;;  %v2683_v14 = vadd.f32 %v2682_v0, %v5684_v19 }
 0xeae   :  { %2645 = vst [vmem:[#allocation12 + $0x20] sm:$0xff] %v2639_v59  ;;  %v3510_v49 = vpop.f32.mrb[63].mxu0  ;;  %v2686_v21 = vpop.f32.mrb[62].mxu1  ;;  %v2685_v16 = vadd.f32 %v2684_v42, %v5688_v7 }
 0xeaf   :  { %v2687_v11 = vpop.f32.mrb[63].mxu1  ;;  %v3330_v48 = vmul.f32 -1.442695, %v2683_v14 }
 0xeb0   :  { %v3331_v12 = vmul.f32 -1.442695, %v2685_v16 }
 0xeb2   :  { %3995 = vpow2.f32 %v3331_v12 }
 0xeb3   :  { %3997 = vpow2.f32 %v3330_v48 }
 0xebc   :  { %v3996_v20 = vpop.eup %3995 }
 0xebd   :  { %v3998_v52 = vpop.eup %3997  ;;  %v2739_v5 = vadd.f32 1.0, %v3996_v20 }
 0xebe   :  { %v2733_v22 = vadd.f32 1.0, %v3998_v52 }
 0xebf   :  { %3999 = vrcp.f32 %v2739_v5 }
 0xec0   :  { %4001 = vrcp.f32 %v2733_v22 }
 0xec9   :  { %v4000_v14 = vpop.eup %3999 }
 0xeca   :  { %v4002_v12 = vpop.eup %4001  ;;  %v2749_v16 = vmul.f32 %v4000_v14, %v6223_v27  ;;  %v7132_v27 = vld [vmem:[#allocation38_spill] sm:$0xff]  ;;  %v7136_v14 = vld [vmem:[#allocation41_spill] sm:$0xff] }
 0xeeb   :  { %v2723_v45 = vpop.f32.mrb[64].mxu0 }
 0xeec   :  { %v2724_v17 = vadd.f32 %v2723_v45, %v5699_v35  ;;  %v2725_v59 = vpop.f32.mrb[65].mxu0 }
 0xeed   :  { %v2726_v49 = vadd.f32 %v2725_v59, %v5694_v40  ;;  %v2727_v11 = vpop.f32.mrb[66].mxu0 }
 0xeee   :  { %4003 = vtanh.f32 %v2724_v17  ;;  %v2728_v21 = vpop.f32.mrb[67].mxu0  ;;  %v7133_v11 = vld [vmem:[#allocation35_spill] sm:$0xff] }
 0xeef   :  { %v3332_v0 = vmul.f32 -1.442695, %v2726_v49  ;;  %v7114_v49 = vld [vmem:[#allocation45_spill] sm:$0xff]  ;;  %v7134_v21 = vld [vmem:[#allocation40_spill] sm:$0xff] }
 0xef1   :  { %4005 = vpow2.f32 %v3332_v0  ;;  %v7135_v0 = vld [vmem:[#allocation36_spill] sm:$0xff] }
 0xef8   :  { %v4004_v48 = vpop.eup %4003 }
 0xef9   :  { %v2750_v20 = vmul.f32 %v4004_v48, %v4002_v12  ;;  %v7137_v12 = vld [vmem:[#allocation39_spill] sm:$0xff]  ;;  %v7138_v48 = vld [vmem:[#allocation42_spill] sm:$0xff] }
 0xefb   :  { %v4006_v52 = vpop.eup %4005  ;;  %v6321_v42 = vadd.f32 %v2750_v20, %v2749_v16  ;;  %v7139_v16 = vld [vmem:[#allocation23_spill] sm:$0xff]  ;;  %v7140_v20 = vld [vmem:[#allocation26_spill] sm:$0xff] }
 0xefc   :  { %v2746_v5 = vadd.f32 1.0, %v4006_v52  ;;  %v7141_v52 = vld [vmem:[#allocation24_spill] sm:$0xff] }
 0xefd   :  { %4007 = vtanh.f32 %v6321_v42 }
 0xefe   :  { %4009 = vrcp.f32 %v2746_v5  ;;  %v7142_v5 = vld [vmem:[#allocation60_spill] sm:$0xff] }
 0xf07   :  { %v4008_v22 = vpop.eup %4007 }
 0xf08   :  { %v4010_v45 = vpop.eup %4009 }
 0xf09   :  { %v2753_v59 = vmul.f32 %v4010_v45, %v4008_v22  ;;  %v7143_v22 = vld [vmem:[#allocation61_spill] sm:$0xff]  ;;  %v7144_v45 = vld [vmem:[#allocation63_spill] sm:$0xff] }
 0xf0b   :  { %v2754_v17 = vpack.c.bf16 %v2753_v59, %v2753_v59  ;;  %v7145_v59 = vld [vmem:[#allocation64_spill] sm:$0xff] }
 0xf0d   :  { %3528 = vmatmul.mubr.bf16.vlgmr.msra.gmra.mrb[64].mxu1 %v2754_v17  ;;  %2831 = vmatprep.mubr.bf16.mxu0 %v2754_v17 }
 0xf0e   :  { %2841 = vmatpush1.bf16.msra.mxu1 %v5896_v25  ;;  %2832 = vmatmul.mubr.bf16.vlgmr.msra.gmra.mrb[68].mxu0 %v7114_v49  ;;  %v7115_v25 = vld [vmem:[#allocation47_spill] sm:$0xff] }
 0xf0f   :  { %2872 = vmatprep.mubr.bf16.mxu1 %v2754_v17  ;;  %2842 = vmatprep.subr.bf16.mxu1 %v5900_v26  ;;  %v7116_v26 = vld [vmem:[#allocation43_spill] sm:$0xff] }
 0xf10   :  { %3532 = vmatpush3.bf16.msra.mxu0 %v6080_v29  ;;  %3547 = vmatprep.mubr.msk.bf16.mxu0 %vm4394_vm0, %v6974_v46 }
 0xf11   :  { %3533 = vmatprep.subr.bf16.mxu0 %v6974_v46 }
 0xf12   :  { %2843 = vmatpush1.bf16.msra.mxu1 %v5907_v30  ;;  %v7117_v30 = vld [vmem:[#allocation21_spill] sm:$0xff] }
 0xf13   :  { %2844 = vmatprep.subr.bf16.mxu1 %v5910_v32  ;;  %v7118_v32 = vld [vmem:[#allocation51_spill] sm:$0xff] }
 0xf14   :  { %3534 = vmatpush3.bf16.msra.mxu0 %v6088_v6 }
 0xf15   :  { %3535 = vmatprep.subr.bf16.mxu0 %v6974_v46 }
 0xf16   :  { %2845 = vmatpush1.bf16.msra.mxu1 %v5915_v39  ;;  %v7119_v39 = vld [vmem:[#allocation53_spill] sm:$0xff] }
 0xf17   :  { %2846 = vmatprep.subr.bf16.mxu1 %v5918_v8  ;;  %v7120_v8 = vld [vmem:[#allocation55_spill] sm:$0xff] }
 0xf18   :  { %3536 = vmatpush3.bf16.msra.mxu0 %v6094_v51 }
 0xf19   :  { %3537 = vmatprep.subr.bf16.mxu0 %v6974_v46 }
 0xf1a   :  { %2847 = vmatpush1.bf16.msra.mxu1 %v5923_v34  ;;  %v7121_v34 = vld [vmem:[#allocation57_spill] sm:$0xff] }
 0xf1b   :  { %2848 = vmatprep.subr.bf16.mxu1 %v5926_v36  ;;  %v7122_v36 = vld [vmem:[#allocation59_spill] sm:$0xff] }
 0xf1c   :  { %3538 = vmatpush3.bf16.msra.mxu0 %v6100_v41 }
 0xf1d   :  { %3539 = vmatprep.subr.bf16.mxu0 %v6974_v46 }
 0xf1e   :  { %2849 = vmatpush1.bf16.msra.mxu1 %v5931_v10  ;;  %v7123_v10 = vld [vmem:[#allocation62_spill] sm:$0xff] }
 0xf1f   :  { %2850 = vmatprep.subr.bf16.mxu1 %v5934_v38  ;;  %v7124_v38 = vld [vmem:[#allocation46_spill] sm:$0xff] }
 0xf20   :  { %3540 = vmatpush3.bf16.msra.mxu0 %v6106_v28 }
 0xf21   :  { %3541 = vmatprep.subr.bf16.mxu0 %v6974_v46 }
 0xf22   :  { %2851 = vmatpush1.bf16.msra.mxu1 %v5939_v18  ;;  %v7125_v18 = vld [vmem:[#allocation30_spill] sm:$0xff] }
 0xf23   :  { %2852 = vmatprep.subr.bf16.mxu1 %v5942_v44  ;;  %v7126_v44 = vld [vmem:[#allocation34_spill] sm:$0xff] }
 0xf24   :  { %3542 = vmatpush3.bf16.msra.mxu0 %v6112_v23 }
 0xf25   :  { %3543 = vmatprep.subr.bf16.mxu0 %v6974_v46 }
 0xf26   :  { %2853 = vmatpush1.bf16.msra.mxu1 %v5947_v13  ;;  %v7127_v13 = vld [vmem:[#allocation27_spill] sm:$0xff] }
 0xf27   :  { %2854 = vmatprep.subr.bf16.mxu1 %v5950_v57  ;;  %v7128_v57 = vld [vmem:[#allocation31_spill] sm:$0xff] }
 0xf28   :  { %3544 = vmatpush3.bf16.msra.mxu0 %v6118_v2 }
 0xf29   :  { %3545 = vmatprep.subr.bf16.mxu0 %v6974_v46 }
 0xf2a   :  { %2855 = vmatpush1.bf16.msra.mxu1 %v5955_v9  ;;  %v7129_v9 = vld [vmem:[#allocation33_spill] sm:$0xff] }
 0xf2b   :  { %2856 = vmatprep.subr.bf16.mxu1 %v6123_v37 }
 0xf2c   :  { %3546 = vmatpush3.bf16.msra.mxu0 %v6126_v31 }
 0xf2d   :  { %2991 = vmatprep.subr.bf16.mxu0 %v5960_v47  ;;  %v7130_v47 = vld [vmem:[#allocation37_spill] sm:$0xff] }
 0xf2e   :  { %2857 = vmatpush1.bf16.msra.mxu1 %v7083_v63 }
 0xf2f   :  { %2858 = vmatprep.subr.bf16.mxu1 %v7084_v53 }
 0xf32   :  { %2859 = vmatpush1.bf16.msra.mxu1 %v7085_v58 }
 0xf33   :  { %2860 = vmatprep.subr.bf16.mxu1 %v7086_v54 }
 0xf36   :  { %2861 = vmatpush1.bf16.msra.mxu1 %v7087_v43 }
 0xf37   :  { %2862 = vmatprep.subr.bf16.mxu1 %v7088_v56 }
 0xf3a   :  { %2863 = vmatpush1.bf16.msra.mxu1 %v7089_v61 }
 0xf3b   :  { %2864 = vmatprep.subr.bf16.mxu1 %v7090_v60 }
 0xf3e   :  { %2865 = vmatpush1.bf16.msra.mxu1 %v7091_v50 }
 0xf3f   :  { %2866 = vmatprep.subr.bf16.mxu1 %v6157_v33 }
 0xf42   :  { %2867 = vmatpush1.bf16.msra.mxu1 %v6160_v4 }
 0xf43   :  { %2868 = vmatprep.subr.bf16.mxu1 %v6163_v15 }
 0xf46   :  { %2869 = vmatpush1.bf16.msra.mxu1 %v6166_v3 }
 0xf47   :  { %2870 = vmatprep.subr.bf16.mxu1 %v6169_v24 }
 0xf4a   :  { %2871 = vmatpush1.bf16.msra.mxu1 %v6172_v55 }
 0xf4b   :  { %2950 = vmatprep.subr.bf16.mxu1 %v5978_v62  ;;  %v7131_v62 = vld [vmem:[#allocation32_spill] sm:$0xff] }
 0xf4d   :  { %2873 = vmatmul.mubr.bf16.vlgmr.msra.gmra.mrb[68].mxu1 %v7114_v49 }
 0xf4e   :  { %2951 = vmatpush1.bf16.msra.mxu1 %v7115_v25 }
 0xf4f   :  { %2952 = vmatprep.subr.bf16.mxu1 %v7116_v26 }
 0xf52   :  { %2953 = vmatpush1.bf16.msra.mxu1 %v7117_v30 }
 0xf53   :  { %2954 = vmatprep.subr.bf16.mxu1 %v7118_v32 }
 0xf56   :  { %2955 = vmatpush1.bf16.msra.mxu1 %v7119_v39 }
 0xf57   :  { %2956 = vmatprep.subr.bf16.mxu1 %v7120_v8 }
 0xf5a   :  { %2957 = vmatpush1.bf16.msra.mxu1 %v7121_v34 }
 0xf5b   :  { %2958 = vmatprep.subr.bf16.mxu1 %v7122_v36 }
 0xf5e   :  { %2959 = vmatpush1.bf16.msra.mxu1 %v7123_v10 }
 0xf5f   :  { %2960 = vmatprep.subr.bf16.mxu1 %v7124_v38 }
 0xf62   :  { %2961 = vmatpush1.bf16.msra.mxu1 %v7125_v18 }
 0xf63   :  { %2962 = vmatprep.subr.bf16.mxu1 %v7126_v44 }
 0xf66   :  { %2963 = vmatpush1.bf16.msra.mxu1 %v7127_v13 }
 0xf67   :  { %2964 = vmatprep.subr.bf16.mxu1 %v7128_v57 }
 0xf6a   :  { %2965 = vmatpush1.bf16.msra.mxu1 %v7129_v9 }
 0xf6b   :  { %2966 = vmatprep.subr.bf16.mxu1 %v7130_v47 }
 0xf6e   :  { %2967 = vmatpush1.bf16.msra.mxu1 %v7131_v62 }
 0xf6f   :  { %2968 = vmatprep.subr.bf16.mxu1 %v7132_v27 }
 0xf72   :  { %2969 = vmatpush1.bf16.msra.mxu1 %v7133_v11 }
 0xf73   :  { %2970 = vmatprep.subr.bf16.mxu1 %v7134_v21 }
 0xf76   :  { %2971 = vmatpush1.bf16.msra.mxu1 %v7135_v0 }
 0xf77   :  { %2972 = vmatprep.subr.bf16.mxu1 %v7136_v14 }
 0xf7a   :  { %2973 = vmatpush1.bf16.msra.mxu1 %v7137_v12 }
 0xf7b   :  { %2974 = vmatprep.subr.bf16.mxu1 %v7138_v48 }
 0xf7e   :  { %2975 = vmatpush1.bf16.msra.mxu1 %v7139_v16 }
 0xf7f   :  { %2976 = vmatprep.subr.bf16.mxu1 %v7140_v20 }
 0xf82   :  { %2977 = vmatpush1.bf16.msra.mxu1 %v7141_v52 }
 0xf83   :  { %2978 = vmatprep.subr.bf16.mxu1 %v7142_v5 }
 0xf86   :  { %2979 = vmatpush1.bf16.msra.mxu1 %v7143_v22 }
 0xf87   :  { %2980 = vmatprep.subr.bf16.mxu1 %v7144_v45 }
 0xf8a   :  { %2981 = vmatpush1.bf16.msra.mxu1 %v7145_v59 }
 0xf8b   :  { %3551 = vmatprep.subr.bf16.mxu1 %v6974_v46 }
 0xfe0   :  { %v2789_v17 = vpop.f32.mrb[64].mxu1 }
 0xfe1   :  { %v2790_v49 = vadd.f32 %v6313_v1, %v2789_v17  ;;  %v3529_v25 = vpop.f32.mrb[65].mxu1  ;;  %v2833_v26 = vpop.f32.mrb[68].mxu0 }
 0xfe2   :  { %v2792_v30 = vpop.f32.mrb[66].mxu1  ;;  %v2835_v32 = vpop.f32.mrb[69].mxu0  ;;  %v2834_v10 = vadd.f32 %v2833_v26, %v5684_v19  ;;  %v4180_v26 = vld [vmem:[#allocation13] sm:$0xff] }
 0xfe3   :  { %2796 = vst [vmem:[#allocation12 + $0x28] sm:$0xff] %v2790_v49  ;;  %v3530_v39 = vpop.f32.mrb[67].mxu1  ;;  %v2837_v8 = vpop.f32.mrb[70].mxu0  ;;  %v2836_v36 = vadd.f32 %v2835_v32, %v5688_v7  ;;  %v6417_v30 = vpack.c.bf16 %v4180_v26, %v4180_v26  ;;  %v4181_v32 = vld [vmem:[#allocation8 + $0x8] ss:$16 sps:$4 sm:$0xff]  }
 0xfe4   :  { %v2838_v34 = vpop.f32.mrb[71].mxu0  ;;  %v3333_v18 = vmul.f32 -1.442695, %v2834_v10  ;;  %v4183_v39 = vld [vmem:[#allocation8 + $0x28] ss:$16 sps:$4 sm:$0xff]  }
 0xfe5   :  { %v3334_v38 = vmul.f32 -1.442695, %v2836_v36  ;;  %v4184_v8 = vld [vmem:[#allocation8 + $0x4c] ss:$16 sps:$4 sm:$0xff]   ;;  %v4185_v34 = vld [vmem:[#allocation8 + $0x48] ss:$16 sps:$4 sm:$0xff]  }
 0xfe6   :  { %v4186_v36 = vld [vmem:[#allocation8 + $0x6c] ss:$16 sps:$4 sm:$0xff]  }
 0xfe7   :  { %4011 = vpow2.f32 %v3334_v38  ;;  %v4188_v10 = vld [vmem:[#allocation8 + $0x8c] ss:$16 sps:$4 sm:$0xff]   ;;  %v4189_v38 = vld [vmem:[#allocation8 + $0x88] ss:$16 sps:$4 sm:$0xff]  }
 0xfe8   :  { %4013 = vpow2.f32 %v3333_v18  ;;  %v4191_v18 = vld [vmem:[#allocation8 + $0xa8] ss:$16 sps:$4 sm:$0xff]  }
 0xff1   :  { %v4012_v44 = vpop.eup %4011 }
 0xff2   :  { %v4014_v13 = vpop.eup %4013  ;;  %v2890_v57 = vadd.f32 1.0, %v4012_v44  ;;  %v4193_v44 = vld [vmem:[#allocation8 + $0xc8] ss:$16 sps:$4 sm:$0xff]  }
 0xff3   :  { %v2884_v9 = vadd.f32 1.0, %v4014_v13  ;;  %v4195_v13 = vld [vmem:[#allocation8 + $0xe8] ss:$16 sps:$4 sm:$0xff]  }
 0xff4   :  { %4015 = vrcp.f32 %v2890_v57 }
 0xff5   :  { %4017 = vrcp.f32 %v2884_v9 }
 0xffe   :  { %v4016_v12 = vpop.eup %4015 }
 0xfff   :  { %v4018_v48 = vpop.eup %4017  ;;  %v2900_v20 = vmul.f32 %v4016_v12, %v6321_v42  ;;  %v4182_v42 = vld [vmem:[#allocation8 + $0x2c] ss:$16 sps:$4 sm:$0xff]  }
0x1020   :  { %v2874_v47 = vpop.f32.mrb[68].mxu1 }
0x1021   :  { %v2875_v62 = vadd.f32 %v2874_v47, %v5699_v35  ;;  %v2876_v27 = vpop.f32.mrb[69].mxu1 }
0x1022   :  { %v2877_v11 = vadd.f32 %v2876_v27, %v5694_v40  ;;  %v2878_v21 = vpop.f32.mrb[70].mxu1 }
0x1023   :  { %4019 = vtanh.f32 %v2875_v62  ;;  %v2879_v0 = vpop.f32.mrb[71].mxu1 }
0x1024   :  { %v3335_v14 = vmul.f32 -1.442695, %v2877_v11 }
0x1026   :  { %4021 = vpow2.f32 %v3335_v14 }
0x102d   :  { %v4020_v16 = vpop.eup %4019 }
0x102e   :  { %v2901_v52 = vmul.f32 %v4020_v16, %v4018_v48 }
0x1030   :  { %v4022_v5 = vpop.eup %4021  ;;  %v6414_v22 = vadd.f32 %v2901_v52, %v2900_v20 }
0x1031   :  { %v2897_v45 = vadd.f32 1.0, %v4022_v5 }
0x1032   :  { %4023 = vtanh.f32 %v6414_v22 }
0x1033   :  { %4025 = vrcp.f32 %v2897_v45 }
0x103c   :  { %v4024_v59 = vpop.eup %4023 }
0x103d   :  { %v4026_v17 = vpop.eup %4025 }
0x103e   :  { %v2904_v49 = vmul.f32 %v4026_v17, %v4024_v59 }
0x1040   :  { %v2905_v25 = vpack.c.bf16 %v2904_v49, %v2904_v49 }
0x1042   :  { %3548 = vmatmul.mubr.bf16.vlgmr.msra.gmra.mrb[72].mxu0 %v2905_v25  ;;  %2982 = vmatprep.mubr.bf16.mxu1 %v2905_v25 }
0x1043   :  { %2992 = vmatpush1.bf16.msra.mxu0 %v4181_v32  ;;  %2983 = vmatmul.mubr.bf16.vlgmr.msra.gmra.mrb[72].mxu1 %v6417_v30 }
0x1044   :  { %3023 = vmatprep.mubr.bf16.mxu0 %v2905_v25  ;;  %2993 = vmatprep.subr.bf16.mxu0 %v4182_v42 }
0x1045   :  { %3552 = vmatpush3.bf16.msra.mxu1 %v6080_v29  ;;  %3567 = vmatprep.mubr.msk.bf16.mxu1 %vm4394_vm0, %v6974_v46  ;;  %v4187_v29 = vld [vmem:[#allocation8 + $0x68] ss:$16 sps:$4 sm:$0xff]  }
0x1046   :  { %3553 = vmatprep.subr.bf16.mxu1 %v6974_v46 }
0x1047   :  { %2994 = vmatpush1.bf16.msra.mxu0 %v4183_v39 }
0x1048   :  { %2995 = vmatprep.subr.bf16.mxu0 %v4184_v8 }
0x1049   :  { %3554 = vmatpush3.bf16.msra.mxu1 %v6088_v6  ;;  %v4190_v6 = vld [vmem:[#allocation8 + $0xac] ss:$16 sps:$4 sm:$0xff]  }
0x104a   :  { %3555 = vmatprep.subr.bf16.mxu1 %v6974_v46 }
0x104b   :  { %2996 = vmatpush1.bf16.msra.mxu0 %v4185_v34 }
0x104c   :  { %2997 = vmatprep.subr.bf16.mxu0 %v4186_v36 }
0x104d   :  { %3556 = vmatpush3.bf16.msra.mxu1 %v6094_v51  ;;  %v4192_v51 = vld [vmem:[#allocation8 + $0xcc] ss:$16 sps:$4 sm:$0xff]  }
0x104e   :  { %3557 = vmatprep.subr.bf16.mxu1 %v6974_v46 }
0x104f   :  { %2998 = vmatpush1.bf16.msra.mxu0 %v4187_v29 }
0x1050   :  { %2999 = vmatprep.subr.bf16.mxu0 %v4188_v10 }
0x1051   :  { %3558 = vmatpush3.bf16.msra.mxu1 %v6100_v41  ;;  %v4194_v41 = vld [vmem:[#allocation8 + $0xec] ss:$16 sps:$4 sm:$0xff]  }
0x1052   :  { %3559 = vmatprep.subr.bf16.mxu1 %v6974_v46 }
0x1053   :  { %3000 = vmatpush1.bf16.msra.mxu0 %v4189_v38 }
0x1054   :  { %3001 = vmatprep.subr.bf16.mxu0 %v4190_v6 }
0x1055   :  { %3560 = vmatpush3.bf16.msra.mxu1 %v6106_v28 }
0x1056   :  { %3561 = vmatprep.subr.bf16.mxu1 %v6974_v46 }
0x1057   :  { %3002 = vmatpush1.bf16.msra.mxu0 %v4191_v18 }
0x1058   :  { %3003 = vmatprep.subr.bf16.mxu0 %v4192_v51 }
0x1059   :  { %3562 = vmatpush3.bf16.msra.mxu1 %v6112_v23 }
0x105a   :  { %3563 = vmatprep.subr.bf16.mxu1 %v6974_v46 }
0x105b   :  { %3004 = vmatpush1.bf16.msra.mxu0 %v4193_v44 }
0x105c   :  { %3005 = vmatprep.subr.bf16.mxu0 %v4194_v41 }
0x105d   :  { %3564 = vmatpush3.bf16.msra.mxu1 %v6118_v2 }
0x105e   :  { %3565 = vmatprep.subr.bf16.mxu1 %v6974_v46 }
0x105f   :  { %3006 = vmatpush1.bf16.msra.mxu0 %v4195_v13 }
0x1060   :  { %3007 = vmatprep.subr.bf16.mxu0 %v6123_v37 }
0x1061   :  { %3566 = vmatpush3.bf16.msra.mxu1 %v6126_v31 }
0x1063   :  { %3008 = vmatpush1.bf16.msra.mxu0 %v7083_v63 }
0x1064   :  { %3009 = vmatprep.subr.bf16.mxu0 %v7084_v53 }
0x1067   :  { %3010 = vmatpush1.bf16.msra.mxu0 %v7085_v58 }
0x1068   :  { %3011 = vmatprep.subr.bf16.mxu0 %v7086_v54 }
0x106b   :  { %3012 = vmatpush1.bf16.msra.mxu0 %v7087_v43 }
0x106c   :  { %3013 = vmatprep.subr.bf16.mxu0 %v7088_v56 }
0x106f   :  { %3014 = vmatpush1.bf16.msra.mxu0 %v7089_v61 }
0x1070   :  { %3015 = vmatprep.subr.bf16.mxu0 %v7090_v60 }
0x1073   :  { %3016 = vmatpush1.bf16.msra.mxu0 %v7091_v50 }
0x1074   :  { %3017 = vmatprep.subr.bf16.mxu0 %v6157_v33 }
0x1077   :  { %3018 = vmatpush1.bf16.msra.mxu0 %v6160_v4 }
0x1078   :  { %3019 = vmatprep.subr.bf16.mxu0 %v6163_v15 }
0x107b   :  { %3020 = vmatpush1.bf16.msra.mxu0 %v6166_v3 }
0x107c   :  { %3021 = vmatprep.subr.bf16.mxu0 %v6169_v24 }
0x107f   :  { %3022 = vmatpush1.bf16.msra.mxu0 %v6172_v55 }
0x1082   :  { %3024 = vmatmul.mubr.bf16.vlgmr.msra.gmra.mrb[76].mxu0 %v6417_v30 }
0x1115   :  { %v2940_v46 = vpop.f32.mrb[72].mxu0 }
0x1116   :  { %v2941_v28 = vadd.f32 %v6313_v1, %v2940_v46  ;;  %v3549_v23 = vpop.f32.mrb[73].mxu0  ;;  %v2984_v2 = vpop.f32.mrb[72].mxu1 }
0x1117   :  { %v2943_v37 = vpop.f32.mrb[74].mxu0  ;;  %v2986_v31 = vpop.f32.mrb[73].mxu1  ;;  %v2985_v3 = vadd.f32 %v2984_v2, %v5684_v19 }
0x1118   :  { %2947 = vst [vmem:[#allocation12 + $0x30] sm:$0xff] %v2941_v28  ;;  %v3550_v33 = vpop.f32.mrb[75].mxu0  ;;  %v2988_v4 = vpop.f32.mrb[74].mxu1  ;;  %v2987_v15 = vadd.f32 %v2986_v31, %v5688_v7 }
0x1119   :  { %v2989_v63 = vpop.f32.mrb[75].mxu1  ;;  %v3336_v53 = vmul.f32 -1.442695, %v2985_v3 }
0x111a   :  { %v3337_v24 = vmul.f32 -1.442695, %v2987_v15 }
0x111c   :  { %4027 = vpow2.f32 %v3337_v24 }
0x111d   :  { %4029 = vpow2.f32 %v3336_v53 }
0x1126   :  { %v4028_v55 = vpop.eup %4027 }
0x1127   :  { %v4030_v58 = vpop.eup %4029  ;;  %v3041_v54 = vadd.f32 1.0, %v4028_v55 }
0x1128   :  { %v3035_v43 = vadd.f32 1.0, %v4030_v58 }
0x1129   :  { %4031 = vrcp.f32 %v3041_v54 }
0x112a   :  { %4033 = vrcp.f32 %v3035_v43 }
0x1133   :  { %v4032_v9 = vpop.eup %4031 }
0x1134   :  { %v4034_v47 = vpop.eup %4033  ;;  %v3051_v27 = vmul.f32 %v4032_v9, %v6414_v22 }
0x1155   :  { %v3025_v56 = vpop.f32.mrb[76].mxu0 }
0x1156   :  { %v3026_v61 = vadd.f32 %v3025_v56, %v5699_v35  ;;  %v3027_v60 = vpop.f32.mrb[77].mxu0 }
0x1157   :  { %v3028_v50 = vadd.f32 %v3027_v60, %v5694_v40  ;;  %v3029_v57 = vpop.f32.mrb[78].mxu0 }
0x1158   :  { %4035 = vtanh.f32 %v3026_v61  ;;  %v3030_v7 = vpop.f32.mrb[79].mxu0 }
0x1159   :  { %v3338_v19 = vmul.f32 -1.442695, %v3028_v50 }
0x115b   :  { %4037 = vpow2.f32 %v3338_v19 }
0x1162   :  { %v4036_v62 = vpop.eup %4035 }
0x1163   :  { %v3052_v11 = vmul.f32 %v4036_v62, %v4034_v47 }
0x1165   :  { %v4038_v21 = vpop.eup %4037  ;;  %v3053_v0 = vadd.f32 %v3052_v11, %v3051_v27 }
0x1166   :  { %v3048_v14 = vadd.f32 1.0, %v4038_v21 }
0x1167   :  { %4039 = vtanh.f32 %v3053_v0  ;;  %3102 = vst [vmem:[#allocation15 + $0x8] sm:$0xff] %v3053_v0 }
0x1168   :  { %4041 = vrcp.f32 %v3048_v14 }
0x1171   :  { %v4040_v35 = vpop.eup %4039 }
0x1172   :  { %v4042_v12 = vpop.eup %4041 }
0x1173   :  { %v3055_v40 = vmul.f32 %v4042_v12, %v4040_v35 }
0x1175   :  { %v3056_v48 = vpack.c.bf16 %v3055_v40, %v3055_v40  ;;  %3100 = vst [vmem:[#allocation13 + $0x8] sm:$0xff] %v3055_v40 }
0x1177   :  { %3568 = vmatmul.mubr.bf16.vlgmr.msra.gmra.mrb[76].mxu1 %v3056_v48 }
0x1178   :  { %4317 = shalt.err (!%p4314_p2)
}
0x1179   :  { %s4318_s19 = scalar_lea.hbm %s6516_s10, 256 }
0x117a   :  { %p4319_p3 = scmp.ne.s32.totalorder %s6516_s10, %s4318_s19  ;;  %p4322_p4 = scmp.lt.u32.totalorder %s4318_s19, %s6516_s10 }
0x117c   :  { %p4324_p5 = pnand %p4322_p4, %p4319_p3 }
0x117e   :  { %4327 = shalt.err (!%p4324_p5)
}
0x117f   :  { %3126 = dma.vmem_to_hbm [thread:$0]  %s3121_s0, 256, %s6516_s10, [#allocation14], %s4389_s5, %s4389_s5, %s4390_s13  }
0x1180   :  { %s4396_s3 = smov [#allocation15]  }
0x1181   :  { %s3132_s27 = sshll.u32 %s4396_s3, 4  ;;  %s3133_s27 = int_to_ptr.vmem [resolvable:$true] %s3132_s27 }
0x1182   :  { %s4328_s8 = scalar_lea.vmem %s3133_s27, 256  ;;  %p4333_p7 = scmp.lt.s32.totalorder %s3133_s27, %s3133_s27 }
0x1183   :  { %p4329_p6 = scmp.ne.s32.totalorder %s3133_s27, %s4328_s8  ;;  %p4334_p8 = scmp.lt.s32.totalorder %s4328_s8, %s4328_s8 }
0x1185   :  { %p4335_p9 = por %p4334_p8, %p4333_p7 }
0x1187   :  { %p4336_p10 = pnand %p4335_p9, %p4329_p6 }
0x1189   :  { %4339 = shalt.err (!%p4336_p10)
}
0x118a   :  { %s4340_s23 = scalar_lea.hbm %s6517_s11, 256 }
0x118b   :  { %p4341_p11 = scmp.ne.s32.totalorder %s6517_s11, %s4340_s23  ;;  %p4344_p12 = scmp.lt.u32.totalorder %s4340_s23, %s6517_s11 }
0x118d   :  { %p4346_p13 = pnand %p4344_p12, %p4341_p11 }
0x118f   :  { %4349 = shalt.err (!%p4346_p13)
}
0x1190   :  { %3138 = dma.vmem_to_hbm [thread:$0]  %s3133_s27, 256, %s6517_s11, [#allocation14], %s4389_s5, %s4389_s5, %s4390_s13  }
0x1191   :  { %s4397_s12 = smov [#allocation12]  }
0x1192   :  { %s3108_s14 = sshll.u32 %s4397_s12, 4  ;;  %s3109_s14 = int_to_ptr.vmem [resolvable:$true] %s3108_s14 }
0x1193   :  { %s4350_s15 = scalar_lea.vmem %s3109_s14, 1024  ;;  %p4355_p1 = scmp.lt.s32.totalorder %s3109_s14, %s3109_s14 }
0x1194   :  { %p4351_p0 = scmp.ne.s32.totalorder %s3109_s14, %s4350_s15  ;;  %p4356_p2 = scmp.lt.s32.totalorder %s4350_s15, %s4350_s15 }
0x1196   :  { %p4357_p3 = por %p4356_p2, %p4355_p1 }
0x1198   :  { %p4358_p4 = pnand %p4357_p3, %p4351_p0 }
0x124a   :  { %v3091_v16 = vpop.f32.mrb[76].mxu1 }
0x124b   :  { %v3092_v20 = vadd.f32 %v6313_v1, %v3091_v16  ;;  %v3569_v52 = vpop.f32.mrb[77].mxu1 }
0x124c   :  { %v3094_v5 = vpop.f32.mrb[78].mxu1 }
0x124d   :  { %3098 = vst [vmem:[#allocation12 + $0x38] sm:$0xff] %v3092_v20  ;;  %v3570_v22 = vpop.f32.mrb[79].mxu1 }
0x124e   :  { %4361 = shalt.err (!%p4358_p4)
}
0x124f   :  { %s4362_s11 = scalar_lea.hbm %s6515_s9, 1024 }
0x1250   :  { %p4363_p5 = scmp.ne.s32.totalorder %s6515_s9, %s4362_s11  ;;  %p4366_p6 = scmp.lt.u32.totalorder %s4362_s11, %s6515_s9 }
0x1252   :  { %p4368_p7 = pnand %p4366_p6, %p4363_p5 }
0x1254   :  { %4371 = shalt.err (!%p4368_p7)
}
0x1255   :  { %3114 = dma.vmem_to_hbm [thread:$0]  %s3109_s14, 1024, %s6515_s9, [#allocation5], %s4389_s5, %s4389_s5, %s4390_s13  }
0x1256   :  { %4378 = dma.done.wait [#allocation5], 1024  }
0x1257   :  { %4379 = vsyncadd [#allocation5], 4294966272 }
0x1258   :  { %4380 = dma.done.wait [#allocation14], 512  }
0x1259   :  { %4381 = vsyncadd [#allocation14], 4294966784 }
0x125a   :  { %3148 = vsyncpa [#allocation4], 1 }
0x125b   :  { %3149 = vsyncpa [#allocation7], 1 }
0x125c   :  { %3150 = vsyncpa [#allocation10], 1 }
0x125d   :  { %3151 = vsyncpa [#allocation5], 1 }
0x125e   :  { %3152 = vsyncpa [#allocation14], 1 }

</bundles_post_ra>
